<compile_context>
chip_gen: v6e
topology: v6e:2x2x1
jax: 0.10.0
libtpu: 0.0.40
codegen_flags: <defaults>
</compile_context>

<pallas_src>
import functools
import math

import jax
import jax.numpy as jnp
from jax.experimental import pallas as pl
from jax.experimental.pallas import tpu as pltpu


def _round_up(v, m):
    return ((v + m - 1) // m) * m


def _conv_bn_kernel(x_ref, w_ref, shift_ref, o_ref, *,
                    toh, ow, kh, kw, stride, dilation):
    """One (batch, output-row-tile) grid step.

    x_ref:     (Cin_p, block_h, Wp)    bf16 input window (halo rows included)
    w_ref:     (KH*KW, Cout_p, Cin_p)  bf16 per-tap BN-folded weights
    shift_ref: (Cout_p, 1)             f32  BN shift (beta - mean*scale)
    o_ref:     (Cout_p, toh*ow)        output tile, lanes = flattened spatial
    """
    cin_p = x_ref.shape[0]
    tm = toh * ow
    acc = None
    for i in range(kh):                       # unrolled kh*kw tap loop
        r0 = i * dilation
        for j in range(kw):
            c0 = j * dilation
            if stride == 1:
                slab = x_ref[:, r0:r0 + toh, c0:c0 + ow]        # (Cin_p, toh, ow)
            else:
                # TODO(synk): stride>1 uses strided value-slices; restructure if
                # this lowers to a slow gather on the target Mosaic version.
                rspan = (toh - 1) * stride + 1
                cspan = (ow - 1) * stride + 1
                full = x_ref[:, r0:r0 + rspan, c0:c0 + cspan]
                slab = jax.lax.slice(full, (0, 0, 0),
                                     (cin_p, rspan, cspan),
                                     (1, stride, stride))
            rhs = slab.reshape(cin_p, tm)                        # (Cin_p, tm) bf16
            part = jnp.dot(w_ref[i * kw + j], rhs,
                           preferred_element_type=jnp.float32)   # (Cout_p, tm) f32
            acc = part if acc is None else acc + part
    o_ref[...] = (acc + shift_ref[...]).astype(o_ref.dtype)


def _pick_toh(oh, ow, n_batch):
    """Output-row tile height with toh*ow a multiple of 128 (lane-dense stores)."""
    unit = 128 // math.gcd(ow, 128)      # smallest toh with (toh*ow) % 128 == 0
    if unit * ow > 8192:
        # Awkward width: whole-image tile (tm == full dim, masked stores).
        return oh
    max_tm = 2048
    k_need = -(-oh // unit)                               # ceil(oh / unit)
    k = max(1, min(max_tm // (unit * ow), k_need))
    # Keep >= 2 grid tiles overall when possible (v7x has 2 TensorCores).
    while n_batch * (-(-oh // (k * unit))) < 2 and k > 1:
        k -= 1
    return k * unit


@functools.partial(jax.jit, static_argnames=("stride", "padding", "dilation"))
def basic_conv2d(x, weight, gamma, beta, running_mean, running_var,
                 stride=1, padding=0, dilation=1, eps=1e-5):
    """x: [N, Cin, H, W] (NCHW). weight: [Cout, Cin, KH, KW]. Returns NCHW."""
    n, cin, h, w = x.shape
    cout, _, kh, kw = weight.shape
    oh = (h + 2 * padding - dilation * (kh - 1) - 1) // stride + 1
    ow = (w + 2 * padding - dilation * (kw - 1) - 1) // stride + 1

    # Fold eval-mode BN: scale into weights, shift added in-kernel.
    inv_std = gamma / jnp.sqrt(running_var + eps)                  # (Cout,)
    shift = beta - running_mean * inv_std                          # (Cout,)
    w_folded = weight * inv_std[:, None, None, None]               # (Cout,Cin,KH,KW)

    cout_p = max(8, _round_up(cout, 8))
    cin_p = max(8, _round_up(cin, 8))

    # Per-tap weight matrices (KH*KW, Cout_p, Cin_p), bf16 for the MXU.
    w_taps = jnp.transpose(w_folded, (2, 3, 0, 1)).reshape(kh * kw, cout, cin)
    w_taps = jnp.pad(w_taps, ((0, 0), (0, cout_p - cout), (0, cin_p - cin)))
    w_taps = w_taps.astype(jnp.bfloat16)
    shift2 = jnp.pad(shift, (0, cout_p - cout)).reshape(cout_p, 1).astype(jnp.float32)

    # Spatial tiling over output rows; tm = toh*ow is a multiple of 128.
    toh = _pick_toh(oh, ow, n)
    n_rt = pl.cdiv(oh, toh)
    oh_pad = n_rt * toh
    tm = toh * ow
    block_h = (toh - 1) * stride + (kh - 1) * dilation + 1

    # Zero-pad input: channels to Cin_p, spatial for conv padding + row-tile pad.
    hp = h + 2 * padding
    wp = w + 2 * padding
    hp_need = (oh_pad - 1) * stride + (kh - 1) * dilation + 1
    pad_bottom = padding + max(0, hp_need - hp)
    xpad = jnp.pad(x, ((0, 0), (0, cin_p - cin),
                       (padding, pad_bottom), (padding, padding)))

    # Unfold H into per-row-tile windows (with halo) so each grid step DMAs a
    # small block instead of the whole image; cast to bf16 once on the host.
    row_idx = (jnp.arange(n_rt)[:, None] * (toh * stride)
               + jnp.arange(block_h)[None, :])                     # (n_rt, block_h)
    x_tiles = xpad[:, :, row_idx, :]                  # (n, Cin_p, n_rt, block_h, Wp)
    x_tiles = jnp.transpose(x_tiles, (0, 2, 1, 3, 4)).astype(jnp.bfloat16)

    kernel = functools.partial(_conv_bn_kernel, toh=toh, ow=ow, kh=kh, kw=kw,
                               stride=stride, dilation=dilation)

    # VMEM budget from actual lane-padded block footprints (double-buffered).
    in_bytes = cin_p * _round_up(block_h, 16) * _round_up(wp, 128) * 2
    w_bytes = kh * kw * _round_up(cout_p, 16) * _round_up(cin_p, 128) * 2
    sh_bytes = _round_up(cout_p, 8) * 128 * 4
    out_bytes = _round_up(cout_p, 8) * _round_up(tm, 128) * 4
    rhs_bytes = _round_up(cin_p, 16) * _round_up(tm, 128) * 2      # relayout scratch
    needed = 2 * (in_bytes + w_bytes + sh_bytes + out_bytes) + 4 * rhs_bytes
    vmem_limit = int(min(max(needed * 2, 32 << 20), 64 << 20))     # v7x ceiling

    out = pl.pallas_call(
        kernel,
        out_shape=jax.ShapeDtypeStruct((n, cout_p, oh_pad * ow), x.dtype),
        grid_spec=pltpu.PrefetchScalarGridSpec(
            num_scalar_prefetch=0,
            grid=(n, n_rt),
            in_specs=[
                pl.BlockSpec((None, None, cin_p, block_h, wp),
                             lambda b, r: (b, r, 0, 0, 0)),
                pl.BlockSpec((kh * kw, cout_p, cin_p), lambda b, r: (0, 0, 0)),
                pl.BlockSpec((cout_p, 1), lambda b, r: (0, 0)),
            ],
            out_specs=pl.BlockSpec((None, cout_p, tm), lambda b, r: (b, 0, r)),
        ),
        compiler_params=pltpu.CompilerParams(
            dimension_semantics=("parallel", "parallel"),
            vmem_limit_bytes=vmem_limit),
    )(x_tiles, w_taps, shift2)

    # Drop channel / row padding; output is already NCHW (no transpose needed).
    out = out[:, :cout, :].reshape(n, cout, oh_pad, ow)[:, :, :oh, :]
    return out


if __name__ == "__main__":
    key = jax.random.PRNGKey(0)
    k_x, k_w, k_g, k_b, k_m, k_v = jax.random.split(key, 6)

    # Module config: BasicConv2d(in_planes=4, out_planes=8, kernel_size=3, padding=1)
    N, Cin, H, W = 2, 4, 16, 16
    Cout, KH, KW = 8, 3, 3
    stride, padding, dilation = 1, 1, 1

    x = jax.random.normal(k_x, (N, Cin, H, W), dtype=jnp.float32)
    weight = jax.random.normal(k_w, (Cout, Cin, KH, KW), dtype=jnp.float32) * 0.1
    gamma = jax.random.normal(k_g, (Cout,), dtype=jnp.float32) * 0.1 + 1.0
    beta = jax.random.normal(k_b, (Cout,), dtype=jnp.float32) * 0.1
    running_mean = jax.random.normal(k_m, (Cout,), dtype=jnp.float32) * 0.1
    running_var = jax.random.uniform(k_v, (Cout,), dtype=jnp.float32,
                                     minval=0.5, maxval=1.5)

    out = basic_conv2d(x, weight, gamma, beta, running_mean, running_var,
                       stride=stride, padding=padding, dilation=dilation)
    out = jax.block_until_ready(out)

    # Self-check against XLA conv (f32) + eval-mode affine BN.
    eps = 1e-5
    ref_conv = jax.lax.conv_general_dilated(
        x, weight, window_strides=(stride, stride),
        padding=[(padding, padding), (padding, padding)],
        rhs_dilation=(dilation, dilation),
        dimension_numbers=("NCHW", "OIHW", "NCHW"))
    ref = (ref_conv - running_mean[None, :, None, None]) / jnp.sqrt(
        running_var[None, :, None, None] + eps)
    ref = ref * gamma[None, :, None, None] + beta[None, :, None, None]

    assert out.shape == (N, Cout, H, W)
    # bf16 matmul operands -> loose tolerance against the pure-f32 reference.
    assert jnp.allclose(out, ref, atol=3e-2, rtol=3e-2), \
        float(jnp.max(jnp.abs(out - ref)))
    print("KERNEL_OK")
</pallas_src>

<mosaic_0001>
module attributes {stable_mosaic.version = 11 : i64} {
  func.func @_conv_bn_kernel(%arg0: i32, %arg1: i32, %arg2: memref<1x1x8x18x18xbf16, #tpu.memory_space<vmem>>, %arg3: memref<9x8x8xbf16, #tpu.memory_space<vmem>>, %arg4: memref<8x1xf32, #tpu.memory_space<vmem>>, %arg5: memref<1x8x256xf32, #tpu.memory_space<vmem>>) attributes {dimension_semantics = [#tpu.dimension_semantics<parallel>, #tpu.dimension_semantics<parallel>], iteration_bounds = array<i64: 2, 1>, scalar_prefetch = 0 : i64, scratch_operands = 0 : i64, tpu.core_type = #tpu.core_type<tc>, window_params = [{transform_indices = @transform_0, window_bounds = array<i64: 1, 1, 8, 18, 18>}, {pipeline_mode = #tpu.pipeline_mode<synchronous>, transform_indices = @transform_1, window_bounds = array<i64: 9, 8, 8>}, {pipeline_mode = #tpu.pipeline_mode<synchronous>, transform_indices = @transform_2, window_bounds = array<i64: 8, 1>}, {transform_indices = @transform_3, window_bounds = array<i64: 1, 8, 256>}]} {
    %c0 = arith.constant 0 : index
    %c0_0 = arith.constant 0 : index
    %c0_1 = arith.constant 0 : index
    %c0_2 = arith.constant 0 : index
    %c0_3 = arith.constant 0 : index
    %0 = vector.load %arg2[%c0, %c0_0, %c0_1, %c0_2, %c0_3] : memref<1x1x8x18x18xbf16, #tpu.memory_space<vmem>>, vector<1x1x8x16x16xbf16>
    %1 = vector.shape_cast %0 : vector<1x1x8x16x16xbf16> to vector<8x16x16xbf16>
    %2 = vector.shape_cast %1 : vector<8x16x16xbf16> to vector<8x256xbf16>
    %c0_4 = arith.constant 0 : index
    %c0_5 = arith.constant 0 : index
    %c0_6 = arith.constant 0 : index
    %3 = vector.load %arg3[%c0_4, %c0_5, %c0_6] : memref<9x8x8xbf16, #tpu.memory_space<vmem>>, vector<1x8x8xbf16>
    %4 = vector.shape_cast %3 : vector<1x8x8xbf16> to vector<8x8xbf16>
    %cst = arith.constant dense<0.000000e+00> : vector<8x256xf32>
    %5 = tpu.matmul %4, %2, %cst {dimension_numbers = #tpu.dot_dimension_numbers<[1], [0], [0], [1], [0, 0, 1, 1], [], []>} : vector<8x8xbf16>, vector<8x256xbf16>, vector<8x256xf32> -> vector<8x256xf32>
    %c0_7 = arith.constant 0 : index
    %c0_8 = arith.constant 0 : index
    %c0_9 = arith.constant 0 : index
    %c0_10 = arith.constant 0 : index
    %c1 = arith.constant 1 : index
    %6 = vector.load %arg2[%c0_7, %c0_8, %c0_9, %c0_10, %c1] : memref<1x1x8x18x18xbf16, #tpu.memory_space<vmem>>, vector<1x1x8x16x16xbf16>
    %7 = vector.shape_cast %6 : vector<1x1x8x16x16xbf16> to vector<8x16x16xbf16>
    %8 = vector.shape_cast %7 : vector<8x16x16xbf16> to vector<8x256xbf16>
    %c1_11 = arith.constant 1 : index
    %c0_12 = arith.constant 0 : index
    %c0_13 = arith.constant 0 : index
    %9 = vector.load %arg3[%c1_11, %c0_12, %c0_13] : memref<9x8x8xbf16, #tpu.memory_space<vmem>>, vector<1x8x8xbf16>
    %10 = vector.shape_cast %9 : vector<1x8x8xbf16> to vector<8x8xbf16>
    %cst_14 = arith.constant dense<0.000000e+00> : vector<8x256xf32>
    %11 = tpu.matmul %10, %8, %cst_14 {dimension_numbers = #tpu.dot_dimension_numbers<[1], [0], [0], [1], [0, 0, 1, 1], [], []>} : vector<8x8xbf16>, vector<8x256xbf16>, vector<8x256xf32> -> vector<8x256xf32>
    %12 = arith.addf %5, %11 : vector<8x256xf32>
    %c0_15 = arith.constant 0 : index
    %c0_16 = arith.constant 0 : index
    %c0_17 = arith.constant 0 : index
    %c0_18 = arith.constant 0 : index
    %c2 = arith.constant 2 : index
    %13 = vector.load %arg2[%c0_15, %c0_16, %c0_17, %c0_18, %c2] : memref<1x1x8x18x18xbf16, #tpu.memory_space<vmem>>, vector<1x1x8x16x16xbf16>
    %14 = vector.shape_cast %13 : vector<1x1x8x16x16xbf16> to vector<8x16x16xbf16>
    %15 = vector.shape_cast %14 : vector<8x16x16xbf16> to vector<8x256xbf16>
    %c2_19 = arith.constant 2 : index
    %c0_20 = arith.constant 0 : index
    %c0_21 = arith.constant 0 : index
    %16 = vector.load %arg3[%c2_19, %c0_20, %c0_21] : memref<9x8x8xbf16, #tpu.memory_space<vmem>>, vector<1x8x8xbf16>
    %17 = vector.shape_cast %16 : vector<1x8x8xbf16> to vector<8x8xbf16>
    %cst_22 = arith.constant dense<0.000000e+00> : vector<8x256xf32>
    %18 = tpu.matmul %17, %15, %cst_22 {dimension_numbers = #tpu.dot_dimension_numbers<[1], [0], [0], [1], [0, 0, 1, 1], [], []>} : vector<8x8xbf16>, vector<8x256xbf16>, vector<8x256xf32> -> vector<8x256xf32>
    %19 = arith.addf %12, %18 : vector<8x256xf32>
    %c0_23 = arith.constant 0 : index
    %c0_24 = arith.constant 0 : index
    %c0_25 = arith.constant 0 : index
    %c1_26 = arith.constant 1 : index
    %c0_27 = arith.constant 0 : index
    %20 = vector.load %arg2[%c0_23, %c0_24, %c0_25, %c1_26, %c0_27] : memref<1x1x8x18x18xbf16, #tpu.memory_space<vmem>>, vector<1x1x8x16x16xbf16>
    %21 = vector.shape_cast %20 : vector<1x1x8x16x16xbf16> to vector<8x16x16xbf16>
    %22 = vector.shape_cast %21 : vector<8x16x16xbf16> to vector<8x256xbf16>
    %c3 = arith.constant 3 : index
    %c0_28 = arith.constant 0 : index
    %c0_29 = arith.constant 0 : index
    %23 = vector.load %arg3[%c3, %c0_28, %c0_29] : memref<9x8x8xbf16, #tpu.memory_space<vmem>>, vector<1x8x8xbf16>
    %24 = vector.shape_cast %23 : vector<1x8x8xbf16> to vector<8x8xbf16>
    %cst_30 = arith.constant dense<0.000000e+00> : vector<8x256xf32>
    %25 = tpu.matmul %24, %22, %cst_30 {dimension_numbers = #tpu.dot_dimension_numbers<[1], [0], [0], [1], [0, 0, 1, 1], [], []>} : vector<8x8xbf16>, vector<8x256xbf16>, vector<8x256xf32> -> vector<8x256xf32>
    %26 = arith.addf %19, %25 : vector<8x256xf32>
    %c0_31 = arith.constant 0 : index
    %c0_32 = arith.constant 0 : index
    %c0_33 = arith.constant 0 : index
    %c1_34 = arith.constant 1 : index
    %c1_35 = arith.constant 1 : index
    %27 = vector.load %arg2[%c0_31, %c0_32, %c0_33, %c1_34, %c1_35] : memref<1x1x8x18x18xbf16, #tpu.memory_space<vmem>>, vector<1x1x8x16x16xbf16>
    %28 = vector.shape_cast %27 : vector<1x1x8x16x16xbf16> to vector<8x16x16xbf16>
    %29 = vector.shape_cast %28 : vector<8x16x16xbf16> to vector<8x256xbf16>
    %c4 = arith.constant 4 : index
    %c0_36 = arith.constant 0 : index
    %c0_37 = arith.constant 0 : index
    %30 = vector.load %arg3[%c4, %c0_36, %c0_37] : memref<9x8x8xbf16, #tpu.memory_space<vmem>>, vector<1x8x8xbf16>
    %31 = vector.shape_cast %30 : vector<1x8x8xbf16> to vector<8x8xbf16>
    %cst_38 = arith.constant dense<0.000000e+00> : vector<8x256xf32>
    %32 = tpu.matmul %31, %29, %cst_38 {dimension_numbers = #tpu.dot_dimension_numbers<[1], [0], [0], [1], [0, 0, 1, 1], [], []>} : vector<8x8xbf16>, vector<8x256xbf16>, vector<8x256xf32> -> vector<8x256xf32>
    %33 = arith.addf %26, %32 : vector<8x256xf32>
    %c0_39 = arith.constant 0 : index
    %c0_40 = arith.constant 0 : index
    %c0_41 = arith.constant 0 : index
    %c1_42 = arith.constant 1 : index
    %c2_43 = arith.constant 2 : index
    %34 = vector.load %arg2[%c0_39, %c0_40, %c0_41, %c1_42, %c2_43] : memref<1x1x8x18x18xbf16, #tpu.memory_space<vmem>>, vector<1x1x8x16x16xbf16>
    %35 = vector.shape_cast %34 : vector<1x1x8x16x16xbf16> to vector<8x16x16xbf16>
    %36 = vector.shape_cast %35 : vector<8x16x16xbf16> to vector<8x256xbf16>
    %c5 = arith.constant 5 : index
    %c0_44 = arith.constant 0 : index
    %c0_45 = arith.constant 0 : index
    %37 = vector.load %arg3[%c5, %c0_44, %c0_45] : memref<9x8x8xbf16, #tpu.memory_space<vmem>>, vector<1x8x8xbf16>
    %38 = vector.shape_cast %37 : vector<1x8x8xbf16> to vector<8x8xbf16>
    %cst_46 = arith.constant dense<0.000000e+00> : vector<8x256xf32>
    %39 = tpu.matmul %38, %36, %cst_46 {dimension_numbers = #tpu.dot_dimension_numbers<[1], [0], [0], [1], [0, 0, 1, 1], [], []>} : vector<8x8xbf16>, vector<8x256xbf16>, vector<8x256xf32> -> vector<8x256xf32>
    %40 = arith.addf %33, %39 : vector<8x256xf32>
    %c0_47 = arith.constant 0 : index
    %c0_48 = arith.constant 0 : index
    %c0_49 = arith.constant 0 : index
    %c2_50 = arith.constant 2 : index
    %c0_51 = arith.constant 0 : index
    %41 = vector.load %arg2[%c0_47, %c0_48, %c0_49, %c2_50, %c0_51] : memref<1x1x8x18x18xbf16, #tpu.memory_space<vmem>>, vector<1x1x8x16x16xbf16>
    %42 = vector.shape_cast %41 : vector<1x1x8x16x16xbf16> to vector<8x16x16xbf16>
    %43 = vector.shape_cast %42 : vector<8x16x16xbf16> to vector<8x256xbf16>
    %c6 = arith.constant 6 : index
    %c0_52 = arith.constant 0 : index
    %c0_53 = arith.constant 0 : index
    %44 = vector.load %arg3[%c6, %c0_52, %c0_53] : memref<9x8x8xbf16, #tpu.memory_space<vmem>>, vector<1x8x8xbf16>
    %45 = vector.shape_cast %44 : vector<1x8x8xbf16> to vector<8x8xbf16>
    %cst_54 = arith.constant dense<0.000000e+00> : vector<8x256xf32>
    %46 = tpu.matmul %45, %43, %cst_54 {dimension_numbers = #tpu.dot_dimension_numbers<[1], [0], [0], [1], [0, 0, 1, 1], [], []>} : vector<8x8xbf16>, vector<8x256xbf16>, vector<8x256xf32> -> vector<8x256xf32>
    %47 = arith.addf %40, %46 : vector<8x256xf32>
    %c0_55 = arith.constant 0 : index
    %c0_56 = arith.constant 0 : index
    %c0_57 = arith.constant 0 : index
    %c2_58 = arith.constant 2 : index
    %c1_59 = arith.constant 1 : index
    %48 = vector.load %arg2[%c0_55, %c0_56, %c0_57, %c2_58, %c1_59] : memref<1x1x8x18x18xbf16, #tpu.memory_space<vmem>>, vector<1x1x8x16x16xbf16>
    %49 = vector.shape_cast %48 : vector<1x1x8x16x16xbf16> to vector<8x16x16xbf16>
    %50 = vector.shape_cast %49 : vector<8x16x16xbf16> to vector<8x256xbf16>
    %c7 = arith.constant 7 : index
    %c0_60 = arith.constant 0 : index
    %c0_61 = arith.constant 0 : index
    %51 = vector.load %arg3[%c7, %c0_60, %c0_61] : memref<9x8x8xbf16, #tpu.memory_space<vmem>>, vector<1x8x8xbf16>
    %52 = vector.shape_cast %51 : vector<1x8x8xbf16> to vector<8x8xbf16>
    %cst_62 = arith.constant dense<0.000000e+00> : vector<8x256xf32>
    %53 = tpu.matmul %52, %50, %cst_62 {dimension_numbers = #tpu.dot_dimension_numbers<[1], [0], [0], [1], [0, 0, 1, 1], [], []>} : vector<8x8xbf16>, vector<8x256xbf16>, vector<8x256xf32> -> vector<8x256xf32>
    %54 = arith.addf %47, %53 : vector<8x256xf32>
    %c0_63 = arith.constant 0 : index
    %c0_64 = arith.constant 0 : index
    %c0_65 = arith.constant 0 : index
    %c2_66 = arith.constant 2 : index
    %c2_67 = arith.constant 2 : index
    %55 = vector.load %arg2[%c0_63, %c0_64, %c0_65, %c2_66, %c2_67] : memref<1x1x8x18x18xbf16, #tpu.memory_space<vmem>>, vector<1x1x8x16x16xbf16>
    %56 = vector.shape_cast %55 : vector<1x1x8x16x16xbf16> to vector<8x16x16xbf16>
    %57 = vector.shape_cast %56 : vector<8x16x16xbf16> to vector<8x256xbf16>
    %c8 = arith.constant 8 : index
    %c0_68 = arith.constant 0 : index
    %c0_69 = arith.constant 0 : index
    %58 = vector.load %arg3[%c8, %c0_68, %c0_69] : memref<9x8x8xbf16, #tpu.memory_space<vmem>>, vector<1x8x8xbf16>
    %59 = vector.shape_cast %58 : vector<1x8x8xbf16> to vector<8x8xbf16>
    %cst_70 = arith.constant dense<0.000000e+00> : vector<8x256xf32>
    %60 = tpu.matmul %59, %57, %cst_70 {dimension_numbers = #tpu.dot_dimension_numbers<[1], [0], [0], [1], [0, 0, 1, 1], [], []>} : vector<8x8xbf16>, vector<8x256xbf16>, vector<8x256xf32> -> vector<8x256xf32>
    %61 = arith.addf %54, %60 : vector<8x256xf32>
    %c0_71 = arith.constant 0 : index
    %c0_72 = arith.constant 0 : index
    %62 = vector.load %arg4[%c0_71, %c0_72] : memref<8x1xf32, #tpu.memory_space<vmem>>, vector<8x1xf32>
    %63 = vector.broadcast %62 : vector<8x1xf32> to vector<8x256xf32>
    %64 = arith.addf %61, %63 : vector<8x256xf32>
    %c0_73 = arith.constant 0 : index
    %c0_74 = arith.constant 0 : index
    %c0_75 = arith.constant 0 : index
    %65 = vector.load %arg5[%c0_73, %c0_74, %c0_75] : memref<1x8x256xf32, #tpu.memory_space<vmem>>, vector<1x8x256xf32>
    %66 = vector.shape_cast %65 : vector<1x8x256xf32> to vector<8x256xf32>
    %67 = vector.shape_cast %64 : vector<8x256xf32> to vector<1x8x256xf32>
    tpu.vector_store %arg5[%c0_73, %c0_74, %c0_75], %67 {strides = array<i32>} : memref<1x8x256xf32, #tpu.memory_space<vmem>>, vector<1x8x256xf32>,
    return
  }
  func.func @transform_0(%arg0: i32, %arg1: i32) -> (i32, i32, i32, i32, i32) {
    %c0_i32 = arith.constant 0 : i32
    %c0_i32_0 = arith.constant 0 : i32
    %c0_i32_1 = arith.constant 0 : i32
    %c0_i32_2 = arith.constant 0 : i32
    return %arg0, %arg1, %c0_i32, %c0_i32_0, %c0_i32_1 : i32, i32, i32, i32, i32
  }
  func.func @transform_1(%arg0: i32, %arg1: i32) -> (i32, i32, i32) {
    %c0_i32 = arith.constant 0 : i32
    %c0_i32_0 = arith.constant 0 : i32
    %c0_i32_1 = arith.constant 0 : i32
    %c0_i32_2 = arith.constant 0 : i32
    return %c0_i32, %c0_i32_0, %c0_i32_1 : i32, i32, i32
  }
  func.func @transform_2(%arg0: i32, %arg1: i32) -> (i32, i32) {
    %c0_i32 = arith.constant 0 : i32
    %c0_i32_0 = arith.constant 0 : i32
    %c0_i32_1 = arith.constant 0 : i32
    return %c0_i32, %c0_i32_0 : i32, i32
  }
  func.func @transform_3(%arg0: i32, %arg1: i32) -> (i32, i32, i32) {
    %c0_i32 = arith.constant 0 : i32
    %c0_i32_0 = arith.constant 0 : i32
    return %arg0, %c0_i32, %arg1 : i32, i32, i32
  }
}

</mosaic_0001>

<bundles_post_ra>
// kernel: basic_conv2d.1
= control target key start
LH: loop header
LB: loop body
LE: loop exit
PB: predicated region body
PF: predicated region fallthrough
CT: control target
= control target key end

     0   :  { %s4850_s12 = smov 0   ;;  %s4852_s13 = smov 0   ;;  %s7262_s0 = inlined_call_operand.vmem [shape: bf16[2,1,8,18,18], index: 0, kind: input, shape index: {}]   ;;  %s7263_s1 = inlined_call_operand.vmem [shape: bf16[9,8,8], index: 1, kind: input, shape index: {}]   ;;  %s7264_s2 = inlined_call_operand.vmem [shape: f32[8,1], index: 2, kind: input, shape index: {}]   ;;  %s7265_s3 = inlined_call_operand.vmem [shape: f32[2,8,256], index: 3, kind: output, shape index: {}]  }
   0x1   :  { %s4854_s14 = smov 0  }
   0x2 LB: > { %s25_s15 = sadd.s32 1, %s4812_s13  ;;  %p4565_p0 = scmp.ge.s32.totalorder %s4816_s14, 1  ;;  %s4816_s14 = sphi %s4854_s14, %s13_s14   ;;  %s4812_s13 = sphi %s4852_s13, %s7486_s13   ;;  %s4808_s12 = sphi %s4850_s12, %s7485_s12  }
   0x3   : > { %p27_p1 = scmp.ge.s32.totalorder %s25_s15, 2  ;;  %p157_p2 = scmp.lt.s32.totalorder %s4816_s14, 3 }
   0x5   : > { %s7488_s15 = smov (%p27_p1, %s25_s15), 0  ;;  %p158_p3 = pnand %p4565_p0, %p157_p2 }
   0x7   : > { %161 = sbr.rel (%p158_p3) target bundleno = 864 (0x360), region = 32 }
   0xc   : > { %p189_p4 = scmp.lt.s32.totalorder %s4808_s12, 1  ;;  %v229_v0 = vlaneseq  ;;  %v4818_v1 = vmov 1983009808   ;;  %v7266_v3 = vmov 0   ;;  %v4820_v6 = vmov 1934713408  }
   0xd   : > { %v227_v2 = vunpack.c.l.s4 %v4818_v1  ;;  %880 = vmatprep.mubr.bf16.mxu0 %v7266_v3  ;;  %928 = vmatprep.mubr.bf16.mxu1 %v7266_v3  ;;  %v244_v7 = vunpack.c.l.s4 %v4820_v6  ;;  %s4821_s20 = smov 64   ;;  %s4822_s21 = smov 16   ;;  %vm1363_vm0 = vsmask.f32 3328  ;;  %vm1364_vm1 = vsmask.f32 7440 }
   0xe   : > { %s7490_s12 = smov (!%p189_p4, %s4808_s12), 1  ;;  %v230_v5 = vshrl.u32 %v229_v0, 7  ;;  %4785 = vset.pattern.permute.xlu0 %v7266_v3  ;;  %s4823_s22 = smov 96   ;;  %vm5088_vm2 = vmor %vm1363_vm0, %vm1364_vm1  ;;  %vm465_vm3 = vcmask 130048   ;;  %vm469_vm4 = vcmask 261120   ;;  %vm472_vm5 = vcmask 392192  }
   0xf   : > { %v228_v4 = vunpack.c.0.s8 %v227_v2  ;;  %s4748_s16 = smul.u32 96, %s7490_s12  ;;  %v245_v12 = vunpack.c.0.s8 %v244_v7  ;;  %s4824_s23 = smov 32   ;;  %vm475_vm6 = vcmask 523264   ;;  %vm478_vm7 = vcmask 654336  }
  0x10   : > { %s4825_s24 = smov 80   ;;  %s4826_s25 = smov 48   ;;  %vm481_vm8 = vcmask 785408   ;;  %vm484_vm9 = vcmask 916480   ;;  %vm843_vm10 = vcmask 1043456   ;;  %vm3116_vm11 = vcmask 1042432  }
  0x11   : > { %s4877_s19 = scalar_lea.vmem %s7262_s0, %s4748_s16  ;;  %v4888_v11 = vsub.s32 %v228_v4, %v230_v5  ;;  %v4925_v26 = vsub.s32 %v245_v12, %v230_v5  ;;  %s4827_s26 = smov 112   ;;  %vm3117_vm12 = vcmask 1046532   ;;  %vm839_vm14 = vcmask 64512  }
  0x12   : > { %v4880_v8 = vld [vmem:[%s4877_s19 + $0x4] sm:$0xf]  ;;  %v4883_v9 = vld [vmem:[%s4877_s19 + $0x10] sm:$0xf]  ;;  %v4886_v10 = vld [vmem:[%s4877_s19 + $0x1c] sm:$0xf] }
  0x13   : > { %v4891_v13 = vld [vmem:[%s4877_s19 + $0x28] sm:$0xf]  ;;  %v4894_v14 = vld [vmem:[%s4877_s19 + $0x34] sm:$0xf]  ;;  %v4897_v15 = vld [vmem:[%s4877_s19 + $0x40] sm:$0xf] }
  0x14   : > { %v4900_v16 = vld [vmem:[%s4877_s19 + $0x4c] sm:$0xf]  ;;  %v4903_v17 = vld [vmem:[%s4877_s19 + $0x58] sm:$0xf]  ;;  %v293_v18 = vcombine.low %v4880_v8, %v4894_v14  ;;  %v327_v19 = vcombine.low %v4883_v9, %v4897_v15  ;;  %v4910_v20 = vld [vmem:[%s4877_s19] sm:$0xf] }
  0x15   : > { %v301_v21 = vcombine.low %v4886_v10, %v4900_v16  ;;  %v335_v22 = vcombine.low %v4891_v13, %v4903_v17  ;;  %v4917_v23 = vld [vmem:[%s4877_s19 + $0xc] sm:$0xf]  ;;  %v4920_v24 = vld [vmem:[%s4877_s19 + $0x18] sm:$0xf]  ;;  %v4923_v25 = vld [vmem:[%s4877_s19 + $0x24] sm:$0xf] }
  0x16   : > { %7313 = vst [vmem:[#allocation2_spill] sm:$0xff] %v4925_v26  ;;  %v300_v27 = vrot.slane %v293_v18, %v4888_v11  ;;  %v334_v28 = vrot.slane %v327_v19, %v4888_v11  ;;  %v4930_v29 = vld [vmem:[%s4877_s19 + $0x30] sm:$0xf]  ;;  %v4933_v30 = vld [vmem:[%s4877_s19 + $0x3c] sm:$0xf]  ;;  %s4828_s27 = smov 127   ;;  %vm5413_vm13 = vmor %vm3116_vm11, %vm3117_vm12 }
  0x17   : > { %v4936_v31 = vld [vmem:[%s4877_s19 + $0x48] sm:$0xf]  ;;  %v308_v32 = vrot.slane %v301_v21, %v4888_v11  ;;  %v342_v33 = vrot.slane %v335_v22, %v4888_v11  ;;  %v4941_v34 = vld [vmem:[%s4877_s19 + $0x54] sm:$0xf]  ;;  %v225_v35 = vcombine.low %v4910_v20, %v4930_v29  ;;  %v259_v37 = vcombine.low %v4917_v23, %v4933_v30  ;;  %s4829_s28 = smov 126  }
  0x18   : > { %v233_v36 = vcombine.low %v4920_v24, %v4936_v31  ;;  %v267_v38 = vcombine.low %v4923_v25, %v4941_v34 }
  0x19   : > { %v310_v39 = vcombine.high %v300_v27, %v308_v32  ;;  %v343_v40 = vcombine.low %v334_v28, %v342_v33  ;;  %v344_v41 = vcombine.high %v334_v28, %v342_v33  ;;  %v309_v42 = vcombine.low %v300_v27, %v308_v32 }
  0x1a   : > { %v232_v43 = vrot.slane %v225_v35, %v4888_v11  ;;  %v240_v44 = vrot.slane %v233_v36, %v4888_v11  ;;  %v266_v45 = vrot.slane %v259_v37, %v4888_v11  ;;  %v274_v46 = vrot.slane %v267_v38, %v4888_v11 }
  0x1b   : > { %v324_v47 = vrot.slane %v310_v39, %v4925_v26  ;;  %v358_v48 = vrot.slane %v344_v41, %v4925_v26  ;;  %v4958_v49 = vrot.slane %v309_v42, %v4925_v26  ;;  %v4961_v50 = vrot.slane %v343_v40, %v4925_v26 }
  0x1c   : > { %v242_v51 = vcombine.high %v232_v43, %v240_v44  ;;  %v275_v52 = vcombine.low %v266_v45, %v274_v46  ;;  %v276_v53 = vcombine.high %v266_v45, %v274_v46  ;;  %v241_v54 = vcombine.low %v232_v43, %v240_v44 }
  0x1d   : > { %v399_v55 = vpack.i.b16 %v358_v48, %v324_v47  ;;  %v388_v61 = vshrl.u32 %v4958_v49, 16  ;;  %v389_v62 = vshrl.u32 %v4961_v50, 16  ;;  %v400_v32 = vshrl.u32 %v324_v47, 16 }
  0x1e   : > { %v256_v56 = vrot.slane %v242_v51, %v4925_v26  ;;  %v290_v57 = vrot.slane %v276_v53, %v4925_v26  ;;  %v4966_v58 = vrot.slane %v241_v54, %v4925_v26  ;;  %v4969_v59 = vrot.slane %v275_v52, %v4925_v26 }
  0x1f   : > { %v4579_v60 = vcombine.low %v399_v55, %v399_v55  ;;  %v390_v28 = vpack.i.b16 %v389_v62, %v388_v61  ;;  %v401_v33 = vshrl.u32 %v358_v48, 16  ;;  %v325_v38 = vcombine.high %v4958_v49, %v7266_v3 }
  0x20   : > { %v375_v63 = vpack.i.b16 %v290_v57, %v256_v56  ;;  %v258_v0 = vcombine.high %v256_v56, %v7266_v3  ;;  %v292_v1 = vcombine.high %v290_v57, %v7266_v3  ;;  %v364_v2 = vshrl.u32 %v4966_v58, 16 }
  0x21   : > { %451 = vrot.lane.b32.xlu0 %v4579_v60, %s4821_s20  ;;  %v365_v4 = vshrl.u32 %v4969_v59, 16  ;;  %v257_v5 = vcombine.high %v4966_v58, %v7266_v3  ;;  %v291_v6 = vcombine.high %v4969_v59, %v7266_v3  ;;  %v376_v21 = vshrl.u32 %v256_v56, 16 }
  0x22   : > { %v4572_v7 = vcombine.low %v375_v63, %v375_v63  ;;  %v381_v12 = vpack.i.b16 %v292_v1, %v258_v0  ;;  %v377_v22 = vshrl.u32 %v290_v57, 16  ;;  %v359_v39 = vcombine.high %v4961_v50, %v7266_v3 }
  0x23   : > { %v366_v18 = vpack.i.b16 %v365_v4, %v364_v2  ;;  %v369_v19 = vpack.i.b16 %v291_v6, %v257_v5  ;;  %v4576_v40 = vcombine.low %v390_v28, %v390_v28  ;;  %v402_v41 = vpack.i.b16 %v401_v33, %v400_v32  ;;  %v1903_v32 = vld [vmem:[%s4877_s19 + $0x1c] sm:$0xf] }
  0x24   : > { %423 = vrot.lane.b32.xlu1 %v4572_v7, %s4821_s20  ;;  %v4574_v27 = vcombine.low %v381_v12, %v381_v12  ;;  %v378_v37 = vpack.i.b16 %v377_v22, %v376_v21  ;;  %v370_v42 = vshrl.u32 %v257_v5, 16  ;;  %v371_v43 = vshrl.u32 %v291_v6, 16  ;;  %v947_v33 = vld [vmem:[%s4877_s19 + $0x3c] sm:$0xf] }
  0x25   : > { %v4569_v35 = vcombine.low %v366_v18, %v366_v18  ;;  %v4570_v36 = vcombine.low %v369_v19, %v369_v19  ;;  %v363_v44 = vpack.i.b16 %v4969_v59, %v4966_v58  ;;  %v387_v45 = vpack.i.b16 %v4961_v50, %v4958_v49 }
  0x26   : > { %v4573_v46 = vcombine.low %v378_v37, %v378_v37  ;;  %v393_v51 = vpack.i.b16 %v359_v39, %v325_v38  ;;  %v326_v52 = vcombine.high %v324_v47, %v7266_v3  ;;  %v360_v53 = vcombine.high %v358_v48, %v7266_v3 }
  0x27   : > { %411 = vrot.lane.b32.xlu0 %v4569_v35, %s4822_s21  ;;  %v4580_v54 = vcombine.low %v402_v41, %v402_v41  ;;  %v372_v55 = vpack.i.b16 %v371_v43, %v370_v42  ;;  %v394_v56 = vshrl.u32 %v325_v38, 16  ;;  %v395_v57 = vshrl.u32 %v359_v39, 16  ;;  %v1902_v35 = vld [vmem:[%s4877_s19 + $0x18] sm:$0xf] }
  0x28   : > { %431 = vrot.lane.b32.xlu1 %v4574_v27, %s4823_s22  ;;  %v4577_v60 = vcombine.low %v393_v51, %v393_v51  ;;  %v405_v61 = vpack.i.b16 %v360_v53, %v326_v52  ;;  %v382_v62 = vshrl.u32 %v258_v0, 16  ;;  %v383_v63 = vshrl.u32 %v292_v1, 16  ;;  %v946_v1 = vld [vmem:[%s4877_s19 + $0x34] sm:$0xf] }
  0x29   : > { %v4571_v2 = vcombine.low %v372_v55, %v372_v55  ;;  %v396_v4 = vpack.i.b16 %v395_v57, %v394_v56  ;;  %v406_v47 = vshrl.u32 %v326_v52, 16  ;;  %v407_v5 = vshrl.u32 %v360_v53, 16  ;;  %v1901_v51 = vld [vmem:[%s4877_s19 + $0x14] sm:$0x1]  ;;  %v949_v56 = vld [vmem:[%s4877_s19 + $0x48] sm:$0xf] }
  0x2a   : > { %v4581_v48 = vcombine.low %v405_v61, %v405_v61  ;;  %v384_v6 = vpack.i.b16 %v383_v63, %v382_v62  ;;  %v1969_v55 = vshrl.u32 %v1902_v35, 16  ;;  %v1906_v61 = vld [vmem:[%s4877_s19 + $0x28] sm:$0xf]  ;;  %v1905_v63 = vld [vmem:[%s4877_s19 + $0x24] sm:$0xf] }
  0x2b   : > { %415 = vrot.lane.b32.xlu0 %v4570_v36, %s4824_s23  ;;  %v4578_v7 = vcombine.low %v396_v4, %v396_v4  ;;  %v408_v12 = vpack.i.b16 %v407_v5, %v406_v47  ;;  %v1898_v36 = vld [vmem:[%s4877_s19 + $0x8] sm:$0x1]  ;;  %v1964_v5 = vshll.u32 %v1901_v51, 16 }
  0x2c   : > { %439 = vrot.lane.b32.xlu1 %v4576_v40, %s4822_s21  ;;  %v4575_v18 = vcombine.low %v384_v6, %v384_v6  ;;  %v948_v40 = vld [vmem:[%s4877_s19 + $0x40] sm:$0xf]  ;;  %v1940_v57 = vshll.u32 %v1898_v36, 16 }
  0x2d   : > { %v4582_v0 = vcombine.low %v408_v12, %v408_v12 }
  0x2f   : > { %427 = vrot.lane.b32.xlu0 %v4573_v46, %s4825_s24  ;;  %v1978_v46 = vshll.u32 %v1903_v32, 16 }
  0x30   : > { %455 = vrot.lane.b32.xlu1 %v4580_v54, %s4825_s24  ;;  %v1982_v54 = vshrl.u32 %v1903_v32, 16 }
  0x32   : > { %v1984_v12 = vrot.slane %v1982_v54, 4 }
  0x33   : > { %443 = vrot.lane.b32.xlu0 %v4577_v60, %s4824_s23  ;;  %v1972_v60 = vshll.u32 %v1902_v35, 16 }
  0x34   : > { %419 = vrot.lane.b32.xlu1 %v4571_v2, %s4826_s25  ;;  %v950_v2 = vld [vmem:[%s4877_s19 + $0x4c] sm:$0xf] }
  0x37   : > { %459 = vrot.lane.b32.xlu0 %v4581_v48, %s4823_s22  ;;  %v5079_v48 = vrot.slane %v1978_v46, 5 }
  0x38   : > { %447 = vrot.lane.b32.xlu1 %v4578_v7, %s4826_s25  ;;  %v1904_v7 = vld [vmem:[%s4877_s19 + $0x20] sm:$0x1] }
  0x3b   : > { %435 = vrot.lane.b32.xlu0 %v4575_v18, %s4827_s26  ;;  %v1971_v18 = vrot.slane %v1969_v55, 4 }
  0x3c   : > { %463 = vrot.lane.b32.xlu1 %v4582_v0, %s4827_s26  ;;  %v2002_v0 = vshll.u32 %v1906_v61, 16 }
  0x3f   : > { %519 = vrot.lane.b32.xlu0 %v4910_v20, %s4828_s27  ;;  %v1897_v20 = vld [vmem:[%s4877_s19 + $0x4] sm:$0xf] }
  0x40   : > { %521 = vrot.lane.b32.xlu1 %v4880_v8, %s4828_s27  ;;  %v937_v8 = vld [vmem:[%s4877_s19] sm:$0xf]  ;;  %v1934_v19 = vshrl.u32 %v1897_v20, 16 }
  0x42   : > { %v1936_v41 = vrot.slane %v1934_v19, 4  ;;  %v1909_v19 = vld [vmem:[%s4877_s19 + $0x34] sm:$0xf] }
  0x43   : > { %523 = vrot.lane.b32.xlu0 %v4917_v23, %s4828_s27  ;;  %v1896_v23 = vld [vmem:[%s4877_s19] sm:$0xf] }
  0x44   : > { %525 = vrot.lane.b32.xlu1 %v4883_v9, %s4828_s27  ;;  %v938_v9 = vld [vmem:[%s4877_s19 + $0x4] sm:$0xf] }
  0x47   : > { %527 = vrot.lane.b32.xlu0 %v4920_v24, %s4828_s27  ;;  %v1900_v24 = vld [vmem:[%s4877_s19 + $0x10] sm:$0xf] }
  0x48   : > { %529 = vrot.lane.b32.xlu1 %v4886_v10, %s4828_s27  ;;  %v939_v10 = vld [vmem:[%s4877_s19 + $0xc] sm:$0xf]  ;;  %v1954_v21 = vshll.u32 %v1900_v24, 16  ;;  %v1958_v22 = vshrl.u32 %v1900_v24, 16  ;;  %v1966_v24 = vrot.slane %v1964_v5, 5 }
  0x4a   : > { %v5068_v42 = vrot.slane %v1954_v21, 5  ;;  %v1960_v43 = vrot.slane %v1958_v22, 4 }
  0x4b   : > { %531 = vrot.lane.b32.xlu0 %v4923_v25, %s4828_s27  ;;  %v1899_v25 = vld [vmem:[%s4877_s19 + $0xc] sm:$0xf] }
  0x4c   : > { %533 = vrot.lane.b32.xlu1 %v4891_v13, %s4828_s27  ;;  %v940_v13 = vld [vmem:[%s4877_s19 + $0x10] sm:$0xf]  ;;  %v1945_v27 = vshrl.u32 %v1899_v25, 16  ;;  %v1948_v28 = vshll.u32 %v1899_v25, 16  ;;  %v1961_v47 = vor.u32 %v1960_v43, %v5068_v42  ;;  %v1988_v25 = vshll.u32 %v1904_v7, 16 }
  0x4e   : > { %v1947_v52 = vrot.slane %v1945_v27, 4  ;;  %v1950_v53 = vrot.slane %v1948_v28, 5 }
  0x4f   : > { %535 = vrot.lane.b32.xlu0 %v4930_v29, %s4828_s27  ;;  %v945_v29 = vld [vmem:[%s4877_s19 + $0x30] sm:$0xf] }
  0x50   : > { %537 = vrot.lane.b32.xlu1 %v4894_v14, %s4828_s27  ;;  %v941_v14 = vld [vmem:[%s4877_s19 + $0x18] sm:$0xf]  ;;  %v1951_v6 = vor.u32 %v1950_v53, %v1947_v52  ;;  %v1990_v52 = vrot.slane %v1988_v25, 5 }
  0x53   : > { %539 = vrot.lane.b32.xlu0 %v4933_v30, %s4828_s27  ;;  %v1930_v30 = vshll.u32 %v1897_v20, 16 }
  0x54   : > { %541 = vrot.lane.b32.xlu1 %v4897_v15, %s4828_s27  ;;  %v942_v15 = vld [vmem:[%s4877_s19 + $0x1c] sm:$0xf] }
  0x55   : > { %v5065_v37 = vrot.slane %v1930_v30, 5  ;;  %v1962_v30 = vrot.slane %v1961_v47, 4  ;;  %v1910_v47 = vld [vmem:[%s4877_s19 + $0x38] sm:$0x1] }
  0x57   : > { %543 = vrot.lane.b32.xlu0 %v4936_v31, %s4828_s27  ;;  %v1921_v31 = vshrl.u32 %v1896_v23, 16  ;;  %v1937_v4 = vor.u32 %v1936_v41, %v5065_v37  ;;  %v1911_v41 = vld [vmem:[%s4877_s19 + $0x3c] sm:$0xf]  ;;  %v1967_v43 = vsel %vm5088_vm2, %v1962_v30, %v1966_v24 }
  0x58   : > { %545 = vrot.lane.b32.xlu1 %v4900_v16, %s4828_s27  ;;  %v943_v16 = vld [vmem:[%s4877_s19 + $0x24] sm:$0xf] }
  0x59   : > { %v1923_v38 = vrot.slane %v1921_v31, 4  ;;  %v1938_v20 = vrot.slane %v1937_v4, 4  ;;  %v1952_v31 = vrot.slane %v1951_v6, 4 }
  0x5b   : > { %547 = vrot.lane.b32.xlu0 %v4941_v34, %s4828_s27  ;;  %v1924_v34 = vshll.u32 %v1896_v23, 16  ;;  %v1942_v23 = vrot.slane %v1940_v57, 5  ;;  %v1957_v46 = vsel %vm5088_vm2, %v1952_v31, %v5068_v42 }
  0x5c   : > { %549 = vrot.lane.b32.xlu1 %v4903_v17, %s4828_s27  ;;  %v944_v17 = vld [vmem:[%s4877_s19 + $0x28] sm:$0xf] }
  0x5d   : > { %v1926_v39 = vrot.slane %v1924_v34, 5  ;;  %v1985_v34 = vor.u32 %v1984_v12, %v5079_v48 }
  0x5f   : > { %969 = vrot.lane.b32.xlu0 %v937_v8, %s4829_s28  ;;  %v1927_v62 = vor.u32 %v1926_v39, %v1923_v38  ;;  %v1974_v8 = vrot.slane %v1972_v60, 5  ;;  %v1943_v38 = vsel %vm5088_vm2, %v1938_v20, %v1942_v23  ;;  %v2026_v39 = vshll.u32 %v1909_v19, 16 }
  0x60   : > { %971 = vrot.lane.b32.xlu1 %v938_v9, %s4829_s28  ;;  %v2006_v9 = vshrl.u32 %v1906_v61, 16  ;;  %v1986_v51 = vrot.slane %v1985_v34, 4  ;;  %v2041_v61 = vshrl.u32 %v1911_v41, 16 }
  0x61   : > { %v1975_v21 = vor.u32 %v1974_v8, %v1971_v18 }
  0x62   : > { %v2008_v22 = vrot.slane %v2006_v9, 4  ;;  %v1991_v5 = vsel %vm5088_vm2, %v1986_v51, %v1990_v52  ;;  %v2043_v8 = vrot.slane %v2041_v61, 4 }
  0x63   : > { %973 = vrot.lane.b32.xlu0 %v939_v10, %s4829_s28  ;;  %v1993_v10 = vshrl.u32 %v1905_v63, 16  ;;  %v1976_v53 = vrot.slane %v1975_v21, 4 }
  0x64   : > { %975 = vrot.lane.b32.xlu1 %v940_v13, %s4829_s28  ;;  %v1996_v13 = vshll.u32 %v1905_v63, 16  ;;  %v2028_v63 = vrot.slane %v2026_v39, 5 }
  0x65   : > { %v1995_v27 = vrot.slane %v1993_v10, 4  ;;  %v1981_v6 = vsel %vm5088_vm2, %v1976_v53, %v5079_v48 }
  0x66   : > { %v1998_v28 = vrot.slane %v1996_v13, 5  ;;  %v2036_v13 = vshll.u32 %v1910_v47, 16 }
  0x67   : > { %977 = vrot.lane.b32.xlu0 %v941_v14, %s4829_s28  ;;  %v952_v14 = vld [vmem:[%s4877_s19 + $0x58] sm:$0xf] }
  0x68   : > { %979 = vrot.lane.b32.xlu1 %v942_v15, %s4829_s28  ;;  %v951_v15 = vld [vmem:[%s4877_s19 + $0x54] sm:$0xf] }
  0x6b   : > { %981 = vrot.lane.b32.xlu0 %v943_v16, %s4829_s28  ;;  %v1928_v16 = vrot.slane %v1927_v62, 4  ;;  %v2044_v62 = vshll.u32 %v1911_v41, 16 }
  0x6c   : > { %983 = vrot.lane.b32.xlu1 %v944_v17, %s4829_s28 }
  0x6d   : > { %v1933_v32 = vsel %vm5088_vm2, %v1928_v16, %v5065_v37  ;;  %v1912_v37 = vld [vmem:[%s4877_s19 + $0x40] sm:$0xf]  ;;  %v2046_v9 = vrot.slane %v2044_v62, 5  ;;  %v1913_v16 = vld [vmem:[%s4877_s19 + $0x44] sm:$0x1] }
  0x6e   : > { %v2050_v4 = vshll.u32 %v1912_v37, 16  ;;  %v2054_v42 = vshrl.u32 %v1912_v37, 16  ;;  %v2060_v31 = vshll.u32 %v1913_v16, 16 }
  0x6f   : > { %985 = vrot.lane.b32.xlu0 %v945_v29, %s4829_s28  ;;  %v1908_v29 = vld [vmem:[%s4877_s19 + $0x30] sm:$0xf]  ;;  %v2047_v24 = vor.u32 %v2046_v9, %v2043_v8 }
  0x70   : > { %987 = vrot.lane.b32.xlu1 %v946_v1, %s4829_s28  ;;  %v2004_v1 = vrot.slane %v2002_v0, 5  ;;  %v2017_v35 = vshrl.u32 %v1908_v29, 16  ;;  %v2020_v36 = vshll.u32 %v1908_v29, 16  ;;  %v2038_v29 = vrot.slane %v2036_v13, 5 }
  0x72   : > { %v2009_v54 = vor.u32 %v2008_v22, %v2004_v1  ;;  %v2019_v57 = vrot.slane %v2017_v35, 4  ;;  %v2022_v60 = vrot.slane %v2020_v36, 5 }
  0x73   : > { %989 = vrot.lane.b32.xlu0 %v947_v33, %s4829_s28  ;;  %v1907_v33 = vld [vmem:[%s4877_s19 + $0x2c] sm:$0x1] }
  0x74   : > { %991 = vrot.lane.b32.xlu1 %v948_v40, %s4829_s28  ;;  %v2030_v40 = vshrl.u32 %v1909_v19, 16  ;;  %v2012_v55 = vshll.u32 %v1907_v33, 16  ;;  %v2010_v7 = vrot.slane %v2009_v54, 4  ;;  %v2023_v0 = vor.u32 %v2022_v60, %v2019_v57 }
  0x75   : > { %v2048_v19 = vrot.slane %v2047_v24, 4 }
  0x76   : > { %v2014_v12 = vrot.slane %v2012_v55, 5  ;;  %v2024_v23 = vrot.slane %v2023_v0, 4 }
  0x77   : > { %993 = vrot.lane.b32.xlu0 %v949_v56, %s4829_s28  ;;  %v1999_v56 = vor.u32 %v1998_v28, %v1995_v27  ;;  %v2062_v27 = vrot.slane %v2060_v31, 5 }
  0x78   : > { %995 = vrot.lane.b32.xlu1 %v950_v2, %s4829_s28  ;;  %v2032_v2 = vrot.slane %v2030_v40, 4  ;;  %v2015_v48 = vsel %vm5088_vm2, %v2010_v7, %v2014_v12  ;;  %v2029_v34 = vsel %vm5088_vm2, %v2024_v23, %v2028_v63 }
  0x79   : > { %v2000_v18 = vrot.slane %v1999_v56, 4 }
  0x7a   : > { %v2033_v10 = vor.u32 %v2032_v2, %v2028_v63 }
  0x7b   : > { %997 = vrot.lane.b32.xlu0 %v951_v15, %s4829_s28  ;;  %v2056_v15 = vrot.slane %v2054_v42, 4  ;;  %v2005_v20 = vsel %vm5088_vm2, %v2000_v18, %v2004_v1 }
  0x7c   : > { %999 = vrot.lane.b32.xlu1 %v952_v14, %s4829_s28  ;;  %v2052_v14 = vrot.slane %v2050_v4, 5  ;;  %v2034_v25 = vrot.slane %v2033_v10, 4 }
  0x7e   : > { %v2057_v30 = vor.u32 %v2056_v15, %v2052_v14  ;;  %v2039_v21 = vsel %vm5088_vm2, %v2034_v25, %v2038_v29  ;;  %v2053_v1 = vsel %vm5088_vm2, %v2048_v19, %v2052_v14 }
  0x7f   : > { %2112 = vrot.lane.b32.xlu0 %v1933_v32, %s4828_s27 }
  0x80   : > { %2114 = vrot.lane.b32.xlu1 %v1943_v38, %s4828_s27  ;;  %v2058_v22 = vrot.slane %v2057_v30, 4 }
  0x82   : > { %v2063_v28 = vsel %vm5088_vm2, %v2058_v22, %v2062_v27 }
  0x83   : > { %2116 = vrot.lane.b32.xlu0 %v1957_v46, %s4828_s27 }
  0x84   : > { %2118 = vrot.lane.b32.xlu1 %v1967_v43, %s4828_s27 }
  0x87   : > { %2120 = vrot.lane.b32.xlu0 %v1981_v6, %s4828_s27 }
  0x88   : > { %2122 = vrot.lane.b32.xlu1 %v1991_v5, %s4828_s27 }
  0x8b   : > { %2124 = vrot.lane.b32.xlu0 %v2005_v20, %s4828_s27 }
  0x8c   : > { %2126 = vrot.lane.b32.xlu1 %v2015_v48, %s4828_s27 }
  0x8f   : > { %2128 = vrot.lane.b32.xlu0 %v2029_v34, %s4828_s27  ;;  %v1914_v34 = vld [vmem:[%s4877_s19 + $0x48] sm:$0xf] }
  0x90   : > { %2130 = vrot.lane.b32.xlu1 %v2039_v21, %s4828_s27 }
  0x93   : > { %v452_v32 = vpop.permute.xlu0 %451  ;;  %2132 = vrot.lane.b32.xlu0 %v2053_v1, %s4828_s27 }
  0x94   : > { %2134 = vrot.lane.b32.xlu1 %v2063_v28, %s4828_s27 }
  0x96   : > { %v424_v33 = vpop.permute.xlu1 %423 }
  0x99   : > { %v412_v35 = vpop.permute.xlu0 %411 }
  0x9a   : > { %v432_v36 = vpop.permute.xlu1 %431  ;;  %v468_v43 = vsel %vm465_vm3, %v363_v44, %v412_v35  ;;  %v1915_v35 = vld [vmem:[%s4877_s19 + $0x4c] sm:$0xf] }
  0x9d   : > { %v416_v38 = vpop.permute.xlu0 %415 }
  0x9e   : > { %v440_v39 = vpop.permute.xlu1 %439  ;;  %v471_v51 = vsel %vm469_vm4, %v468_v43, %v416_v38 }
  0x9f   : > { %v489_v54 = vsel %vm465_vm3, %v387_v45, %v440_v39 }
  0xa1   : > { %v428_v40 = vpop.permute.xlu0 %427 }
  0xa2   : > { %v456_v41 = vpop.permute.xlu1 %455 }
  0xa5   : > { %v444_v46 = vpop.permute.xlu0 %443 }
  0xa6   : > { %v420_v52 = vpop.permute.xlu1 %419  ;;  %v491_v58 = vsel %vm469_vm4, %v489_v54, %v444_v46  ;;  %v2078_v54 = vshrl.u32 %v1915_v35, 16 }
  0xa7   : > { %v474_v37 = vsel %vm472_vm5, %v471_v51, %v420_v52 }
  0xa8   : > { %v477_v53 = vsel %vm475_vm6, %v474_v37, %v424_v33 }
  0xa9   : > { %v460_v55 = vpop.permute.xlu0 %459  ;;  %v480_v44 = vsel %vm478_vm7, %v477_v53, %v428_v40  ;;  %v2074_v53 = vshll.u32 %v1915_v35, 16 }
  0xaa   : > { %v448_v59 = vpop.permute.xlu1 %447  ;;  %v483_v49 = vsel %vm481_vm8, %v480_v44, %v432_v36  ;;  %v2065_v36 = vshrl.u32 %v1914_v34, 16 }
  0xab   : > { %v493_v56 = vsel %vm472_vm5, %v491_v58, %v448_v59 }
  0xac   : > { %v495_v57 = vsel %vm475_vm6, %v493_v56, %v452_v32  ;;  %v2067_v44 = vrot.slane %v2065_v36, 4 }
  0xad   : > { %v497_v60 = vsel %vm478_vm7, %v495_v57, %v456_v41  ;;  %v436_v61 = vpop.permute.xlu0 %435  ;;  %v2068_v41 = vshll.u32 %v1914_v34, 16 }
  0xae   : > { %v499_v50 = vsel %vm481_vm8, %v497_v60, %v460_v55  ;;  %v464_v45 = vpop.permute.xlu1 %463  ;;  %v486_v62 = vsel %vm484_vm9, %v483_v49, %v436_v61 }
  0xaf   : > { %v501_v63 = vsel %vm484_vm9, %v499_v50, %v464_v45  ;;  %v892_v2 = vsel %vm843_vm10, %v486_v62, 0  ;;  %v2070_v61 = vrot.slane %v2068_v41, 5 }
  0xb0   : > { %4600 = vmatprep.subr.msk.bf16.mxu1 %vm843_vm10, %v501_v63 }
  0xb1   : > { %911 = vmatpush1.bf16.msra.mxu1 %v892_v2  ;;  %v520_v4 = vpop.permute.xlu0 %519 }
  0xb2   : > { %v522_v42 = vpop.permute.xlu1 %521 }
  0xb5   : > { %v524_v47 = vpop.permute.xlu0 %523 }
  0xb6   : > { %v526_v5 = vpop.permute.xlu1 %525 }
  0xb9   : > { %v528_v6 = vpop.permute.xlu0 %527 }
  0xba   : > { %v530_v7 = vpop.permute.xlu1 %529 }
  0xbd   : > { %v532_v12 = vpop.permute.xlu0 %531 }
  0xbe   : > { %v534_v18 = vpop.permute.xlu1 %533 }
  0xc1   : > { %v536_v0 = vpop.permute.xlu0 %535 }
  0xc2   : > { %v538_v8 = vpop.permute.xlu1 %537  ;;  %v567_v13 = vcombine.low %v520_v4, %v536_v0 }
  0xc3   : > { %v635_v48 = vcombine.low %v522_v42, %v538_v8  ;;  %v1917_v42 = vld [vmem:[%s4877_s19 + $0x54] sm:$0xf] }
  0xc4   : > { %v574_v23 = vrot.slane %v567_v13, %v4888_v11 }
  0xc5   : > { %v540_v9 = vpop.permute.xlu0 %539  ;;  %v642_v27 = vrot.slane %v635_v48, %v4888_v11 }
  0xc6   : > { %v542_v10 = vpop.permute.xlu1 %541  ;;  %v601_v24 = vcombine.low %v524_v47, %v540_v9 }
  0xc7   : > { %v669_v29 = vcombine.low %v526_v5, %v542_v10  ;;  %v1916_v10 = vld [vmem:[%s4877_s19 + $0x50] sm:$0x1] }
  0xc8   : > { %v608_v28 = vrot.slane %v601_v24, %v4888_v11 }
  0xc9   : > { %v544_v14 = vpop.permute.xlu0 %543  ;;  %v676_v38 = vrot.slane %v669_v29, %v4888_v11 }
  0xca   : > { %v546_v15 = vpop.permute.xlu1 %545  ;;  %v575_v16 = vcombine.low %v528_v6, %v544_v14  ;;  %v2071_v14 = vor.u32 %v2070_v61, %v2067_v44 }
  0xcb   : > { %v643_v20 = vcombine.low %v530_v7, %v546_v15  ;;  %v5208_v7 = vrot.slane %v2074_v53, 5  ;;  %v2080_v15 = vrot.slane %v2078_v54, 4 }
  0xcc   : > { %v582_v25 = vrot.slane %v575_v16, %v4888_v11  ;;  %v2089_v16 = vshrl.u32 %v1917_v42, 16 }
  0xcd   : > { %v650_v30 = vrot.slane %v643_v20, %v4888_v11  ;;  %v548_v31 = vpop.permute.xlu0 %547 }
  0xce   : > { %v583_v19 = vcombine.low %v574_v23, %v582_v25  ;;  %v550_v21 = vpop.permute.xlu1 %549  ;;  %v609_v22 = vcombine.low %v532_v12, %v548_v31  ;;  %v584_v32 = vcombine.high %v574_v23, %v582_v25  ;;  %v1918_v12 = vld [vmem:[%s4877_s19 + $0x58] sm:$0xf]  ;;  %v2092_v23 = vshll.u32 %v1917_v42, 16 }
  0xcf   : > { %v677_v1 = vcombine.low %v534_v18, %v550_v21  ;;  %v652_v39 = vcombine.high %v642_v27, %v650_v30  ;;  %v651_v56 = vcombine.low %v642_v27, %v650_v30  ;;  %v2098_v24 = vshll.u32 %v1918_v12, 16 }
  0xd0   : > { %v616_v33 = vrot.slane %v609_v22, %v4888_v11  ;;  %v5174_v43 = vrot.slane %v583_v19, %v4925_v26  ;;  %v598_v55 = vrot.slane %v584_v32, %v4925_v26  ;;  %v2084_v31 = vshll.u32 %v1916_v10, 16  ;;  %v2482_v32 = vld [vmem:[%s4877_s19] sm:$0xf] }
  0xd1   : > { %v684_v40 = vrot.slane %v677_v1, %v4888_v11  ;;  %v5182_v57 = vrot.slane %v652_v39, %v4925_v26  ;;  %v5212_v18 = vrot.slane %v651_v56, %v4925_v26  ;;  %v2102_v22 = vshrl.u32 %v1918_v12, 16 }
  0xd2   : > { %7316 = vst [vmem:[#allocation3_spill] sm:$0xff] %v5174_v43  ;;  %v617_v46 = vcombine.low %v608_v28, %v616_v33  ;;  %v618_v51 = vcombine.high %v608_v28, %v616_v33  ;;  %v5190_v45 = vcombine.high %v5174_v43, %v7266_v3  ;;  %v706_v4 = vshrl.u32 %v5174_v43, 16  ;;  %v4004_v33 = vld [vmem:[%s4877_s19 + $0x44] sm:$0x1] }
  0xd3   : > { %v685_v52 = vcombine.low %v676_v38, %v684_v40  ;;  %v686_v37 = vcombine.high %v676_v38, %v684_v40  ;;  %7319 = vst [vmem:[#allocation6_spill] sm:$0xff] %v5212_v18  ;;  %v5217_v13 = vcombine.high %v598_v55, %v7266_v3  ;;  %v718_v48 = vshrl.u32 %v598_v55, 16  ;;  %v2483_v40 = vld [vmem:[%s4877_s19 + $0x4] sm:$0xf] }
  0xd4   : > { %v5178_v58 = vrot.slane %v617_v46, %v4925_v26  ;;  %v632_v59 = vrot.slane %v618_v51, %v4925_v26  ;;  %v667_v21 = vcombine.high %v5212_v18, %v7266_v3  ;;  %v730_v27 = vshrl.u32 %v5212_v18, 16 }
  0xd5   : > { %v5185_v60 = vrot.slane %v686_v37, %v4925_v26  ;;  %v5197_v63 = vrot.slane %v685_v52, %v4925_v26  ;;  %v5231_v1 = vrot.slane %v2071_v14, 4  ;;  %v2081_v28 = vor.u32 %v2080_v15, %v5208_v7 }
  0xd6   : > { %7317 = vst [vmem:[#allocation4_spill] sm:$0xff] %v5178_v58  ;;  %v717_v49 = vpack.i.b16 %v632_v59, %v598_v55  ;;  %v707_v50 = vshrl.u32 %v5178_v58, 16  ;;  %v5194_v62 = vcombine.high %v5178_v58, %v7266_v3  ;;  %v5206_v6 = vcombine.high %v632_v59, %v7266_v3 }
  0xd7   : > { %7318 = vst [vmem:[#allocation5_spill] sm:$0xff] %v5197_v63  ;;  %v741_v2 = vpack.i.b16 %v5185_v60, %v5182_v57  ;;  %v719_v9 = vshrl.u32 %v632_v59, 16  ;;  %v5222_v20 = vcombine.high %v5197_v63, %v7266_v3  ;;  %v731_v30 = vshrl.u32 %v5197_v63, 16  ;;  %v1353_v63 = vld [vmem:[%s4877_s19 + $0x38] sm:$0x1] }
  0xd8   : > { %v4586_v47 = vcombine.low %v717_v49, %v717_v49  ;;  %v711_v5 = vpack.i.b16 %v5194_v62, %v5190_v45  ;;  %v708_v8 = vpack.i.b16 %v707_v50, %v706_v4  ;;  %v723_v29 = vpack.i.b16 %v5206_v6, %v5217_v13 }
  0xd9   : > { %v4593_v0 = vcombine.low %v741_v2, %v741_v2  ;;  %v720_v19 = vpack.i.b16 %v719_v9, %v718_v48  ;;  %v735_v35 = vpack.i.b16 %v5222_v20, %v667_v21  ;;  %v2091_v36 = vrot.slane %v2089_v16, 4 }
  0xda   : > { %765 = vrot.lane.b32.xlu1 %v4586_v47, %s4821_s20  ;;  %v4584_v25 = vcombine.low %v711_v5, %v711_v5  ;;  %v4583_v34 = vcombine.low %v708_v8, %v708_v8  ;;  %v2094_v38 = vrot.slane %v2092_v23, 5  ;;  %v5239_v39 = vrot.slane %v2098_v24, 5  ;;  %v1919_v5 = vld [vmem:[%s4877_s19 + $0x5c] sm:$0x1] }
  0xdb   : > { %793 = vrot.lane.b32.xlu0 %v4593_v0, %s4821_s20  ;;  %v4588_v41 = vcombine.low %v723_v29, %v723_v29  ;;  %v732_v46 = vpack.i.b16 %v731_v30, %v730_v27  ;;  %v713_v51 = vshrl.u32 %v5194_v62, 16  ;;  %v743_v52 = vshrl.u32 %v5185_v60, 16 }
  0xdc   : > { %v4587_v37 = vcombine.low %v720_v19, %v720_v19  ;;  %v2104_v53 = vrot.slane %v2102_v22, 4  ;;  %v2507_v54 = vshrl.u32 %v2482_v32, 16  ;;  %v2510_v55 = vshll.u32 %v2482_v32, 16 }
  0xdd   : > { %v712_v59 = vshrl.u32 %v5190_v45, 16  ;;  %v742_v44 = vshrl.u32 %v5182_v57, 16  ;;  %v2516_v56 = vshll.u32 %v2483_v40, 16  ;;  %v4591_v49 = vcombine.low %v735_v35, %v735_v35 }
  0xde   : > { %757 = vrot.lane.b32.xlu1 %v4584_v25, %s4824_s23  ;;  %v2520_v50 = vshrl.u32 %v2483_v40, 16  ;;  %v668_v62 = vcombine.high %v5182_v57, %v7266_v3  ;;  %v702_v2 = vcombine.high %v5185_v60, %v7266_v3  ;;  %v4590_v4 = vcombine.low %v732_v46, %v732_v46 }
  0xdf   : > { %753 = vrot.lane.b32.xlu0 %v4583_v34, %s4822_s21  ;;  %v714_v42 = vpack.i.b16 %v713_v51, %v712_v59  ;;  %v744_v47 = vpack.i.b16 %v743_v52, %v742_v44  ;;  %v737_v45 = vshrl.u32 %v5222_v20, 16  ;;  %v725_v12 = vshrl.u32 %v5206_v6, 16  ;;  %v2485_v20 = vld [vmem:[%s4877_s19 + $0xc] sm:$0xf]  ;;  %v2486_v6 = vld [vmem:[%s4877_s19 + $0x10] sm:$0xf] }
  0xe0   : > { %v5257_v0 = vpack.i.b16 %v702_v2, %v668_v62  ;;  %v748_v8 = vshrl.u32 %v668_v62, 16  ;;  %v749_v9 = vshrl.u32 %v702_v2, 16  ;;  %v736_v57 = vshrl.u32 %v667_v21, 16  ;;  %v2488_v51 = vld [vmem:[%s4877_s19 + $0x18] sm:$0xf]  ;;  %v5289_v62 = vpop.permute.xlu0 %969 }
  0xe1   : > { %v2082_v10 = vrot.slane %v2081_v28, 4  ;;  %v2086_v14 = vrot.slane %v2084_v31, 5  ;;  %v2095_v60 = vor.u32 %v2094_v38, %v2091_v36  ;;  %v724_v15 = vshrl.u32 %v5217_v13, 16  ;;  %v2484_v13 = vld [vmem:[%s4877_s19 + $0x8] sm:$0x1] }
  0xe2   : > { %773 = vrot.lane.b32.xlu1 %v4588_v41, %s4823_s22  ;;  %v2105_v16 = vor.u32 %v2104_v53, %v5239_v39  ;;  %v2108_v48 = vshll.u32 %v1919_v5, 16  ;;  %v5265_v23 = vpack.i.b16 %v749_v9, %v748_v8  ;;  %v4594_v24 = vcombine.low %v744_v47, %v744_v47  ;;  %v2489_v52 = vld [vmem:[%s4877_s19 + $0x1c] sm:$0xf]  ;;  %v5280_v53 = vpop.permute.xlu1 %971  ;;  %v2491_v44 = vld [vmem:[%s4877_s19 + $0x24] sm:$0xf] }
  0xe3   : > { %769 = vrot.lane.b32.xlu0 %v4587_v37, %s4825_s24  ;;  %v738_v25 = vpack.i.b16 %v737_v45, %v736_v57  ;;  %v2509_v29 = vrot.slane %v2507_v54, 4  ;;  %v2512_v30 = vrot.slane %v2510_v55, 5  ;;  %v4585_v34 = vcombine.low %v714_v42, %v714_v42  ;;  %v2487_v2 = vld [vmem:[%s4877_s19 + $0x14] sm:$0x1] }
  0xe4   : > { %v726_v19 = vpack.i.b16 %v725_v12, %v724_v15  ;;  %v5267_v31 = vrot.slane %v2516_v56, 5  ;;  %v2522_v21 = vrot.slane %v2520_v50, 4  ;;  %v2531_v22 = vshrl.u32 %v2485_v20, 16  ;;  %v2492_v56 = vld [vmem:[%s4877_s19 + $0x28] sm:$0xf] }
  0xe5   : > { %v2534_v27 = vshll.u32 %v2485_v20, 16  ;;  %v2540_v28 = vshll.u32 %v2486_v6, 16  ;;  %v2544_v32 = vshrl.u32 %v2486_v6, 16  ;;  %v2077_v35 = vsel %vm5088_vm2, %v5231_v1, %v5208_v7  ;;  %v2494_v6 = vld [vmem:[%s4877_s19 + $0x30] sm:$0xf] }
  0xe6   : > { %781 = vrot.lane.b32.xlu1 %v4590_v4, %s4822_s21  ;;  %v2096_v36 = vrot.slane %v2095_v60, 4  ;;  %v4592_v38 = vcombine.low %v738_v25, %v738_v25  ;;  %v2087_v40 = vsel %vm5088_vm2, %v2082_v10, %v2086_v14  ;;  %v2106_v41 = vrot.slane %v2105_v16, 4  ;;  %v5302_v25 = vpop.permute.xlu1 %975 }
  0xe7   : > { %785 = vrot.lane.b32.xlu0 %v4591_v49, %s4824_s23  ;;  %v2110_v46 = vrot.slane %v2108_v48, 5  ;;  %v4589_v37 = vcombine.low %v726_v19, %v726_v19  ;;  %v2513_v54 = vor.u32 %v2512_v30, %v2509_v29  ;;  %v2523_v55 = vor.u32 %v2522_v21, %v5267_v31  ;;  %v2490_v19 = vld [vmem:[%s4877_s19 + $0x20] sm:$0x1] }
  0xe8   : > { %v2526_v59 = vshll.u32 %v2484_v13, 16  ;;  %v2533_v7 = vrot.slane %v2531_v22, 4  ;;  %v2536_v1 = vrot.slane %v2534_v27, 5  ;;  %v5286_v49 = vrot.slane %v2540_v28, 5  ;;  %v5309_v28 = vpop.permute.xlu0 %973 }
  0xe9   : > { %v2546_v50 = vrot.slane %v2544_v32, 4  ;;  %v2555_v4 = vshrl.u32 %v2488_v51, 16  ;;  %v2558_v42 = vshll.u32 %v2488_v51, 16  ;;  %v2564_v47 = vshll.u32 %v2489_v52, 16  ;;  %v2493_v32 = vld [vmem:[%s4877_s19 + $0x2c] sm:$0x1] }
  0xea   : > { %797 = vrot.lane.b32.xlu1 %v4594_v24, %s4825_s24  ;;  %v2568_v45 = vshrl.u32 %v2489_v52, 16  ;;  %v2579_v5 = vshrl.u32 %v2491_v44, 16  ;;  %v2582_v12 = vshll.u32 %v2491_v44, 16  ;;  %v2588_v8 = vshll.u32 %v2492_v56, 16  ;;  %v2495_v24 = vld [vmem:[%s4877_s19 + $0x34] sm:$0xf] }
  0xeb   : > { %761 = vrot.lane.b32.xlu0 %v4585_v34, %s4826_s25  ;;  %v2592_v9 = vshrl.u32 %v2492_v56, 16  ;;  %v2101_v57 = vsel %vm5088_vm2, %v2096_v36, %v5239_v39  ;;  %v2111_v10 = vsel %vm5088_vm2, %v2106_v41, %v2110_v46  ;;  %v2514_v14 = vrot.slane %v2513_v54, 4  ;;  %v2498_v44 = vld [vmem:[%s4877_s19 + $0x40] sm:$0xf] }
  0xec   : > { %v2528_v60 = vrot.slane %v2526_v59, 5  ;;  %v2524_v15 = vrot.slane %v2523_v55, 4  ;;  %v2537_v16 = vor.u32 %v2536_v1, %v2533_v7  ;;  %v2547_v48 = vor.u32 %v2546_v50, %v5286_v49  ;;  %v2497_v59 = vld [vmem:[%s4877_s19 + $0x3c] sm:$0xf] }
  0xed   : > { %v2550_v20 = vshll.u32 %v2487_v2, 16  ;;  %v2557_v39 = vrot.slane %v2555_v4, 4  ;;  %v2560_v29 = vrot.slane %v2558_v42, 5  ;;  %v5304_v30 = vrot.slane %v2564_v47, 5 }
  0xee   : > { %789 = vrot.lane.b32.xlu1 %v4592_v38, %s4826_s25  ;;  %v2570_v34 = vrot.slane %v2568_v45, 4  ;;  %v2581_v21 = vrot.slane %v2579_v5, 4  ;;  %v2584_v13 = vrot.slane %v2582_v12, 5  ;;  %v5307_v22 = vrot.slane %v2588_v8, 5  ;;  %v2496_v45 = vld [vmem:[%s4877_s19 + $0x38] sm:$0x1] }
  0xef   : > { %777 = vrot.lane.b32.xlu0 %v4589_v37, %s4827_s26  ;;  %v2594_v27 = vrot.slane %v2592_v9, 4  ;;  %v2603_v36 = vshrl.u32 %v2494_v6, 16  ;;  %v2612_v38 = vshll.u32 %v2495_v24, 16  ;;  %v2519_v41 = vsel %vm5088_vm2, %v2514_v14, %v5267_v31  ;;  %v5323_v31 = vpop.permute.xlu1 %979 }
  0xf0   : > { %v2538_v46 = vrot.slane %v2537_v16, 4  ;;  %v2552_v51 = vrot.slane %v2550_v20, 5  ;;  %v2529_v52 = vsel %vm5088_vm2, %v2524_v15, %v2528_v60  ;;  %v2548_v37 = vrot.slane %v2547_v48, 4 }
  0xf1   : > { %v2571_v54 = vor.u32 %v2570_v34, %v5304_v30  ;;  %v2574_v55 = vshll.u32 %v2490_v19, 16  ;;  %v2561_v56 = vor.u32 %v2560_v29, %v2557_v39  ;;  %v2585_v7 = vor.u32 %v2584_v13, %v2581_v21  ;;  %v2500_v19 = vld [vmem:[%s4877_s19 + $0x48] sm:$0xf] }
  0xf2   : > { %2138 = vrot.lane.b32.xlu1 %v2087_v40, %s4828_s27  ;;  %v2616_v40 = vshrl.u32 %v2495_v24, 16  ;;  %v2595_v1 = vor.u32 %v2594_v27, %v5307_v22  ;;  %v2598_v50 = vshll.u32 %v2493_v32, 16  ;;  %v2605_v2 = vrot.slane %v2603_v36, 4 }
  0xf3   : > { %2136 = vrot.lane.b32.xlu0 %v2077_v35, %s4828_s27  ;;  %v2606_v35 = vshll.u32 %v2494_v6, 16  ;;  %v5325_v42 = vrot.slane %v2612_v38, 5  ;;  %v2627_v5 = vshrl.u32 %v2497_v59, 16  ;;  %v2630_v12 = vshll.u32 %v2497_v59, 16  ;;  %v2501_v6 = vld [vmem:[%s4877_s19 + $0x4c] sm:$0xf]  ;;  %v5346_v36 = vpop.permute.xlu1 %983 }
  0xf4   : > { %v2618_v47 = vrot.slane %v2616_v40, 4  ;;  %v2636_v8 = vshll.u32 %v2498_v44, 16  ;;  %v2640_v9 = vshrl.u32 %v2498_v44, 16  ;;  %v2572_v14 = vrot.slane %v2571_v54, 4 }
  0xf5   : > { %v2608_v4 = vrot.slane %v2606_v35, 5  ;;  %v2576_v60 = vrot.slane %v2574_v55, 5  ;;  %v2543_v15 = vsel %vm5088_vm2, %v2538_v46, %v5286_v49  ;;  %v2562_v16 = vrot.slane %v2561_v56, 4  ;;  %v2499_v35 = vld [vmem:[%s4877_s19 + $0x44] sm:$0x1] }
  0xf6   : > { %2142 = vrot.lane.b32.xlu1 %v2111_v10, %s4828_s27  ;;  %v5332_v10 = vpop.permute.xlu0 %977  ;;  %v2586_v48 = vrot.slane %v2585_v7, 4  ;;  %v2600_v20 = vrot.slane %v2598_v50, 5  ;;  %v2596_v24 = vrot.slane %v2595_v1, 4  ;;  %v2619_v29 = vor.u32 %v2618_v47, %v5325_v42  ;;  %v2503_v56 = vld [vmem:[%s4877_s19 + $0x54] sm:$0xf] }
  0xf7   : > { %2140 = vrot.lane.b32.xlu0 %v2101_v57, %s4828_s27  ;;  %v2553_v57 = vsel %vm5088_vm2, %v2548_v37, %v2552_v51  ;;  %v2609_v39 = vor.u32 %v2608_v4, %v2605_v2  ;;  %v2622_v34 = vshll.u32 %v2496_v45, 16  ;;  %v2629_v21 = vrot.slane %v2627_v5, 4  ;;  %v2502_v4 = vld [vmem:[%s4877_s19 + $0x50] sm:$0x1] }
  0xf8   : > { %v2632_v13 = vrot.slane %v2630_v12, 5  ;;  %v5341_v27 = vrot.slane %v2636_v8, 5  ;;  %v2642_v32 = vrot.slane %v2640_v9, 4  ;;  %v2577_v49 = vsel %vm5088_vm2, %v2572_v14, %v2576_v60 }
  0xf9   : > { %v2660_v38 = vshll.u32 %v2501_v6, 16  ;;  %v2664_v40 = vshrl.u32 %v2501_v6, 16  ;;  %v2651_v46 = vshrl.u32 %v2500_v19, 16  ;;  %v2654_v51 = vshll.u32 %v2500_v19, 16 }
  0xfa   : > { %2700 = vrot.lane.b32.xlu1 %v2529_v52, %s4829_s28  ;;  %v2504_v52 = vld [vmem:[%s4877_s19 + $0x58] sm:$0xf]  ;;  %v5353_v37 = vpop.permute.xlu0 %981  ;;  %v2591_v54 = vsel %vm5088_vm2, %v2586_v48, %v5307_v22  ;;  %v2601_v55 = vsel %vm5088_vm2, %v2596_v24, %v2600_v20  ;;  %v2610_v59 = vrot.slane %v2609_v39, 4  ;;  %v2624_v44 = vrot.slane %v2622_v34, 5 }
  0xfb   : > { %2698 = vrot.lane.b32.xlu0 %v2519_v41, %s4829_s28  ;;  %v2567_v41 = vsel %vm5088_vm2, %v2562_v16, %v5304_v30  ;;  %v2620_v7 = vrot.slane %v2619_v29, 4  ;;  %v2633_v30 = vor.u32 %v2632_v13, %v2629_v21  ;;  %v2643_v1 = vor.u32 %v2642_v32, %v5341_v27 }
  0xfc   : > { %v2646_v50 = vshll.u32 %v2499_v35, 16  ;;  %v2662_v2 = vrot.slane %v2660_v38, 5  ;;  %v2666_v47 = vrot.slane %v2664_v40, 4  ;;  %v2684_v45 = vshll.u32 %v2504_v52, 16 }
  0xfd   : > { %v2688_v22 = vshrl.u32 %v2504_v52, 16  ;;  %v2653_v5 = vrot.slane %v2651_v46, 4  ;;  %v2656_v12 = vrot.slane %v2654_v51, 5  ;;  %v2675_v8 = vshrl.u32 %v2503_v56, 16  ;;  %v3514_v52 = vld [vmem:[%s4877_s19 + $0x4] sm:$0xf] }
  0xfe   : > { %2704 = vrot.lane.b32.xlu1 %v2553_v57, %s4829_s28  ;;  %v2678_v9 = vshll.u32 %v2503_v56, 16  ;;  %v5365_v57 = vpop.permute.xlu1 %987  ;;  %v2615_v14 = vsel %vm5088_vm2, %v2610_v59, %v5325_v42  ;;  %v2625_v60 = vsel %vm5088_vm2, %v2620_v7, %v2624_v44  ;;  %v2670_v16 = vshll.u32 %v2502_v4, 16  ;;  %v5374_v48 = vpop.permute.xlu0 %985  ;;  %v2505_v42 = vld [vmem:[%s4877_s19 + $0x5c] sm:$0x1] }
  0xff   : > { %2702 = vrot.lane.b32.xlu0 %v2543_v15, %s4829_s28  ;;  %v2648_v15 = vrot.slane %v2646_v50, 5  ;;  %v2644_v20 = vrot.slane %v2643_v1, 4  ;;  %v2667_v6 = vor.u32 %v2666_v47, %v2662_v2  ;;  %v2686_v24 = vrot.slane %v2684_v45, 5  ;;  %v3515_v1 = vld [vmem:[%s4877_s19 + $0x8] sm:$0x1] }
 0x100   : > { %v2690_v39 = vrot.slane %v2688_v22, 4  ;;  %v2634_v29 = vrot.slane %v2633_v30, 4  ;;  %v2657_v34 = vor.u32 %v2656_v12, %v2653_v5  ;;  %v2677_v19 = vrot.slane %v2675_v8, 4  ;;  %v3520_v50 = vld [vmem:[%s4877_s19 + $0x1c] sm:$0xf] }
 0x101   : > { %v2680_v21 = vrot.slane %v2678_v9, 5  ;;  %v2672_v13 = vrot.slane %v2670_v16, 5  ;;  %v2668_v35 = vrot.slane %v2667_v6, 4  ;;  %v2694_v40 = vshll.u32 %v2505_v42, 16  ;;  %v3513_v47 = vld [vmem:[%s4877_s19] sm:$0xe] }
 0x102   : > { %2708 = vrot.lane.b32.xlu1 %v2577_v49, %s4829_s28  ;;  %v5379_v32 = vpop.permute.xlu1 %991  ;;  %v2649_v49 = vsel %vm5088_vm2, %v2644_v20, %v2648_v15  ;;  %v2691_v38 = vor.u32 %v2690_v39, %v2686_v24  ;;  %v2658_v46 = vrot.slane %v2657_v34, 4  ;;  %v3516_v22 = vld [vmem:[%s4877_s19 + $0xc] sm:$0xe]  ;;  %v3518_v5 = vld [vmem:[%s4877_s19 + $0x14] sm:$0x1]  ;;  %v7320_v16 = vmov 0 }
 0x103   : > { %2706 = vrot.lane.b32.xlu0 %v2567_v41, %s4829_s28  ;;  %v2639_v41 = vsel %vm5088_vm2, %v2634_v29, %v5341_v27  ;;  %v2681_v51 = vor.u32 %v2680_v21, %v2677_v19  ;;  %v2673_v59 = vsel %vm5088_vm2, %v2668_v35, %v2672_v13  ;;  %v2696_v56 = vrot.slane %v2694_v40, 5  ;;  %v3519_v12 = vld [vmem:[%s4877_s19 + $0x18] sm:$0xe]  ;;  %v3521_v6 = vld [vmem:[%s4877_s19 + $0x20] sm:$0x1] }
 0x104   : > { %v2692_v44 = vrot.slane %v2691_v38, 4  ;;  %v3563_v27 = vrot.slane %v3514_v52, 5  ;;  %v2663_v7 = vsel %vm5088_vm2, %v2658_v46, %v2662_v2  ;;  %v7321_v16 = vsel %vm5413_vm13, 4294967295, %v7320_v16  ;;  %v3523_v21 = vld [vmem:[%s4877_s19 + $0x28] sm:$0xf] }
 0x105   : > { %v2682_v30 = vrot.slane %v2681_v51, 4  ;;  %7322 = vst [vmem:[#allocation7_spill] sm:$0xff] %v7321_v16  ;;  %v4695_v20 = vrot.slane %v3513_v47, 9  ;;  %v4696_v39 = vrot.slane %v3516_v22, 9  ;;  %v3573_v34 = vrot.slane %v3518_v5, 5 }
 0x106   : > { %2712 = vrot.lane.b32.xlu1 %v2601_v55, %s4829_s28  ;;  %v3517_v55 = vld [vmem:[%s4877_s19 + $0x10] sm:$0xf]  ;;  %v5398_v4 = vpop.permute.xlu1 %995  ;;  %v2697_v2 = vsel %vm5088_vm2, %v2692_v44, %v2696_v56  ;;  %v3565_v9 = vrot.slane %v3563_v27, 4  ;;  %v4697_v19 = vrot.slane %v3519_v12, 9  ;;  %v3522_v38 = vld [vmem:[%s4877_s19 + $0x24] sm:$0xe]  ;;  %v1085_v44 = vcombine.low %v5280_v53, %v5365_v57 }
 0x107   : > { %2710 = vrot.lane.b32.xlu0 %v2591_v54, %s4829_s28  ;;  %v5387_v54 = vpop.permute.xlu0 %989  ;;  %v3570_v45 = vrot.slane %v3517_v55, 5  ;;  %v2687_v15 = vsel %vm5088_vm2, %v2682_v30, %v2686_v24  ;;  %v3564_v35 = vsel %vm5413_vm13, %v4695_v20, %v3563_v27  ;;  %v5427_v40 = vld [vmem:[%s4877_s19 + $0x34] sm:$0xf]  ;;  %v1119_v56 = vcombine.low %v5302_v25, %v5379_v32  ;;  %v3524_v30 = vld [vmem:[%s4877_s19 + $0x2c] sm:$0x1] }
 0x108   : > { %v1093_v27 = vcombine.low %v5323_v31, %v5398_v4  ;;  %v4698_v57 = vrot.slane %v3522_v38, 9  ;;  %v3591_v25 = vrot.slane %v5427_v40, 5  ;;  %v1017_v31 = vcombine.low %v5289_v62, %v5374_v48  ;;  %v3528_v22 = vld [vmem:[%s4877_s19 + $0x3c] sm:$0xe]  ;;  %v5481_v48 = vld [vmem:[%s4877_s19 + $0x58] sm:$0xf] }
 0x109   : > { %v3572_v29 = vrot.slane %v3570_v45, 4  ;;  %v3571_v51 = vsel %vm5413_vm13, %v4696_v39, %v3570_v45  ;;  %v3527_v45 = vld [vmem:[%s4877_s19 + $0x38] sm:$0x1]  ;;  %v3587_v12 = vrot.slane %v3524_v30, 5  ;;  %v5470_v62 = vrot.slane %v1119_v56, %v4888_v11  ;;  %v3531_v20 = vld [vmem:[%s4877_s19 + $0x48] sm:$0xe] }
 0x10a   : > { %2716 = vrot.lane.b32.xlu1 %v2625_v60, %s4829_s28  ;;  %v3577_v60 = vrot.slane %v3520_v50, 5  ;;  %v1000_v42 = vpop.permute.xlu1 %999  ;;  %v5449_v50 = vld [vmem:[%s4877_s19 + $0x4c] sm:$0xf]  ;;  %v3612_v38 = vrot.slane %v5481_v48, 5  ;;  %v3987_v56 = vld [vmem:[%s4877_s19] sm:$0xe] }
 0x10b   : > { %2714 = vrot.lane.b32.xlu0 %v2615_v14, %s4829_s28  ;;  %v5405_v8 = vpop.permute.xlu0 %993  ;;  %v3566_v14 = vrot.slane %v3515_v1, 5  ;;  %v3574_v52 = vsel %vm5413_vm13, %v3572_v29, %v3573_v34  ;;  %v3525_v1 = vld [vmem:[%s4877_s19 + $0x30] sm:$0xe]  ;;  %v5527_v30 = vld [vmem:[%s4877_s19 + $0x1c] sm:$0xf] }
 0x10c   : > { %v3579_v13 = vrot.slane %v3577_v60, 4  ;;  %v3578_v55 = vsel %vm5413_vm13, %v4697_v19, %v3577_v60  ;;  %v1025_v4 = vcombine.low %v5332_v10, %v5405_v8  ;;  %v3594_v8 = vrot.slane %v3527_v45, 5  ;;  %v5498_v19 = vld [vmem:[%s4877_s19 + $0x4] sm:$0xf] }
 0x10d   : > { %v3567_v24 = vsel %vm5413_vm13, %v3565_v9, %v3566_v14  ;;  %v3605_v9 = vrot.slane %v5449_v50, 5  ;;  %v5467_v14 = vrot.slane %v1085_v44, %v4888_v11  ;;  %v4700_v60 = vrot.slane %v3528_v22, 9  ;;  %v3992_v22 = vld [vmem:[%s4877_s19 + $0x14] sm:$0x1] }
 0x10e   : > { %2720 = vrot.lane.b32.xlu1 %v2649_v49, %s4829_s28  ;;  %v3580_v49 = vrot.slane %v3521_v6, 5  ;;  %v5486_v6 = vrot.slane %v1017_v31, %v4888_v11  ;;  %v5492_v29 = vrot.slane %v1025_v4, %v4888_v11  ;;  %v3990_v31 = vld [vmem:[%s4877_s19 + $0xc] sm:$0xe]  ;;  %v4051_v48 = vrot.slane %v5527_v30, 5  ;;  %v3998_v30 = vld [vmem:[%s4877_s19 + $0x2c] sm:$0x1] }
 0x10f   : > { %2718 = vrot.lane.b32.xlu0 %v2639_v41, %s4829_s28  ;;  %v5430_v41 = vld [vmem:[%s4877_s19 + $0x40] sm:$0xf]  ;;  %v998_v46 = vpop.permute.xlu0 %997 }
 0x110   : > { %v3581_v53 = vsel %vm5413_vm13, %v3579_v13, %v3580_v49  ;;  %v3598_v32 = vrot.slane %v5430_v41, 5  ;;  %v1059_v47 = vcombine.low %v5353_v37, %v998_v46  ;;  %v3530_v37 = vld [vmem:[%s4877_s19 + $0x44] sm:$0x1]  ;;  %v3533_v49 = vld [vmem:[%s4877_s19 + $0x50] sm:$0x1]  ;;  %v4701_v46 = vrot.slane %v3531_v20, 9 }
 0x111   : > { %v3601_v13 = vrot.slane %v3530_v37, 5  ;;  %v3993_v37 = vld [vmem:[%s4877_s19 + $0x18] sm:$0xe] }
 0x112   : > { %2724 = vrot.lane.b32.xlu1 %v2673_v59, %s4829_s28  ;;  %v3584_v59 = vrot.slane %v3523_v21, 5  ;;  %v5495_v34 = vrot.slane %v1059_v47, %v4888_v11  ;;  %v5501_v21 = vld [vmem:[%s4877_s19 + $0x10] sm:$0xf]  ;;  %v3614_v47 = vrot.slane %v3612_v38, 4 }
 0x113   : > { %2722 = vrot.lane.b32.xlu0 %v2663_v7, %s4829_s28  ;;  %v1127_v7 = vcombine.low %v5346_v36, %v1000_v42  ;;  %v1051_v36 = vcombine.low %v5309_v28, %v5387_v54  ;;  %v5473_v28 = vrot.slane %v1093_v27, %v4888_v11  ;;  %v3593_v54 = vrot.slane %v3591_v25, 4 }
 0x114   : > { %v3586_v5 = vrot.slane %v3584_v59, 4  ;;  %v3585_v42 = vsel %vm5413_vm13, %v4698_v57, %v3584_v59  ;;  %v4037_v27 = vrot.slane %v5498_v19, 5  ;;  %v3995_v19 = vld [vmem:[%s4877_s19 + $0x20] sm:$0x1] }
 0x115   : > { %v5476_v10 = vrot.slane %v1127_v7, %v4888_v11  ;;  %v5489_v39 = vrot.slane %v1051_v36, %v4888_v11  ;;  %v1101_v40 = vcombine.low %v5467_v14, %v5473_v28  ;;  %v3595_v44 = vsel %vm5413_vm13, %v3593_v54, %v3594_v8  ;;  %v5555_v54 = vld [vmem:[%s4877_s19 + $0x34] sm:$0xf] }
 0x116   : > { %2728 = vrot.lane.b32.xlu1 %v2697_v2, %s4829_s28  ;;  %v4699_v2 = vrot.slane %v3525_v1, 9  ;;  %v4044_v7 = vrot.slane %v5501_v21, 5  ;;  %v1033_v1 = vcombine.low %v5486_v6, %v5492_v29  ;;  %v5537_v36 = vsel %vm5413_vm13, %v4700_v60, %v3598_v32 }
 0x117   : > { %2726 = vrot.lane.b32.xlu0 %v2687_v15, %s4829_s28  ;;  %v3600_v15 = vrot.slane %v3598_v32, 4  ;;  %v1135_v41 = vcombine.low %v5470_v62, %v5476_v10  ;;  %v4720_v32 = vrot.slane %v3987_v56, 9  ;;  %v4039_v8 = vrot.slane %v4037_v27, 4 }
 0x118   : > { %v3592_v59 = vsel %vm5413_vm13, %v4699_v2, %v3591_v25  ;;  %v3989_v25 = vld [vmem:[%s4877_s19 + $0x8] sm:$0x1]  ;;  %v4046_v20 = vrot.slane %v4044_v7, 4  ;;  %v4722_v56 = vrot.slane %v3993_v37, 9  ;;  %v4006_v37 = vld [vmem:[%s4877_s19 + $0x4c] sm:$0xf] }
 0x119   : > { %v3602_v4 = vsel %vm5413_vm13, %v3600_v15, %v3601_v13  ;;  %v5549_v2 = vrot.slane %v1135_v41, %v4925_v26  ;;  %v4040_v60 = vrot.slane %v3989_v25, 5  ;;  %v4721_v15 = vrot.slane %v3990_v31, 9  ;;  %v5581_v25 = vpop.permute.xlu1 %2114 }
 0x11a   : > { %3619 = vrot.lane.b32.xlu1 %v3567_v24, %s4828_s27  ;;  %v3588_v24 = vsel %vm5413_vm13, %v3586_v5, %v3587_v12  ;;  %v5543_v5 = vld [vmem:[%s4877_s19 + $0x28] sm:$0xf]  ;;  %v5546_v12 = vrot.slane %v1101_v40, %v4925_v26  ;;  %v5570_v40 = vld [vmem:[%s4877_s19 + $0x40] sm:$0xf]  ;;  %v3606_v41 = vsel %vm5413_vm13, %v4701_v46, %v3605_v9  ;;  %7327 = vst [vmem:[#allocation12_spill] sm:$0xff] %v5581_v25  ;;  %v4053_v31 = vrot.slane %v4051_v48, 4 }
 0x11b   : > { %3617 = vrot.lane.b32.xlu0 %v3564_v35, %s4828_s27  ;;  %v3534_v35 = vld [vmem:[%s4877_s19 + $0x54] sm:$0xe]  ;;  %7324 = vst [vmem:[#allocation9_spill] sm:$0xff] %v5549_v2  ;;  %v4001_v46 = vld [vmem:[%s4877_s19 + $0x38] sm:$0x1]  ;;  %v5630_v21 = vsel %vm5413_vm13, %v4722_v56, %v4051_v48 }
 0x11c   : > { %v4702_v57 = vrot.slane %v3534_v35, 9  ;;  %7323 = vst [vmem:[#allocation8_spill] sm:$0xff] %v5546_v12  ;;  %v3996_v35 = vld [vmem:[%s4877_s19 + $0x24] sm:$0xe] }
 0x11e   : > { %3623 = vrot.lane.b32.xlu1 %v3574_v52, %s4828_s27  ;;  %v3536_v52 = vld [vmem:[%s4877_s19 + $0x5c] sm:$0x1]  ;;  %v5586_v50 = vsel %vm5413_vm13, %v4702_v57, %v3612_v38  ;;  %v4723_v38 = vrot.slane %v3996_v35, 9  ;;  %v4072_v57 = vrot.slane %v5570_v40, 5  ;;  %v5616_v35 = vsel %vm5413_vm13, %v4721_v15, %v4044_v7  ;;  %v4007_v15 = vld [vmem:[%s4877_s19 + $0x50] sm:$0x1] }
 0x11f   : > { %3621 = vrot.lane.b32.xlu0 %v3571_v51, %s4828_s27  ;;  %v3607_v51 = vrot.slane %v3605_v9, 4  ;;  %v3615_v45 = vrot.slane %v3536_v52, 5  ;;  %v4054_v9 = vrot.slane %v3995_v19, 5 }
 0x120   : > { %v4074_v7 = vrot.slane %v4072_v57, 4 }
 0x122   : > { %3627 = vrot.lane.b32.xlu1 %v3581_v53, %s4828_s27  ;;  %v3608_v53 = vrot.slane %v3533_v49, 5  ;;  %v4047_v49 = vrot.slane %v3992_v22, 5  ;;  %v5592_v22 = vpop.permute.xlu0 %2112 }
 0x123   : > { %3625 = vrot.lane.b32.xlu0 %v3578_v55, %s4828_s27  ;;  %v1067_v55 = vcombine.low %v5489_v39, %v5495_v34  ;;  %7328 = vst [vmem:[#allocation13_spill] sm:$0xff] %v5592_v22  ;;  %v1357_v22 = vld [vmem:[%s4877_s19 + $0x48] sm:$0xf] }
 0x124   : > { %v3609_v52 = vsel %vm5413_vm13, %v3607_v51, %v3608_v53  ;;  %v4002_v51 = vld [vmem:[%s4877_s19 + $0x3c] sm:$0xe]  ;;  %v4061_v53 = vrot.slane %v3998_v30, 5  ;;  %v5620_v40 = vsel %vm5413_vm13, %v4046_v20, %v4047_v49  ;;  %v4005_v30 = vld [vmem:[%s4877_s19 + $0x48] sm:$0xe]  ;;  %v5634_v49 = vpop.permute.xlu1 %2118 }
 0x125   : > { %v5565_v13 = vrot.slane %v1067_v55, %v4925_v26  ;;  %v4065_v55 = vrot.slane %v5555_v54, 5  ;;  %v4009_v54 = vld [vmem:[%s4877_s19 + $0x58] sm:$0xf]  ;;  %v4010_v20 = vld [vmem:[%s4877_s19 + $0x5c] sm:$0x1]  ;;  %7329 = vst [vmem:[#allocation14_spill] sm:$0xff] %v5634_v49 }
 0x126   : > { %3631 = vrot.lane.b32.xlu1 %v3588_v24, %s4828_s27  ;;  %v5562_v24 = vrot.slane %v1033_v1, %v4925_v26  ;;  %v3999_v1 = vld [vmem:[%s4877_s19 + $0x30] sm:$0xe]  ;;  %v5654_v48 = vpop.permute.xlu0 %2116  ;;  %v1362_v49 = vld [vmem:[%s4877_s19 + $0x5c] sm:$0x1] }
 0x127   : > { %3629 = vrot.lane.b32.xlu0 %v3585_v42, %s4828_s27  ;;  %7326 = vst [vmem:[#allocation11_spill] sm:$0xff] %v5565_v13  ;;  %v4058_v42 = vrot.slane %v5543_v5, 5  ;;  %v3616_v5 = vsel %vm5413_vm13, %v3614_v47, %v3615_v45  ;;  %v4724_v61 = vrot.slane %v3999_v1, 9  ;;  %v5609_v47 = vsel %vm5413_vm13, %v4039_v8, %v4040_v60  ;;  %v4008_v60 = vld [vmem:[%s4877_s19 + $0x54] sm:$0xe]  ;;  %7330 = vst [vmem:[#allocation15_spill] sm:$0xff] %v5654_v48 }
 0x128   : > { %7325 = vst [vmem:[#allocation10_spill] sm:$0xff] %v5562_v24  ;;  %v4068_v45 = vrot.slane %v4001_v46, 5  ;;  %v4079_v8 = vrot.slane %v4006_v37, 5  ;;  %v4086_v1 = vrot.slane %v4009_v54, 5  ;;  %v1102_v46 = vcombine.high %v5467_v14, %v5473_v28 }
 0x129   : > { %v4060_v19 = vrot.slane %v4058_v42, 4  ;;  %v5642_v14 = vsel %vm5413_vm13, %v4723_v38, %v4058_v42  ;;  %v4727_v42 = vrot.slane %v4008_v60, 9  ;;  %v4082_v38 = vrot.slane %v4007_v15, 5  ;;  %v1341_v60 = vld [vmem:[%s4877_s19 + $0x8] sm:$0x1] }
 0x12a   : > { %3635 = vrot.lane.b32.xlu1 %v3595_v44, %s4828_s27  ;;  %v5599_v44 = vsel %vm5413_vm13, %v4720_v32, %v4037_v27  ;;  %v4067_v27 = vrot.slane %v4065_v55, 4  ;;  %v4725_v32 = vrot.slane %v4002_v51, 9  ;;  %v5638_v51 = vsel %vm5413_vm13, %v4053_v31, %v4054_v9  ;;  %v1340_v9 = vld [vmem:[%s4877_s19 + $0x4] sm:$0xf] }
 0x12b   : > { %3633 = vrot.lane.b32.xlu0 %v3592_v59, %s4828_s27  ;;  %v5646_v28 = vsel %vm5413_vm13, %v4060_v19, %v4061_v53  ;;  %v4726_v31 = vrot.slane %v4005_v30, 9  ;;  %v4081_v53 = vrot.slane %v4079_v8, 4  ;;  %v4088_v37 = vrot.slane %v4086_v1, 4 }
 0x12c   : > { %v5658_v56 = vsel %vm5413_vm13, %v4067_v27, %v4068_v45  ;;  %v4089_v54 = vrot.slane %v4010_v20, 5  ;;  %v1376_v19 = vshll.u32 %v1340_v9, 16  ;;  %v1380_v27 = vshrl.u32 %v1340_v9, 16  ;;  %v1346_v20 = vld [vmem:[%s4877_s19 + $0x1c] sm:$0xf] }
 0x12d   : > { %v5687_v45 = vsel %vm5413_vm13, %v4726_v31, %v4079_v8  ;;  %v1352_v9 = vld [vmem:[%s4877_s19 + $0x34] sm:$0xf]  ;;  %v1386_v59 = vshll.u32 %v1341_v60, 16  ;;  %v1424_v30 = vshll.u32 %v1346_v20, 16 }
 0x12e   : > { %3639 = vrot.lane.b32.xlu1 %v3602_v4, %s4828_s27  ;;  %v4075_v4 = vrot.slane %v4004_v33, 5  ;;  %v1034_v33 = vcombine.high %v5486_v6, %v5492_v29  ;;  %v5668_v6 = vsel %vm5413_vm13, %v4725_v32, %v4072_v57  ;;  %v5691_v32 = vsel %vm5413_vm13, %v4727_v42, %v4086_v1  ;;  %v1343_v1 = vld [vmem:[%s4877_s19 + $0x10] sm:$0xf]  ;;  %v1349_v42 = vld [vmem:[%s4877_s19 + $0x28] sm:$0xf] }
 0x12f   : > { %3637 = vrot.lane.b32.xlu0 %v5537_v36, %s4828_s27  ;;  %v5650_v36 = vsel %vm5413_vm13, %v4724_v61, %v4065_v55  ;;  %v5663_v61 = vrot.slane %v1102_v46, %v4925_v26  ;;  %v1136_v55 = vcombine.high %v5470_v62, %v5476_v10  ;;  %v5695_v62 = vcombine.high %v5546_v12, %v7266_v3  ;;  %v5697_v10 = vpop.permute.xlu1 %2122 }
 0x130   : > { %v5672_v29 = vsel %vm5413_vm13, %v4074_v7, %v4075_v4  ;;  %v5683_v57 = vrot.slane %v1034_v33, %v4925_v26  ;;  %7334 = vst [vmem:[#allocation19_spill] sm:$0xff] %v5697_v10  ;;  %v1400_v15 = vshll.u32 %v1343_v1, 16  ;;  %v1404_v4 = vshrl.u32 %v1343_v1, 16  ;;  %v1361_v7 = vld [vmem:[%s4877_s19 + $0x58] sm:$0xf] }
 0x131   : > { %7331 = vst [vmem:[#allocation16_spill] sm:$0xff] %v5663_v61  ;;  %v5724_v33 = vrot.slane %v1136_v55, %v4925_v26  ;;  %v1452_v60 = vshrl.u32 %v1349_v42, 16  ;;  %v1476_v8 = vshrl.u32 %v1352_v9, 16  ;;  %v1347_v55 = vld [vmem:[%s4877_s19 + $0x20] sm:$0x1]  ;;  %v5753_v43 = vrot.slane %v1386_v59, 5 }
 0x132   : > { %3643 = vrot.lane.b32.xlu1 %v3609_v52, %s4828_s27  ;;  %v5676_v52 = vcombine.high %v5562_v24, %v7266_v3  ;;  %7333 = vst [vmem:[#allocation18_spill] sm:$0xff] %v5683_v57  ;;  %v1406_v16 = vrot.slane %v1404_v4, 4  ;;  %v1359_v59 = vld [vmem:[%s4877_s19 + $0x50] sm:$0x1]  ;;  %v1548_v25 = vshrl.u32 %v1361_v7, 16  ;;  %v1514_v57 = vshll.u32 %v1357_v22, 16 }
 0x133   : > { %3641 = vrot.lane.b32.xlu0 %v3606_v41, %s4828_s27  ;;  %v1068_v41 = vcombine.high %v5489_v39, %v5495_v34  ;;  %v5702_v39 = vsel %vm5413_vm13, %v4081_v53, %v4082_v38  ;;  %v5706_v34 = vsel %vm5413_vm13, %v4088_v37, %v4089_v54  ;;  %7336 = vst [vmem:[#allocation21_spill] sm:$0xff] %v5724_v33  ;;  %v1382_v53 = vrot.slane %v1380_v27, 4  ;;  %v1355_v54 = vld [vmem:[%s4877_s19 + $0x40] sm:$0xf]  ;;  %v1344_v27 = vld [vmem:[%s4877_s19 + $0x14] sm:$0x1]  ;;  %v5743_v3 = vpop.permute.xlu1 %2126 }
 0x134   : > { %7332 = vst [vmem:[#allocation17_spill] sm:$0xff] %v5676_v52  ;;  %v1448_v37 = vshll.u32 %v1349_v42, 16  ;;  %v1472_v38 = vshll.u32 %v1352_v9, 16  ;;  %7338 = vst [vmem:[#allocation23_spill] sm:$0xff] %v5743_v3  ;;  %v1496_v46 = vshll.u32 %v1355_v54, 16  ;;  %v5755_v42 = vrot.slane %v1400_v15, 5 }
 0x135   : > { %v5727_v31 = vrot.slane %v1068_v41, %v4925_v26  ;;  %v1358_v41 = vld [vmem:[%s4877_s19 + $0x4c] sm:$0xf]  ;;  %v1454_v15 = vrot.slane %v1452_v60, 4  ;;  %v1544_v3 = vshll.u32 %v1361_v7, 16 }
 0x136   : > { %3647 = vrot.lane.b32.xlu1 %v3616_v5, %s4828_s27  ;;  %v5714_v5 = vpop.permute.xlu0 %2120  ;;  %v1520_v9 = vshll.u32 %v1358_v41, 16  ;;  %v1524_v58 = vshrl.u32 %v1358_v41, 16  ;;  %v5765_v10 = vrot.slane %v1448_v37, 5  ;;  %v5767_v48 = vrot.slane %v1472_v38, 5 }
 0x137   : > { %7335 = vst [vmem:[#allocation20_spill] sm:$0xff] %v5714_v5  ;;  %3645 = vrot.lane.b32.xlu0 %v5586_v50, %s4828_s27  ;;  %7337 = vst [vmem:[#allocation22_spill] sm:$0xff] %v5727_v31  ;;  %v5731_v50 = vrot.slane %v1376_v19, 5  ;;  %v1428_v19 = vshrl.u32 %v1346_v20, 16  ;;  %v1500_v20 = vshrl.u32 %v1355_v54, 16  ;;  %v5760_v5 = vrot.slane %v1424_v30, 5  ;;  %v5779_v37 = vpop.permute.xlu1 %2130 }
 0x138   : > { %7340 = vst [vmem:[#allocation25_spill] sm:$0xff] %v5765_v10  ;;  %7341 = vst [vmem:[#allocation26_spill] sm:$0xff] %v5767_v48  ;;  %v1478_v41 = vrot.slane %v1476_v8, 4  ;;  %v5772_v4 = vrot.slane %v1496_v46, 5  ;;  %v1407_v8 = vor.u32 %v1406_v16, %v5755_v42  ;;  %v7376_v17 = vld [vmem:[#allocation16_spill] sm:$0xff] }
 0x139   : > { %v1383_v1 = vor.u32 %v1382_v53, %v5731_v50  ;;  %v1410_v53 = vshll.u32 %v1344_v27, 16  ;;  %v1430_v54 = vrot.slane %v1428_v19, 4  ;;  %v1502_v30 = vrot.slane %v1500_v20, 4  ;;  %7344 = vst [vmem:[#allocation29_spill] sm:$0xff] %v5779_v37 }
 0x13a   : > { %4093 = vrot.lane.b32.xlu1 %v5609_v47, %s4829_s28  ;;  %v5749_v18 = vpop.permute.xlu0 %2124  ;;  %v1356_v47 = vld [vmem:[%s4877_s19 + $0x44] sm:$0x1]  ;;  %7342 = vst [vmem:[#allocation27_spill] sm:$0xff] %v5772_v4  ;;  %v5774_v27 = vrot.slane %v1520_v9, 5  ;;  %v1526_v19 = vrot.slane %v1524_v58, 4  ;;  %v1455_v58 = vor.u32 %v1454_v15, %v5765_v10  ;;  %v1479_v7 = vor.u32 %v1478_v41, %v5767_v48 }
 0x13b   : > { %4091 = vrot.lane.b32.xlu0 %v5599_v44, %s4829_s28  ;;  %7339 = vst [vmem:[#allocation24_spill] sm:$0xff] %v5749_v18  ;;  %v1350_v44 = vld [vmem:[%s4877_s19 + $0x2c] sm:$0x1]  ;;  %v5770_v18 = vrot.slane %v1383_v1, 4  ;;  %v1431_v38 = vor.u32 %v1430_v54, %v5760_v5  ;;  %v1506_v1 = vshll.u32 %v1356_v47, 16  ;;  %v1530_v20 = vshll.u32 %v1359_v59, 16 }
 0x13c   : > { %7343 = vst [vmem:[#allocation28_spill] sm:$0xff] %v5774_v27  ;;  %v1458_v46 = vshll.u32 %v1350_v44, 16  ;;  %v1503_v16 = vor.u32 %v1502_v30, %v5772_v4  ;;  %v1554_v44 = vshll.u32 %v1362_v49, 16  ;;  %v1527_v37 = vor.u32 %v1526_v19, %v5774_v27  ;;  %v1345_v41 = vld [vmem:[%s4877_s19 + $0x18] sm:$0xf] }
 0x13d   : > { %v1550_v15 = vrot.slane %v1548_v25, 4  ;;  %v1348_v47 = vld [vmem:[%s4877_s19 + $0x24] sm:$0xf]  ;;  %v5807_v49 = vrot.slane %v1431_v38, 4  ;;  %v1351_v30 = vld [vmem:[%s4877_s19 + $0x30] sm:$0xf]  ;;  %v5825_v38 = vpop.permute.xlu1 %2134 }
 0x13e   : > { %4097 = vrot.lane.b32.xlu1 %v5620_v40, %s4829_s28  ;;  %v1434_v40 = vshll.u32 %v1347_v55, 16  ;;  %v1482_v55 = vshll.u32 %v1353_v63, 16  ;;  %v5785_v60 = vpop.permute.xlu0 %2128  ;;  %v1342_v63 = vld [vmem:[%s4877_s19 + $0xc] sm:$0xf]  ;;  %v5809_v59 = vrot.slane %v1458_v46, 5  ;;  %v5818_v25 = vrot.slane %v1479_v7, 4 }
 0x13f   : > { %4095 = vrot.lane.b32.xlu0 %v5616_v35, %s4829_s28  ;;  %v5777_v35 = vld [vmem:[%s4877_s19] sm:$0xf]  ;;  %7345 = vst [vmem:[#allocation30_spill] sm:$0xff] %v5785_v60  ;;  %v5820_v19 = vrot.slane %v1506_v1, 5  ;;  %7347 = vst [vmem:[#allocation32_spill] sm:$0xff] %v5825_v38  ;;  %v5827_v46 = vrot.slane %v1503_v16, 4 }
 0x140   : > { %v1367_v9 = vshrl.u32 %v5777_v35, 16  ;;  %v5796_v54 = vrot.slane %v1434_v40, 5  ;;  %v5811_v40 = vrot.slane %v1482_v55, 5  ;;  %v5829_v55 = vrot.slane %v1554_v44, 5 }
 0x141   : > { %v5837_v7 = vrot.slane %v1527_v37, 4  ;;  %v1391_v26 = vshrl.u32 %v1342_v63, 16  ;;  %v1394_v61 = vshll.u32 %v1342_v63, 16  ;;  %v1415_v16 = vshrl.u32 %v1345_v41, 16 }
 0x142   : > { %4101 = vrot.lane.b32.xlu1 %v5638_v51, %s4829_s28  ;;  %v5791_v51 = vrot.slane %v1410_v53, 5  ;;  %v5805_v53 = vrot.slane %v1407_v8, 4  ;;  %v1354_v8 = vld [vmem:[%s4877_s19 + $0x3c] sm:$0xf]  ;;  %v5832_v60 = vrot.slane %v1367_v9, 4  ;;  %v1418_v44 = vshll.u32 %v1345_v41, 16 }
 0x143   : > { %4099 = vrot.lane.b32.xlu0 %v5630_v21, %s4829_s28  ;;  %v5799_v21 = vrot.slane %v1544_v3, 5  ;;  %v5816_v3 = vrot.slane %v1455_v58, 4  ;;  %v5835_v58 = vpop.permute.xlu0 %2132  ;;  %v1439_v38 = vshrl.u32 %v1348_v47, 16  ;;  %v1442_v33 = vshll.u32 %v1348_v47, 16 }
 0x144   : > { %7348 = vst [vmem:[#allocation33_spill] sm:$0xff] %v5835_v58  ;;  %v1466_v9 = vshll.u32 %v1351_v30, 16  ;;  %v1487_v58 = vshrl.u32 %v1354_v8, 16  ;;  %v1490_v37 = vshll.u32 %v1354_v8, 16  ;;  %v1393_v41 = vrot.slane %v1391_v26, 4 }
 0x145   : > { %7346 = vst [vmem:[#allocation31_spill] sm:$0xff] %v5799_v21  ;;  %v1551_v1 = vor.u32 %v1550_v15, %v5799_v21  ;;  %v1511_v15 = vshrl.u32 %v1357_v22, 16  ;;  %v1396_v4 = vrot.slane %v1394_v61, 5  ;;  %v1420_v47 = vrot.slane %v1418_v44, 5 }
 0x146   : > { %4105 = vrot.lane.b32.xlu1 %v5646_v28, %s4829_s28  ;;  %v5822_v28 = vrot.slane %v1530_v20, 5  ;;  %v1360_v20 = vld [vmem:[%s4877_s19 + $0x54] sm:$0xf]  ;;  %v1444_v48 = vrot.slane %v1442_v33, 5  ;;  %v1468_v22 = vrot.slane %v1466_v9, 5  ;;  %v1437_v33 = vsel %vm5088_vm2, %v5807_v49, %v5796_v54 }
 0x147   : > { %4103 = vrot.lane.b32.xlu0 %v5642_v14, %s4829_s28  ;;  %v1370_v14 = vshll.u32 %v5777_v35, 16  ;;  %v1463_v35 = vshrl.u32 %v1351_v30, 16  ;;  %v1535_v52 = vshrl.u32 %v1360_v20, 16  ;;  %v1538_v63 = vshll.u32 %v1360_v20, 16 }
 0x148   : > { %v1441_v30 = vrot.slane %v1439_v38, 4  ;;  %v1492_v20 = vrot.slane %v1490_v37, 5  ;;  %v1397_v54 = vor.u32 %v1396_v4, %v1393_v41 }
 0x149   : > { %v1372_v27 = vrot.slane %v1370_v14, 5  ;;  %v1465_v8 = vrot.slane %v1463_v35, 4  ;;  %v1516_v14 = vrot.slane %v1514_v57, 5  ;;  %v1537_v26 = vrot.slane %v1535_v52, 4 }
 0x14a   : > { %4109 = vrot.lane.b32.xlu1 %v5658_v56, %s4829_s28  ;;  %v1552_v56 = vrot.slane %v1551_v1, 4  ;;  %v1513_v1 = vrot.slane %v1511_v15, 4  ;;  %v1540_v61 = vrot.slane %v1538_v63, 5  ;;  %v1461_v52 = vsel %vm5088_vm2, %v5816_v3, %v5809_v59 }
 0x14b   : > { %4107 = vrot.lane.b32.xlu0 %v5650_v36, %s4829_s28  ;;  %v1417_v36 = vrot.slane %v1415_v16, 4  ;;  %v1533_v57 = vsel %vm5088_vm2, %v5837_v7, %v5822_v28  ;;  %v1445_v49 = vor.u32 %v1444_v48, %v1441_v30  ;;  %v7357_v28 = vshrl.u32 %v5562_v24, 16 }
 0x14c   : > { %v5845_v31 = vpop.permute.xlu1 %765  ;;  %v1650_v7 = vcombine.low %v1437_v33, %v1533_v57  ;;  %v1398_v9 = vrot.slane %v1397_v54, 4  ;;  %v7369_v54 = vld [vmem:[#allocation31_spill] sm:$0xff] }
 0x14d   : > { %7349 = vst [vmem:[#allocation34_spill] sm:$0xff] %v5845_v31  ;;  %v5847_v21 = vpop.permute.xlu0 %793  ;;  %v1489_v31 = vrot.slane %v1487_v58, 4  ;;  %v1446_v15 = vrot.slane %v1445_v49, 4 }
 0x14e   : > { %7350 = vst [vmem:[#allocation35_spill] sm:$0xff] %v5847_v21  ;;  %4113 = vrot.lane.b32.xlu1 %v5672_v29, %s4829_s28  ;;  %v1389_v29 = vsel %vm5088_vm2, %v5770_v18, %v5753_v43  ;;  %v1485_v43 = vsel %vm5088_vm2, %v5818_v25, %v5811_v40  ;;  %v1509_v18 = vsel %vm5088_vm2, %v5827_v46, %v5820_v19  ;;  %v7358_v46 = vshrl.u32 %v5565_v13, 16 }
 0x14f   : > { %4111 = vrot.lane.b32.xlu0 %v5668_v6, %s4829_s28  ;;  %v1413_v6 = vsel %vm5088_vm2, %v5805_v53, %v5791_v51  ;;  %v1373_v51 = vor.u32 %v1372_v27, %v5832_v60  ;;  %v1421_v53 = vor.u32 %v1420_v47, %v1417_v36  ;;  %v1469_v40 = vor.u32 %v1468_v22, %v1465_v8 }
 0x150   : > { %v5853_v10 = vpop.permute.xlu1 %757  ;;  %v1493_v3 = vor.u32 %v1492_v20, %v1489_v31  ;;  %v1517_v25 = vor.u32 %v1516_v14, %v1513_v1  ;;  %v1541_v19 = vor.u32 %v1540_v61, %v1537_v26  ;;  %v7355_v27 = vshrl.u32 %v5546_v12, 16 }
 0x151   : > { %7351 = vst [vmem:[#allocation36_spill] sm:$0xff] %v5853_v10  ;;  %v5855_v21 = vpop.permute.xlu0 %753  ;;  %v7356_v60 = vshrl.u32 %v5549_v2, 16  ;;  %v1158_v4 = vpack.i.b16 %v7358_v46, %v7357_v28  ;;  %v1642_v58 = vcombine.low %v1389_v29, %v1485_v43  ;;  %v1676_v16 = vcombine.low %v1413_v6, %v1509_v18  ;;  %v7375_v46 = vld [vmem:[#allocation21_spill] sm:$0xff] }
 0x152   : > { %7352 = vst [vmem:[#allocation37_spill] sm:$0xff] %v5855_v21  ;;  %4117 = vrot.lane.b32.xlu1 %v5702_v39, %s4829_s28  ;;  %v1557_v39 = vsel %vm5088_vm2, %v1552_v56, %v5829_v55  ;;  %v7359_v55 = vmov 0   ;;  %v1374_v35 = vrot.slane %v1373_v51, 4  ;;  %v1422_v37 = vrot.slane %v1421_v53, 4  ;;  %v7367_v51 = vld [vmem:[#allocation27_spill] sm:$0xff] }
 0x153   : > { %4115 = vrot.lane.b32.xlu0 %v5687_v45, %s4829_s28  ;;  %v1182_v45 = vpack.i.b16 %v7356_v60, %v7355_v27  ;;  %v1151_v48 = vcombine.high %v5549_v2, %v7359_v55  ;;  %v1083_v31 = vcombine.high %v5565_v13, %v7359_v55  ;;  %v1684_v44 = vcombine.low %v1461_v52, %v1557_v39  ;;  %v7364_v52 = vld [vmem:[#allocation25_spill] sm:$0xff]  ;;  %v7368_v39 = vld [vmem:[#allocation28_spill] sm:$0xff]  ;;  %v3070_v13 = vld [vmem:[%s4877_s19 + $0x8] sm:$0x1] }
 0x154   : > { %v5893_v59 = vpop.permute.xlu1 %773  ;;  %v1470_v56 = vrot.slane %v1469_v40, 4  ;;  %v1494_v41 = vrot.slane %v1493_v3, 4  ;;  %v1518_v36 = vrot.slane %v1517_v25, 4  ;;  %v1542_v47 = vrot.slane %v1541_v19, 4  ;;  %v7371_v40 = vld [vmem:[#allocation17_spill] sm:$0xff]  ;;  %v7372_v25 = vld [vmem:[#allocation18_spill] sm:$0xff] }
 0x155   : > { %7353 = vst [vmem:[#allocation38_spill] sm:$0xff] %v5893_v59  ;;  %v5895_v38 = vpop.permute.xlu0 %769  ;;  %v1185_v8 = vpack.i.b16 %v1151_v48, %v5695_v62  ;;  %v1187_v22 = vshrl.u32 %v1151_v48, 16  ;;  %v1163_v20 = vshrl.u32 %v1083_v31, 16  ;;  %v5923_v1 = vrot.slane %v1642_v58, %v4888_v11  ;;  %v7373_v19 = vld [vmem:[#allocation22_spill] sm:$0xff]  ;;  %v3073_v59 = vld [vmem:[%s4877_s19 + $0x14] sm:$0x1] }
 0x156   : > { %7354 = vst [vmem:[#allocation39_spill] sm:$0xff] %v5895_v38  ;;  %4121 = vrot.lane.b32.xlu1 %v5706_v34, %s4829_s28  ;;  %v4609_v34 = vcombine.low %v1182_v45, %v1182_v45  ;;  %v5926_v14 = vrot.slane %v1650_v7, %v4888_v11  ;;  %v5929_v26 = vrot.slane %v1676_v16, %v4888_v11  ;;  %v1169_v60 = vshrl.u32 %v7373_v19, 16 }
 0x157   : > { %4119 = vrot.lane.b32.xlu0 %v5691_v32, %s4829_s28  ;;  %v7362_v32 = vcombine.low %v5265_v23, %v5265_v23  ;;  %v5932_v61 = vrot.slane %v1684_v44, %v4888_v11  ;;  %v7363_v29 = vcombine.low %v5257_v0, %v5257_v0  ;;  %v1379_v23 = vsel %vm5088_vm2, %v1374_v35, %v5731_v50  ;;  %v7366_v0 = vld [vmem:[#allocation26_spill] sm:$0xff] }
 0x158   : > { %v5913_v63 = vpop.permute.xlu1 %781  ;;  %v1403_v6 = vsel %vm5088_vm2, %v1398_v9, %v5755_v42  ;;  %v1427_v33 = vsel %vm5088_vm2, %v1422_v37, %v5760_v5  ;;  %v1451_v43 = vsel %vm5088_vm2, %v1446_v15, %v7364_v52  ;;  %v1475_v57 = vsel %vm5088_vm2, %v1470_v56, %v7366_v0 }
 0x159   : > { %7360 = vst [vmem:[#allocation40_spill] sm:$0xff] %v5913_v63  ;;  %v5915_v30 = vpop.permute.xlu0 %785  ;;  %v1499_v50 = vsel %vm5088_vm2, %v1494_v41, %v7367_v51  ;;  %v1523_v42 = vsel %vm5088_vm2, %v1518_v36, %v7368_v39  ;;  %v1547_v5 = vsel %vm5088_vm2, %v1542_v47, %v7369_v54  ;;  %v4602_v49 = vcombine.low %v1158_v4, %v1158_v4  ;;  %v7382_v39 = vld [vmem:[#allocation2_spill] sm:$0xff] }
 0x15a   : > { %7361 = vst [vmem:[#allocation41_spill] sm:$0xff] %v5915_v30  ;;  %805 = vrot.lane.b32.xlu1 %v7362_v32, %s4827_s26  ;;  %v1161_v3 = vpack.i.b16 %v1083_v31, %v7371_v40  ;;  %v5969_v27 = vpack.i.b16 %v7373_v19, %v7372_v25  ;;  %v7374_v45 = vshrl.u32 %v7371_v40, 16  ;;  %v1193_v48 = vshrl.u32 %v7375_v46, 16 }
 0x15b   : > { %801 = vrot.lane.b32.xlu0 %v7363_v29, %s4823_s22  ;;  %v1118_v58 = vcombine.high %v7376_v17, %v7359_v55  ;;  %v1152_v4 = vcombine.high %v7375_v46, %v7359_v55  ;;  %v1574_v31 = vcombine.low %v1379_v23, %v1475_v57  ;;  %v1582_v7 = vcombine.low %v1427_v33, %v1523_v42 }
 0x15c   : > { %v5950_v18 = vpop.permute.xlu1 %797  ;;  %v1164_v28 = vpack.i.b16 %v1163_v20, %v7374_v45  ;;  %v1608_v16 = vcombine.low %v1403_v6, %v1499_v50  ;;  %v1616_v44 = vcombine.low %v1451_v43, %v1547_v5  ;;  %v4610_v9 = vcombine.low %v1185_v8, %v1185_v8 }
 0x15d   : > { %7365 = vst [vmem:[#allocation25_spill] sm:$0xff] %v5950_v18  ;;  %v5964_v53 = vpop.permute.xlu0 %761  ;;  %v7378_v37 = vshrl.u32 %v5695_v62, 16  ;;  %v1658_v56 = vcombine.low %v5923_v1, %v5926_v14  ;;  %v1692_v41 = vcombine.low %v5929_v26, %v5932_v61  ;;  %v4603_v47 = vcombine.low %v1161_v3, %v1161_v3 }
 0x15e   : > { %7370 = vst [vmem:[#allocation26_spill] sm:$0xff] %v5964_v53  ;;  %1231 = vrot.lane.b32.xlu1 %v4609_v34, %s4822_s21  ;;  %v1191_v34 = vpack.i.b16 %v7375_v46, %v7376_v17  ;;  %v1050_v20 = vcombine.high %v7372_v25, %v7359_v55  ;;  %v1084_v8 = vcombine.high %v7373_v19, %v7359_v55  ;;  %v7380_v62 = vshrl.u32 %v7376_v17, 16 }
 0x15f   : > { %1203 = vrot.lane.b32.xlu0 %v4602_v49, %s4822_s21  ;;  %v1188_v15 = vpack.i.b16 %v1187_v22, %v7378_v37  ;;  %v7381_v32 = vshrl.u32 %v7372_v25, 16  ;;  %v1198_v23 = vshrl.u32 %v1118_v58, 16  ;;  %v1199_v6 = vshrl.u32 %v1152_v4, 16 }
 0x160   : > { %v5981_v35 = vpop.permute.xlu1 %789  ;;  %v1194_v22 = vpack.i.b16 %v1193_v48, %v7380_v62  ;;  %v6004_v33 = vrot.slane %v1574_v31, %v4888_v11  ;;  %v6007_v52 = vrot.slane %v1582_v7, %v4888_v11  ;;  %v6010_v43 = vrot.slane %v1608_v16, %v4888_v11  ;;  %v7385_v7 = vld [vmem:[#allocation30_spill] sm:$0xff]  ;;  %v7386_v16 = vld [vmem:[#allocation13_spill] sm:$0xff]  ;;  %v7389_v62 = vld [vmem:[#allocation23_spill] sm:$0xff] }
 0x161   : > { %7377 = vst [vmem:[#allocation27_spill] sm:$0xff] %v5981_v35  ;;  %v5989_v36 = vpop.permute.xlu0 %777  ;;  %v1170_v29 = vpack.i.b16 %v1169_v60, %v7381_v32  ;;  %v6013_v0 = vrot.slane %v1616_v44, %v4888_v11  ;;  %v4611_v51 = vcombine.low %v1188_v15, %v1188_v15  ;;  %v4604_v50 = vcombine.low %v1164_v28, %v1164_v28  ;;  %v7390_v32 = vld [vmem:[#allocation24_spill] sm:$0xff]  ;;  %v3076_v35 = vld [vmem:[%s4877_s19 + $0x20] sm:$0x1] }
 0x162   : > { %7379 = vst [vmem:[#allocation28_spill] sm:$0xff] %v5989_v36  ;;  %1235 = vrot.lane.b32.xlu1 %v4610_v9, %s4824_s23  ;;  %v6018_v42 = vrot.slane %v1658_v56, %v7382_v39  ;;  %v6021_v54 = vrot.slane %v1692_v41, %v7382_v39  ;;  %v1197_v49 = vpack.i.b16 %v1152_v4, %v1118_v58  ;;  %v1174_v3 = vshrl.u32 %v1050_v20, 16  ;;  %v7387_v56 = vld [vmem:[#allocation29_spill] sm:$0xff]  ;;  %v7388_v41 = vld [vmem:[#allocation12_spill] sm:$0xff] }
 0x163   : > { %1207 = vrot.lane.b32.xlu0 %v4603_v47, %s4824_s23  ;;  %v6023_v40 = vpack.i.b16 %v1084_v8, %v1050_v20  ;;  %v1175_v25 = vshrl.u32 %v1084_v8, 16  ;;  %v6026_v19 = vpack.i.b16 %v1199_v6, %v1198_v23  ;;  %v4612_v60 = vcombine.low %v1191_v34, %v1191_v34 }
 0x164   : > { %v6015_v57 = vpop.permute.xlu1 %2138  ;;  %7383 = vst [vmem:[#allocation31_spill] sm:$0xff] %v6018_v42  ;;  %7384 = vst [vmem:[#allocation17_spill] sm:$0xff] %v6021_v54  ;;  %v4605_v45 = vcombine.low %v5969_v27, %v5969_v27  ;;  %v1590_v28 = vcombine.low %v6004_v33, %v6007_v52  ;;  %v1624_v46 = vcombine.low %v6010_v43, %v6013_v0  ;;  %v1737_v4 = vshrl.u32 %v6018_v42, 16 }
 0x165   : > { %v2137_v5 = vpop.permute.xlu0 %2136  ;;  %v4613_v17 = vcombine.low %v1194_v22, %v1194_v22  ;;  %v4606_v58 = vcombine.low %v1170_v29, %v1170_v29  ;;  %v1738_v31 = vshrl.u32 %v6021_v54, 16  ;;  %v2160_v44 = vcombine.low %v7386_v16, %v7385_v7  ;;  %v7397_v7 = vld [vmem:[#allocation19_spill] sm:$0xff]  ;;  %v7398_v16 = vld [vmem:[#allocation20_spill] sm:$0xff] }
 0x166   : > { %1239 = vrot.lane.b32.xlu1 %v4611_v51, %s4826_s25  ;;  %v4614_v37 = vcombine.low %v1197_v49, %v1197_v49  ;;  %v4607_v27 = vcombine.low %v6023_v40, %v6023_v40  ;;  %v6041_v15 = vpack.i.b16 %v1175_v25, %v1174_v3  ;;  %v2228_v47 = vcombine.low %v7388_v41, %v7387_v56  ;;  %v7393_v51 = vld [vmem:[#allocation32_spill] sm:$0xff]  ;;  %v7395_v40 = vld [vmem:[#allocation33_spill] sm:$0xff]  ;;  %v7396_v3 = vld [vmem:[#allocation15_spill] sm:$0xff] }
 0x167   : > { %1211 = vrot.lane.b32.xlu0 %v4604_v50, %s4826_s25  ;;  %v4615_v34 = vcombine.low %v6026_v19, %v6026_v19  ;;  %v1674_v20 = vcombine.high %v6018_v42, %v7359_v55  ;;  %v1708_v8 = vcombine.high %v6021_v54, %v7359_v55  ;;  %v6056_v23 = vrot.slane %v1590_v28, %v7382_v39  ;;  %v7394_v50 = vld [vmem:[#allocation14_spill] sm:$0xff]  ;;  %v6204_v54 = vld [vmem:[%s4877_s19 + $0x34] sm:$0xf] }
 0x168   : > { %v2143_v48 = vpop.permute.xlu1 %2142  ;;  %v6059_v6 = vrot.slane %v1624_v46, %v7382_v39  ;;  %v2262_v49 = vcombine.low %v7394_v50, %v7393_v51  ;;  %v2194_v25 = vcombine.low %v7396_v3, %v7395_v40  ;;  %v2168_v28 = vcombine.low %v7398_v16, %v2137_v5 }
 0x169   : > { %v2141_v9 = vpop.permute.xlu0 %2140  ;;  %v2270_v22 = vcombine.low %v7389_v62, %v2143_v48  ;;  %7391 = vst [vmem:[#allocation18_spill] sm:$0xff] %v6056_v23  ;;  %v1743_v48 = vshrl.u32 %v1674_v20, 16  ;;  %v1744_v46 = vshrl.u32 %v1708_v8, 16  ;;  %v1659_v56 = vcombine.high %v5923_v1, %v5926_v14 }
 0x16a   : > { %1243 = vrot.lane.b32.xlu1 %v4612_v60, %s4821_s20  ;;  %v2202_v29 = vcombine.low %v7390_v32, %v2141_v9  ;;  %7392 = vst [vmem:[#allocation22_spill] sm:$0xff] %v6059_v6  ;;  %v6067_v60 = vpack.i.b16 %v1738_v31, %v1737_v4  ;;  %v6077_v41 = vrot.slane %v2228_v47, %v4888_v11  ;;  %v1713_v1 = vshrl.u32 %v6056_v23, 16 }
 0x16b   : > { %1215 = vrot.lane.b32.xlu0 %v4605_v45, %s4821_s20  ;;  %v2236_v45 = vcombine.low %v7397_v7, %v6015_v57  ;;  %v6080_v62 = vrot.slane %v2160_v44, %v4888_v11  ;;  %v4608_v4 = vcombine.low %v6041_v15, %v6041_v15  ;;  %v1693_v57 = vcombine.high %v5929_v26, %v5932_v61 }
 0x16c   : > { %v6065_v19 = vpop.permute.xlu1 %2700  ;;  %v6088_v5 = vrot.slane %v2270_v22, %v4888_v11  ;;  %v6091_v31 = vrot.slane %v2202_v29, %v4888_v11  ;;  %v1714_v14 = vshrl.u32 %v6059_v6, 16  ;;  %v6100_v44 = vrot.slane %v2194_v25, %v4888_v11 }
 0x16d   : > { %v6072_v9 = vpop.permute.xlu0 %2698  ;;  %v4626_v26 = vcombine.low %v6067_v60, %v6067_v60  ;;  %v6106_v61 = vpack.i.b16 %v1708_v8, %v1674_v20  ;;  %v6109_v47 = vrot.slane %v2236_v45, %v4888_v11  ;;  %v6116_v32 = vpack.i.b16 %v1744_v46, %v1743_v48 }
 0x16e   : > { %1247 = vrot.lane.b32.xlu1 %v4613_v17, %s4825_s24  ;;  %v6097_v17 = vrot.slane %v2262_v49, %v4888_v11  ;;  %v1673_v29 = vrot.slane %v1659_v56, %v7382_v39  ;;  %v1606_v51 = vcombine.high %v6056_v23, %v7359_v55  ;;  %v1707_v20 = vrot.slane %v1693_v57, %v7382_v39  ;;  %v6201_v23 = vld [vmem:[%s4877_s19 + $0x28] sm:$0xf] }
 0x16f   : > { %1219 = vrot.lane.b32.xlu0 %v4606_v58, %s4825_s24  ;;  %v6112_v58 = vrot.slane %v2168_v28, %v4888_v11  ;;  %v1591_v8 = vcombine.high %v6004_v33, %v6007_v52  ;;  %v1625_v50 = vcombine.high %v6010_v43, %v6013_v0  ;;  %v2210_v40 = vcombine.low %v6100_v44, %v6091_v31 }
 0x170   : > { %v6102_v15 = vpop.permute.xlu1 %2704  ;;  %v2278_v49 = vcombine.low %v6097_v17, %v6088_v5  ;;  %v1640_v3 = vcombine.high %v6059_v6, %v7359_v55  ;;  %v1749_v60 = vshrl.u32 %v1673_v29, 16  ;;  %v1750_v48 = vshrl.u32 %v1707_v20, 16  ;;  %7403 = vst [vmem:[#allocation13_spill] sm:$0xff] %v6201_v23 }
 0x171   : > { %v6114_v22 = vpop.permute.xlu0 %2702  ;;  %v1675_v33 = vcombine.high %v1673_v29, %v7359_v55  ;;  %v1709_v52 = vcombine.high %v1707_v20, %v7359_v55  ;;  %v2244_v43 = vcombine.low %v6077_v41, %v6109_v47  ;;  %v2176_v0 = vcombine.low %v6080_v62, %v6112_v58 }
 0x172   : > { %1251 = vrot.lane.b32.xlu1 %v4614_v37, %s4823_s22  ;;  %v1715_v37 = vpack.i.b16 %v1714_v14, %v1713_v1  ;;  %v1719_v16 = vshrl.u32 %v1606_v51, 16  ;;  %v1720_v28 = vshrl.u32 %v1640_v3, 16  ;;  %v1605_v46 = vrot.slane %v1591_v8, %v7382_v39 }
 0x173   : > { %1223 = vrot.lane.b32.xlu0 %v4607_v27, %s4823_s22  ;;  %v4627_v27 = vcombine.low %v6106_v61, %v6106_v61  ;;  %v1639_v56 = vrot.slane %v1625_v50, %v7382_v39  ;;  %v6152_v57 = vrot.slane %v2278_v49, %v7382_v39  ;;  %v6155_v1 = vrot.slane %v2210_v40, %v7382_v39 }
 0x174   : > { %v6134_v25 = vpop.permute.xlu1 %2708  ;;  %v4619_v14 = vcombine.low %v1715_v37, %v1715_v37  ;;  %v1718_v61 = vpack.i.b16 %v1640_v3, %v1606_v51  ;;  %v6160_v45 = vpack.i.b16 %v1707_v20, %v1673_v29  ;;  %v6164_v8 = vpack.i.b16 %v1709_v52, %v1675_v33 }
 0x175   : > { %v6142_v7 = vpop.permute.xlu0 %2706  ;;  %7399 = vst [vmem:[#allocation21_spill] sm:$0xff] %v6152_v57  ;;  %7400 = vst [vmem:[#allocation16_spill] sm:$0xff] %v6155_v1  ;;  %v1755_v50 = vshrl.u32 %v1675_v33, 16  ;;  %v6167_v49 = vrot.slane %v2244_v43, %v7382_v39  ;;  %v6170_v40 = vrot.slane %v2176_v0, %v7382_v39  ;;  %v1725_v51 = vshrl.u32 %v1605_v46, 16  ;;  %v6181_v43 = vld [vmem:[%s4877_s19 + $0x4] sm:$0xf] }
 0x176   : > { %1255 = vrot.lane.b32.xlu1 %v4615_v34, %s4827_s26  ;;  %v6162_v34 = vpack.i.b16 %v1750_v48, %v1749_v60  ;;  %v1756_v37 = vshrl.u32 %v1709_v52, 16  ;;  %v1721_v29 = vpack.i.b16 %v1720_v28, %v1719_v16  ;;  %v6175_v20 = vpack.i.b16 %v1639_v56, %v1605_v46  ;;  %v6184_v0 = vld [vmem:[%s4877_s19 + $0x10] sm:$0xf]  ;;  %v6187_v52 = vld [vmem:[%s4877_s19 + $0x1c] sm:$0xf] }
 0x177   : > { %1227 = vrot.lane.b32.xlu0 %v4608_v4, %s4827_s26  ;;  %7401 = vst [vmem:[#allocation2_spill] sm:$0xff] %v6167_v49  ;;  %7402 = vst [vmem:[#allocation30_spill] sm:$0xff] %v6170_v40  ;;  %v1726_v3 = vshrl.u32 %v1639_v56, 16  ;;  %v1607_v60 = vcombine.high %v1605_v46, %v7359_v55  ;;  %v4620_v48 = vcombine.low %v1718_v61, %v1718_v61  ;;  %v2324_v46 = vshrl.u32 %v6152_v57, 16 }
 0x178   : > { %v6158_v6 = vpop.permute.xlu1 %2712  ;;  %v1641_v33 = vcombine.high %v1639_v56, %v7359_v55  ;;  %v2300_v16 = vshrl.u32 %v6155_v1, 16  ;;  %v6211_v24 = vpack.i.b16 %v1756_v37, %v1755_v50  ;;  %v4621_v12 = vcombine.low %v1721_v29, %v1721_v29  ;;  %v3079_v37 = vld [vmem:[%s4877_s19 + $0x2c] sm:$0x1] }
 0x179   : > { %v6172_v4 = vpop.permute.xlu0 %2710  ;;  %v1731_v61 = vshrl.u32 %v1607_v60, 16  ;;  %v2323_v2 = vshrl.u32 %v6167_v49, 16  ;;  %v6221_v36 = vpack.i.b16 %v1726_v3, %v1725_v51  ;;  %v2299_v50 = vshrl.u32 %v6170_v40, 16  ;;  %v3082_v51 = vld [vmem:[%s4877_s19 + $0x38] sm:$0x1] }
 0x17a   : > { %1788 = vrot.lane.b32.xlu1 %v4626_v26, %s4822_s21  ;;  %7404 = vst [vmem:[#allocation29_spill] sm:$0xff] %v6211_v24  ;;  %v1732_v56 = vshrl.u32 %v1641_v33, 16  ;;  %v6233_v18 = vpack.i.b16 %v1641_v33, %v1607_v60  ;;  %v3124_v29 = vrot.slane %v3070_v13, 5  ;;  %v6249_v60 = vld [vmem:[%s4877_s19 + $0x4c] sm:$0xf]  ;;  %v3131_v33 = vrot.slane %v3073_v59, 5 }
 0x17b   : > { %1760 = vrot.lane.b32.xlu0 %v4619_v14, %s4822_s21  ;;  %v6215_v14 = vld [vmem:[%s4877_s19 + $0x40] sm:$0xf]  ;;  %v2325_v30 = vpack.i.b16 %v2324_v46, %v2323_v2  ;;  %v2301_v53 = vpack.i.b16 %v2300_v16, %v2299_v50  ;;  %v7407_v2 = vcombine.low %v6116_v32, %v6116_v32  ;;  %v3138_v46 = vrot.slane %v3076_v35, 5  ;;  %v3085_v16 = vld [vmem:[%s4877_s19 + $0x44] sm:$0x1] }
 0x17c   : > { %v6193_v28 = vpop.permute.xlu1 %2716  ;;  %7405 = vst [vmem:[#allocation12_spill] sm:$0xff] %v6215_v14  ;;  %v3145_v3 = vrot.slane %v3079_v37, 5  ;;  %v7408_v50 = vrot.slane %v6181_v43, 5  ;;  %v7409_v13 = vrot.slane %v6184_v0, 5  ;;  %v7410_v42 = vrot.slane %v6187_v52, 5 }
 0x17d   : > { %v6206_v26 = vpop.permute.xlu0 %2714  ;;  %v4643_v59 = vcombine.low %v2325_v30, %v2325_v30  ;;  %v6262_v35 = vcombine.high %v6152_v57, %v7359_v55  ;;  %v4636_v21 = vcombine.low %v2301_v53, %v2301_v53  ;;  %v6283_v57 = vld [vmem:[%s4877_s19 + $0x50] sm:$0x1]  ;;  %v7413_v53 = vrot.slane %v6215_v14, 5 }
 0x17e   : > { %1792 = vrot.lane.b32.xlu1 %v4627_v27, %s4824_s23  ;;  %v6242_v27 = vpack.i.b16 %v1732_v56, %v1731_v61  ;;  %v3123_v56 = vrot.slane %v7408_v50, 4  ;;  %v3130_v61 = vrot.slane %v7409_v13, 4  ;;  %v3137_v32 = vrot.slane %v7410_v42, 4 }
 0x17f   : > { %1764 = vrot.lane.b32.xlu0 %v4620_v48, %s4824_s23  ;;  %v7412_v48 = vrot.slane %v6204_v54, 5  ;;  %v6272_v42 = vcombine.high %v6155_v1, %v7359_v55  ;;  %v3158_v1 = vrot.slane %v7413_v53, 4  ;;  %v3159_v24 = vrot.slane %v3085_v16, 5 }
 0x180   : > { %v6231_v38 = vpop.permute.xlu1 %2720  ;;  %7406 = vst [vmem:[#allocation23_spill] sm:$0xff] %v6242_v27  ;;  %v2192_v30 = vcombine.high %v6170_v40, %v7359_v55  ;;  %v6304_v53 = vsel %vm5413_vm13, %v3130_v61, %v3131_v33  ;;  %v6309_v40 = vsel %vm5413_vm13, %v3137_v32, %v3138_v46  ;;  %v7415_v14 = vrot.slane %v6249_v60, 5 }
 0x181   : > { %v6238_v63 = vpop.permute.xlu0 %2718  ;;  %v3151_v50 = vrot.slane %v7412_v48, 4  ;;  %v3166_v32 = vrot.slane %v6283_v57, 5 }
 0x182   : > { %1796 = vrot.lane.b32.xlu1 %v7407_v2, %s4826_s25  ;;  %v3152_v2 = vrot.slane %v3082_v51, 5  ;;  %v6293_v51 = vld [vmem:[%s4877_s19 + $0x58] sm:$0xf]  ;;  %v2304_v61 = vpack.i.b16 %v6272_v42, %v2192_v30  ;;  %v3165_v46 = vrot.slane %v7415_v14, 4  ;;  %v2848_v14 = vcombine.low %v6102_v15, %v6231_v38 }
 0x183   : > { %1768 = vrot.lane.b32.xlu0 %v4621_v12, %s4826_s25  ;;  %v7411_v12 = vrot.slane %v6201_v23, 5  ;;  %v6300_v23 = vsel %vm5413_vm13, %v3123_v56, %v3124_v29  ;;  %v6320_v29 = vld [vmem:[%s4877_s19] sm:$0xe] }
 0x184   : > { %v2725_v10 = vpop.permute.xlu1 %2724  ;;  %v6317_v27 = vsel %vm5413_vm13, %v3151_v50, %v3152_v2  ;;  %v7416_v2 = vcombine.low %v6160_v45, %v6160_v45 }
 0x185   : > { %v3144_v37 = vrot.slane %v7411_v12, 4  ;;  %v6268_v13 = vpop.permute.xlu0 %2722  ;;  %v2260_v12 = vcombine.high %v6167_v49, %v7359_v55  ;;  %v6296_v49 = vld [vmem:[%s4877_s19 + $0x5c] sm:$0x1]  ;;  %v2822_v57 = vcombine.low %v6134_v25, %v2725_v10  ;;  %v3259_v45 = vcombine.low %v6300_v23, %v6317_v27 }
 0x186   : > { %2374 = vrot.lane.b32.xlu1 %v4643_v59, %s4822_s21  ;;  %v3173_v50 = vrot.slane %v6296_v49, 5  ;;  %v2754_v38 = vcombine.low %v6142_v7, %v6268_v13  ;;  %v2330_v25 = vshrl.u32 %v6262_v35, 16  ;;  %v2814_v49 = vcombine.low %v6065_v19, %v6193_v28 }
 0x187   : > { %2346 = vrot.lane.b32.xlu0 %v4636_v21, %s4822_s21  ;;  %v2328_v21 = vpack.i.b16 %v6262_v35, %v2260_v12  ;;  %v6313_v59 = vsel %vm5413_vm13, %v3144_v37, %v3145_v3  ;;  %v6334_v37 = vsel %vm5413_vm13, %v3158_v1, %v3159_v24  ;;  %v4670_v24 = vrot.slane %v6320_v29, 9 }
 0x188   : > { %v2729_v16 = vpop.permute.xlu1 %2728  ;;  %v2780_v1 = vcombine.low %v6114_v22, %v6238_v63  ;;  %v4637_v27 = vcombine.low %v2304_v61, %v2304_v61  ;;  %v2746_v63 = vcombine.low %v6072_v9, %v6206_v26  ;;  %v2329_v7 = vshrl.u32 %v2260_v12, 16  ;;  %v6393_v61 = vld [vmem:[%s4877_s19 + $0x18] sm:$0xe] }
 0x189   : > { %v2856_v33 = vcombine.low %v6158_v6, %v2729_v16  ;;  %v2727_v56 = vpop.permute.xlu0 %2726  ;;  %v3170_v6 = vrot.slane %v6293_v51, 5  ;;  %v6348_v16 = vld [vmem:[%s4877_s19 + $0xc] sm:$0xe]  ;;  %v4644_v10 = vcombine.low %v2328_v21, %v2328_v21  ;;  %v6374_v28 = vrot.slane %v2848_v14, %v4888_v11 }
 0x18a   : > { %v2788_v3 = vcombine.low %v6172_v4, %v2727_v56  ;;  %1800 = vrot.lane.b32.xlu1 %v7416_v2, %s4821_s20  ;;  %v7417_v4 = vcombine.low %v6175_v20, %v6175_v20  ;;  %v2306_v56 = vshrl.u32 %v6272_v42, 16  ;;  %v4671_v19 = vrot.slane %v6348_v16, 9 }
 0x18b   : > { %v6361_v23 = vrot.slane %v2856_v33, %v4888_v11  ;;  %v6377_v35 = vrot.slane %v2822_v57, %v4888_v11  ;;  %v2305_v13 = vshrl.u32 %v2192_v30, 16  ;;  %v3172_v9 = vrot.slane %v3170_v6, 4 }
 0x18c   : > { %1772 = vrot.lane.b32.xlu0 %v7417_v4, %s4821_s20  ;;  %v6355_v15 = vpop.permute.xlu1 %3619  ;;  %v6369_v22 = vrot.slane %v2788_v3, %v4888_v11  ;;  %v2279_v26 = vcombine.high %v6097_v17, %v6088_v5  ;;  %v6385_v42 = vrot.slane %v2780_v1, %v4888_v11  ;;  %v6388_v12 = vrot.slane %v2754_v38, %v4888_v11 }
 0x18d   : > { %v6363_v20 = vpop.permute.xlu0 %3617  ;;  %v2331_v33 = vpack.i.b16 %v2330_v25, %v2329_v7  ;;  %v2211_v30 = vcombine.high %v6100_v44, %v6091_v31  ;;  %v6398_v3 = vrot.slane %v2814_v49, %v4888_v11  ;;  %v2864_v5 = vcombine.low %v6374_v28, %v6361_v23  ;;  %v3086_v25 = vld [vmem:[%s4877_s19 + $0x48] sm:$0xe] }
 0x18e   : > { %2378 = vrot.lane.b32.xlu1 %v4644_v10, %s4824_s23  ;;  %v2307_v2 = vpack.i.b16 %v2306_v56, %v2305_v13  ;;  %v2245_v14 = vcombine.high %v6077_v41, %v6109_v47  ;;  %v6407_v57 = vrot.slane %v2746_v63, %v4888_v11  ;;  %v2796_v4 = vcombine.low %v6385_v42, %v6369_v22  ;;  %v3083_v63 = vld [vmem:[%s4877_s19 + $0x3c] sm:$0xe] }
 0x18f   : > { %v7418_v31 = vcombine.low %v6162_v34, %v6162_v34  ;;  %v3167_v44 = vsel %vm5413_vm13, %v3165_v46, %v3166_v32  ;;  %v2177_v1 = vcombine.high %v6080_v62, %v6112_v58  ;;  %v2830_v41 = vcombine.low %v6398_v3, %v6377_v35  ;;  %v3080_v34 = vld [vmem:[%s4877_s19 + $0x30] sm:$0xe] }
 0x190   : > { %2350 = vrot.lane.b32.xlu0 %v4637_v27, %s4824_s23  ;;  %v6390_v21 = vpop.permute.xlu1 %3623  ;;  %v7419_v47 = vcombine.low %v6221_v36, %v6221_v36  ;;  %v3293_v38 = vcombine.low %v6304_v53, %v6334_v37  ;;  %v4672_v10 = vrot.slane %v6393_v61, 9  ;;  %v6430_v46 = vrot.slane %v2279_v26, %v7382_v39  ;;  %v3077_v26 = vld [vmem:[%s4877_s19 + $0x24] sm:$0xe] }
 0x191   : > { %v6402_v17 = vpop.permute.xlu0 %3621  ;;  %v2762_v62 = vcombine.low %v6407_v57, %v6388_v12  ;;  %v4645_v32 = vcombine.low %v2331_v33, %v2331_v33  ;;  %v6437_v36 = vrot.slane %v3259_v45, %v4888_v11  ;;  %v6441_v53 = vrot.slane %v2211_v30, %v7382_v39  ;;  %v3089_v33 = vld [vmem:[%s4877_s19 + $0x54] sm:$0xe] }
 0x192   : > { %1804 = vrot.lane.b32.xlu1 %v7418_v31, %s4825_s24  ;;  %v6444_v37 = vrot.slane %v2864_v5, %v7382_v39  ;;  %v4638_v27 = vcombine.low %v2307_v2, %v2307_v2  ;;  %v3174_v56 = vsel %vm5413_vm13, %v3172_v9, %v3173_v50  ;;  %v2259_v7 = vrot.slane %v2245_v14, %v7382_v39  ;;  %v502_v9 = vld [vmem:[%s7263_s1] sm:$0xf] }
 0x193   : > { %v6453_v13 = vrot.slane %v2796_v4, %v7382_v39  ;;  %v3267_v45 = vcombine.low %v6309_v40, %v3167_v44  ;;  %v4674_v61 = vrot.slane %v3080_v34, 9  ;;  %v2191_v30 = vrot.slane %v2177_v1, %v7382_v39  ;;  %4601 = vmatmul.mubr.msk.bf16.vlgmr.msra.gmra.mxu1 %vm839_vm14, %v502_v9 }
 0x194   : > { %1776 = vrot.lane.b32.xlu0 %v7419_v47, %s4825_s24  ;;  %v6434_v58 = vpop.permute.xlu1 %3627  ;;  %v6461_v5 = vrot.slane %v2830_v41, %v7382_v39  ;;  %v4676_v50 = vrot.slane %v3086_v25, 9  ;;  %v6468_v2 = vrot.slane %v2762_v62, %v7382_v39  ;;  %v2334_v14 = vpack.i.b16 %v6430_v46, %v2259_v7  ;;  %1885 = vmatprep.mubr.bf16.mxu1 %v7359_v55 }
 0x195   : > { %v6446_v49 = vpop.permute.xlu0 %3625  ;;  %7420 = vst [vmem:[#allocation24_spill] sm:$0xff] %v6453_v13  ;;  %v3301_v4 = vcombine.low %v6313_v59, %v3174_v56  ;;  %v4675_v31 = vrot.slane %v3083_v63, 9  ;;  %v2310_v1 = vpack.i.b16 %v6441_v53, %v2191_v30  ;;  %v4673_v41 = vrot.slane %v3077_v26, 9 }
 0x196   : > { %2382 = vrot.lane.b32.xlu1 %v4645_v32, %s4826_s25  ;;  %7421 = vst [vmem:[#allocation32_spill] sm:$0xff] %v6468_v2  ;;  %v4677_v47 = vrot.slane %v3089_v33, 9  ;;  %v7422_v62 = vcombine.low %v6164_v8, %v6164_v8  ;;  %v6486_v59 = vrot.slane %v3267_v45, %v4888_v11  ;;  %v7423_v32 = vrot.slane %v6181_v43, 5  ;;  %v7429_v33 = vld [vmem:[#allocation12_spill] sm:$0xff] }
 0x197   : > { %v7425_v63 = vcombine.low %v6233_v18, %v6233_v18  ;;  %v6507_v43 = vrot.slane %v3293_v38, %v4888_v11  ;;  %v7426_v29 = vrot.slane %v6187_v52, 5  ;;  %v7427_v16 = vrot.slane %v6204_v54, 5 }
 0x198   : > { %2354 = vrot.lane.b32.xlu0 %v4638_v27, %s4826_s25  ;;  %v6470_v40 = vpop.permute.xlu1 %3631  ;;  %v3122_v25 = vsel %vm5413_vm13, %v4670_v24, %v7423_v32  ;;  %v7424_v27 = vrot.slane %v6184_v0, 5  ;;  %v4646_v26 = vcombine.low %v2334_v14, %v2334_v14  ;;  %v2336_v38 = vshrl.u32 %v6430_v46, 16 }
 0x199   : > { %v6475_v44 = vpop.permute.xlu0 %3629  ;;  %v3136_v0 = vsel %vm5413_vm13, %v4672_v10, %v7426_v29  ;;  %v3150_v24 = vsel %vm5413_vm13, %v4674_v61, %v7427_v16  ;;  %v6525_v52 = vrot.slane %v3301_v4, %v4888_v11  ;;  %v7430_v10 = vrot.slane %v7429_v33, 5 }
 0x19a   : > { %1808 = vrot.lane.b32.xlu1 %v7422_v62, %s4823_s22  ;;  %v3129_v56 = vsel %vm5413_vm13, %v4671_v19, %v7424_v27  ;;  %v7428_v19 = vrot.slane %v6249_v60, 5  ;;  %v4639_v61 = vcombine.low %v2310_v1, %v2310_v1  ;;  %v2312_v60 = vshrl.u32 %v6441_v53, 16  ;;  %v7431_v62 = vld [vmem:[#allocation13_spill] sm:$0xff] }
 0x19b   : > { %v3157_v54 = vsel %vm5413_vm13, %v4675_v31, %v7430_v10  ;;  %v3171_v4 = vsel %vm5413_vm13, %v4677_v47, %v3170_v6  ;;  %v2335_v32 = vshrl.u32 %v2259_v7, 16  ;;  %v3275_v31 = vcombine.low %v6437_v36, %v6486_v59 }
 0x19c   : > { %1780 = vrot.lane.b32.xlu0 %v7425_v63, %s4823_s22  ;;  %v3164_v45 = vsel %vm5413_vm13, %v4676_v50, %v7428_v19  ;;  %v6521_v18 = vpop.permute.xlu1 %3635  ;;  %v7432_v50 = vrot.slane %v7431_v62, 5  ;;  %v3191_v27 = vcombine.low %v3122_v25, %v3150_v24  ;;  %v2311_v63 = vshrl.u32 %v2191_v30, 16 }
 0x19d   : > { %v6531_v9 = vpop.permute.xlu0 %3633  ;;  %v3199_v1 = vcombine.low %v3136_v0, %v3164_v45  ;;  %v2295_v29 = vcombine.high %v6430_v46, %v7359_v55  ;;  %v2227_v51 = vcombine.high %v6441_v53, %v7359_v55  ;;  %v2337_v6 = vpack.i.b16 %v2336_v38, %v2335_v32  ;;  %v7433_v46 = vld [vmem:[#allocation29_spill] sm:$0xff] }
 0x19e   : > { %v3143_v14 = vsel %vm5413_vm13, %v4673_v41, %v7432_v50  ;;  %2386 = vrot.lane.b32.xlu1 %v4646_v26, %s4821_s20  ;;  %v3225_v41 = vcombine.low %v3129_v56, %v3157_v54  ;;  %v3309_v47 = vcombine.low %v6507_v43, %v6525_v52  ;;  %v2313_v25 = vpack.i.b16 %v2312_v60, %v2311_v63  ;;  %v7435_v26 = vld [vmem:[#allocation23_spill] sm:$0xff] }
 0x19f   : > { %v3233_v16 = vcombine.low %v3143_v14, %v3171_v4  ;;  %v2261_v0 = vcombine.high %v2259_v7, %v7359_v55  ;;  %v2193_v24 = vcombine.high %v2191_v30, %v7359_v55  ;;  %v7434_v45 = vcombine.low %v7433_v46, %v7433_v46 }
 0x1a0   : > { %2358 = vrot.lane.b32.xlu0 %v4639_v61, %s4821_s20  ;;  %v6550_v48 = vpop.permute.xlu1 %3639  ;;  %v6563_v53 = vrot.slane %v3191_v27, %v4888_v11  ;;  %v6566_v56 = vrot.slane %v3199_v1, %v4888_v11  ;;  %v7436_v38 = vcombine.low %v7435_v26, %v7435_v26  ;;  %v2342_v33 = vshrl.u32 %v2295_v29, 16 }
 0x1a1   : > { %v6554_v19 = vpop.permute.xlu0 %3637  ;;  %v2318_v7 = vshrl.u32 %v2227_v51, 16  ;;  %v6573_v30 = vrot.slane %v3275_v31, %v7382_v39  ;;  %v6576_v10 = vrot.slane %v3225_v41, %v4888_v11  ;;  %v4647_v61 = vcombine.low %v2337_v6, %v2337_v6 }
 0x1a2   : > { %1812 = vrot.lane.b32.xlu1 %v7434_v45, %s4827_s26  ;;  %v2340_v60 = vpack.i.b16 %v2295_v29, %v2261_v0  ;;  %v6579_v62 = vrot.slane %v3309_v47, %v7382_v39  ;;  %v6582_v50 = vrot.slane %v3233_v16, %v4888_v11  ;;  %v4640_v4 = vcombine.low %v2313_v25, %v2313_v25 }
 0x1a3   : > { %7437 = vst [vmem:[#allocation14_spill] sm:$0xff] %v6573_v30  ;;  %v2316_v32 = vpack.i.b16 %v2227_v51, %v2193_v24  ;;  %v2341_v27 = vshrl.u32 %v2261_v0, 16  ;;  %v2317_v1 = vshrl.u32 %v2193_v24, 16  ;;  %v3207_v31 = vcombine.low %v6563_v53, %v6566_v56 }
 0x1a4   : > { %1784 = vrot.lane.b32.xlu0 %v7436_v38, %s4827_s26  ;;  %v3644_v54 = vpop.permute.xlu1 %3643  ;;  %7438 = vst [vmem:[#allocation33_spill] sm:$0xff] %v6579_v62  ;;  %v4648_v6 = vcombine.low %v2340_v60, %v2340_v60  ;;  %v2910_v47 = vshrl.u32 %v6444_v37, 16  ;;  %v2886_v16 = vshrl.u32 %v6453_v13, 16  ;;  %v3354_v51 = vshrl.u32 %v6573_v30, 16 }
 0x1a5   : > { %v3642_v14 = vpop.permute.xlu0 %3641  ;;  %v2343_v63 = vpack.i.b16 %v2342_v33, %v2341_v27  ;;  %v2319_v29 = vpack.i.b16 %v2318_v7, %v2317_v1  ;;  %v4641_v25 = vcombine.low %v2316_v32, %v2316_v32  ;;  %v3355_v0 = vshrl.u32 %v6579_v62, 16 }
 0x1a6   : > { %2390 = vrot.lane.b32.xlu1 %v4647_v61, %s4825_s24  ;;  %v3241_v24 = vcombine.low %v6576_v10, %v6582_v50  ;;  %v2909_v45 = vshrl.u32 %v6461_v5, 16  ;;  %v2885_v26 = vshrl.u32 %v6468_v2, 16  ;;  %v2880_v38 = vcombine.high %v6444_v37, %v7359_v55 }
 0x1a7   : > { %v6600_v33 = vrot.slane %v3207_v31, %v7382_v39  ;;  %v4649_v60 = vcombine.low %v2343_v63, %v2343_v63  ;;  %v2812_v8 = vcombine.high %v6453_v13, %v7359_v55  ;;  %v3767_v31 = vcombine.low %v6390_v21, %v6550_v48 }
 0x1a8   : > { %2362 = vrot.lane.b32.xlu0 %v4640_v4, %s4825_s24  ;;  %v3648_v41 = vpop.permute.xlu1 %3647  ;;  %v4642_v4 = vcombine.low %v2319_v29, %v2319_v29  ;;  %v2911_v27 = vpack.i.b16 %v2910_v47, %v2909_v45  ;;  %v2887_v1 = vpack.i.b16 %v2886_v16, %v2885_v26  ;;  %v3673_v63 = vcombine.low %v6446_v49, %v3642_v14 }
 0x1a9   : > { %v3646_v46 = vpop.permute.xlu0 %3645  ;;  %7439 = vst [vmem:[#allocation15_spill] sm:$0xff] %v6600_v33  ;;  %v3775_v7 = vcombine.low %v6470_v40, %v3648_v41  ;;  %v3699_v40 = vcombine.low %v6402_v17, %v6554_v19  ;;  %v2778_v47 = vcombine.high %v6468_v2, %v7359_v55  ;;  %v2916_v16 = vshrl.u32 %v2880_v38, 16  ;;  %v7451_v2 = vld [vmem:[#allocation34_spill] sm:$0xff] }
 0x1aa   : > { %2394 = vrot.lane.b32.xlu1 %v4648_v6, %s4823_s22  ;;  %v3707_v61 = vcombine.low %v6475_v44, %v3646_v46  ;;  %v2846_v6 = vcombine.high %v6461_v5, %v7359_v55  ;;  %v3741_v44 = vcombine.low %v6434_v58, %v3644_v54  ;;  %v6623_v46 = vrot.slane %v3241_v24, %v7382_v39 }
 0x1ab   : > { %v3733_v21 = vcombine.low %v6355_v15, %v6521_v18  ;;  %v3665_v17 = vcombine.low %v6363_v20, %v6531_v9  ;;  %v6630_v58 = vrot.slane %v3775_v7, %v4888_v11  ;;  %v4660_v19 = vcombine.low %v2911_v27, %v2911_v27 }
 0x1ac   : > { %2366 = vrot.lane.b32.xlu0 %v4641_v25, %s4823_s22  ;;  %v6605_v32 = vpop.permute.xlu1 %4093  ;;  %v2914_v41 = vpack.i.b16 %v2880_v38, %v2846_v6  ;;  %7440 = vst [vmem:[#allocation19_spill] sm:$0xff] %v6623_v46  ;;  %v6633_v49 = vrot.slane %v3707_v61, %v4888_v11  ;;  %v4653_v54 = vcombine.low %v2887_v1, %v2887_v1  ;;  %v2892_v25 = vshrl.u32 %v2812_v8, 16 }
 0x1ad   : > { %v6617_v29 = vpop.permute.xlu0 %4091  ;;  %v2890_v14 = vpack.i.b16 %v2812_v8, %v2778_v47  ;;  %v6639_v24 = vrot.slane %v3767_v31, %v4888_v11  ;;  %v6642_v15 = vrot.slane %v3699_v40, %v4888_v11  ;;  %v6645_v20 = vrot.slane %v3741_v44, %v4888_v11 }
 0x1ae   : > { %2398 = vrot.lane.b32.xlu1 %v4649_v60, %s4827_s26  ;;  %v6648_v18 = vrot.slane %v3673_v63, %v4888_v11  ;;  %v2915_v45 = vshrl.u32 %v2846_v6, 16  ;;  %v2891_v26 = vshrl.u32 %v2778_v47, 16  ;;  %v3330_v8 = vshrl.u32 %v6600_v33, 16 }
 0x1af   : > { %v3331_v38 = vshrl.u32 %v6623_v46, 16  ;;  %v6656_v7 = vrot.slane %v3733_v21, %v4888_v11  ;;  %v6659_v61 = vrot.slane %v3665_v17, %v4888_v11  ;;  %v3783_v60 = vcombine.low %v6639_v24, %v6630_v58 }
 0x1b0   : > { %2370 = vrot.lane.b32.xlu0 %v4642_v4, %s4827_s26  ;;  %v6636_v48 = vpop.permute.xlu1 %4097  ;;  %v3715_v4 = vcombine.low %v6642_v15, %v6633_v49  ;;  %v2865_v27 = vcombine.high %v6374_v28, %v6361_v23  ;;  %v2797_v1 = vcombine.high %v6385_v42, %v6369_v22  ;;  %v4661_v31 = vcombine.low %v2914_v41, %v2914_v41 }
 0x1b1   : > { %v6650_v9 = vpop.permute.xlu0 %4095  ;;  %v2917_v40 = vpack.i.b16 %v2916_v16, %v2915_v45  ;;  %v3749_v44 = vcombine.low %v6656_v7, %v6645_v20  ;;  %v3681_v63 = vcombine.low %v6659_v61, %v6648_v18  ;;  %v4654_v21 = vcombine.low %v2890_v14, %v2890_v14 }
 0x1b2   : > { %2960 = vrot.lane.b32.xlu1 %v4660_v19, %s4822_s21  ;;  %v2893_v17 = vpack.i.b16 %v2892_v25, %v2891_v26  ;;  %v2831_v23 = vcombine.high %v6398_v3, %v6377_v35  ;;  %v3356_v22 = vpack.i.b16 %v3355_v0, %v3354_v51  ;;  %v2763_v28 = vcombine.high %v6407_v57, %v6388_v12 }
 0x1b3   : > { %v6688_v42 = vrot.slane %v3783_v60, %v7382_v39  ;;  %v6691_v41 = vrot.slane %v3715_v4, %v7382_v39  ;;  %v3332_v16 = vpack.i.b16 %v3331_v38, %v3330_v8  ;;  %v6695_v35 = vrot.slane %v2865_v27, %v7382_v39 }
 0x1b4   : > { %2932 = vrot.lane.b32.xlu0 %v4653_v54, %s4822_s21  ;;  %v6670_v6 = vpop.permute.xlu1 %4101  ;;  %v4662_v19 = vcombine.low %v2917_v40, %v2917_v40  ;;  %v3291_v51 = vcombine.high %v6573_v30, %v7359_v55  ;;  %v3325_v12 = vcombine.high %v6579_v62, %v7359_v55  ;;  %v6704_v57 = vrot.slane %v2797_v1, %v7382_v39  ;;  %v7442_v40 = vld [vmem:[#allocation4_spill] sm:$0xff] }
 0x1b5   : > { %v6676_v47 = vpop.permute.xlu0 %4099  ;;  %v6707_v0 = vrot.slane %v3749_v44, %v7382_v39  ;;  %v6710_v54 = vrot.slane %v3681_v63, %v7382_v39  ;;  %v4655_v25 = vcombine.low %v2893_v17, %v2893_v17  ;;  %v6715_v45 = vrot.slane %v2831_v23, %v7382_v39  ;;  %v7443_v44 = vld [vmem:[#allocation3_spill] sm:$0xff] }
 0x1b6   : > { %2964 = vrot.lane.b32.xlu1 %v4661_v31, %s4824_s23  ;;  %v4685_v26 = vcombine.low %v3356_v22, %v3356_v22  ;;  %v3223_v8 = vcombine.high %v6600_v33, %v7359_v55  ;;  %v3257_v38 = vcombine.high %v6623_v46, %v7359_v55  ;;  %v6723_v60 = vrot.slane %v2763_v28, %v7382_v39  ;;  %v7441_v31 = vld [vmem:[#allocation37_spill] sm:$0xff] }
 0x1b7   : > { %v4678_v4 = vcombine.low %v3332_v16, %v3332_v16  ;;  %v7444_v63 = vpack.i.b16 %v7442_v40, %v7443_v44  ;;  %v2920_v23 = vpack.i.b16 %v6695_v35, %v6715_v45  ;;  %v3359_v16 = vpack.i.b16 %v3325_v12, %v3291_v51  ;;  %v7446_v44 = vld [vmem:[#allocation26_spill] sm:$0xff] }
 0x1b8   : > { %2936 = vrot.lane.b32.xlu0 %v4654_v21, %s4824_s23  ;;  %v6697_v3 = vpop.permute.xlu1 %4105  ;;  %v2896_v28 = vpack.i.b16 %v6704_v57, %v6723_v60  ;;  %v3335_v40 = vpack.i.b16 %v3257_v38, %v3223_v8  ;;  %v2922_v34 = vshrl.u32 %v6695_v35, 16  ;;  %v3361_v46 = vshrl.u32 %v3325_v12, 16 }
 0x1b9   : > { %v6712_v14 = vpop.permute.xlu0 %4103  ;;  %v809_v21 = vsel %vm465_vm3, %v7444_v63, %v7441_v31  ;;  %v3360_v31 = vshrl.u32 %v3291_v51, 16  ;;  %v4663_v27 = vcombine.low %v2920_v23, %v2920_v23  ;;  %v2898_v62 = vshrl.u32 %v6704_v57, 16 }
 0x1ba   : > { %2968 = vrot.lane.b32.xlu1 %v4662_v19, %s4826_s25  ;;  %v7445_v19 = vld [vmem:[#allocation36_spill] sm:$0xff]  ;;  %v3310_v51 = vcombine.high %v6507_v43, %v6525_v52  ;;  %v4686_v12 = vcombine.low %v3359_v16, %v3359_v16  ;;  %v2921_v30 = vshrl.u32 %v6715_v45, 16  ;;  %v3337_v43 = vshrl.u32 %v3257_v38, 16 }
 0x1bc   : > { %2940 = vrot.lane.b32.xlu0 %v4655_v25, %s4826_s25  ;;  %v6735_v17 = vpop.permute.xlu1 %4109  ;;  %v811_v25 = vsel %vm469_vm4, %v809_v21, %v7445_v19  ;;  %v3276_v21 = vcombine.high %v6437_v36, %v6486_v59  ;;  %v7448_v19 = vld [vmem:[#allocation5_spill] sm:$0xff]  ;;  %v4679_v36 = vcombine.low %v3335_v40, %v3335_v40  ;;  %v2897_v59 = vshrl.u32 %v6723_v60, 16  ;;  %v7453_v40 = vld [vmem:[#allocation39_spill] sm:$0xff] }
 0x1bd   : > { %v6739_v22 = vpop.permute.xlu0 %4107  ;;  %v813_v63 = vsel %vm472_vm5, %v811_v25, %v7446_v44  ;;  %v7449_v25 = vld [vmem:[#allocation6_spill] sm:$0xff] }
 0x1be   : > { %3405 = vrot.lane.b32.xlu1 %v4685_v26, %s4822_s21  ;;  %v4656_v26 = vcombine.low %v2896_v28, %v2896_v28  ;;  %v7450_v44 = vpack.i.b16 %v7448_v19, %v7449_v25  ;;  %v3336_v28 = vshrl.u32 %v3223_v8, 16  ;;  %v815_v13 = vsel %vm475_vm6, %v813_v63, %v7451_v2  ;;  %v7452_v2 = vld [vmem:[#allocation41_spill] sm:$0xff] }
 0x1bf   : > { %v2923_v19 = vpack.i.b16 %v2922_v34, %v2921_v30  ;;  %v2899_v8 = vpack.i.b16 %v2898_v62, %v2897_v59  ;;  %v3362_v25 = vpack.i.b16 %v3361_v46, %v3360_v31  ;;  %v817_v38 = vsel %vm478_vm7, %v815_v13, %v7453_v40 }
 0x1c0   : > { %3377 = vrot.lane.b32.xlu0 %v4678_v4, %s4822_s21  ;;  %v6749_v1 = vpop.permute.xlu1 %4113  ;;  %v7447_v4 = vld [vmem:[#allocation40_spill] sm:$0xff]  ;;  %v6784_v34 = vrot.slane %v3276_v21, %v7382_v39  ;;  %v6794_v46 = vcombine.high %v6695_v35, %v7359_v55 }
 0x1c1   : > { %v6752_v33 = vpop.permute.xlu0 %4111  ;;  %v824_v23 = vsel %vm465_vm3, %v7450_v44, %v7447_v4  ;;  %v3208_v4 = vcombine.high %v6563_v53, %v6566_v56  ;;  %v6787_v53 = vrot.slane %v3310_v51, %v7382_v39  ;;  %v7454_v56 = vld [vmem:[#allocation27_spill] sm:$0xff]  ;;  %v4657_v21 = vcombine.low %v2899_v8, %v2899_v8  ;;  %v7455_v51 = vld [vmem:[#allocation38_spill] sm:$0xff] }
 0x1c2   : > { %2972 = vrot.lane.b32.xlu1 %v4663_v27, %s4821_s20  ;;  %v3242_v27 = vcombine.high %v6576_v10, %v6582_v50  ;;  %v826_v63 = vsel %vm469_vm4, %v824_v23, %v7452_v2  ;;  %v3338_v10 = vpack.i.b16 %v3337_v43, %v3336_v28  ;;  %v4664_v50 = vcombine.low %v2923_v19, %v2923_v19 }
 0x1c3   : > { %v828_v30 = vsel %vm472_vm5, %v826_v63, %v7454_v56  ;;  %v6797_v13 = vrot.slane %v3208_v4, %v7382_v39  ;;  %v819_v44 = vsel %vm481_vm8, %v817_v38, %v7455_v51  ;;  %v6806_v23 = vcombine.high %v6704_v57, %v7359_v55  ;;  %v7458_v38 = vld [vmem:[#allocation25_spill] sm:$0xff] }
 0x1c4   : > { %2944 = vrot.lane.b32.xlu0 %v4656_v26, %s4821_s20  ;;  %v6770_v52 = vpop.permute.xlu1 %4117  ;;  %v6800_v31 = vrot.slane %v3242_v27, %v7382_v39  ;;  %v4687_v35 = vcombine.low %v3362_v25, %v3362_v25  ;;  %v3365_v59 = vpack.i.b16 %v6787_v53, %v6784_v34  ;;  %v4680_v43 = vcombine.low %v3338_v10, %v3338_v10  ;;  %v7457_v25 = vld [vmem:[#allocation28_spill] sm:$0xff] }
 0x1c5   : > { %v6776_v16 = vpop.permute.xlu0 %4115  ;;  %v2779_v19 = vcombine.high %v6723_v60, %v7359_v55  ;;  %v3366_v57 = vshrl.u32 %v6784_v34, 16  ;;  %v3367_v4 = vshrl.u32 %v6787_v53, 16  ;;  %v821_v2 = vsel %vm484_vm9, %v819_v44, %v7457_v25 }
 0x1c6   : > { %3409 = vrot.lane.b32.xlu1 %v4686_v12, %s4824_s23  ;;  %v7456_v12 = vld [vmem:[#allocation35_spill] sm:$0xff]  ;;  %v3341_v63 = vpack.i.b16 %v6800_v31, %v6797_v13  ;;  %v3342_v10 = vshrl.u32 %v6797_v13, 16 }
 0x1c7   : > { %v830_v28 = vsel %vm475_vm6, %v828_v30, %v7456_v12  ;;  %v2902_v30 = vpack.i.b16 %v6806_v23, %v2779_v19  ;;  %v4597_v12 = vld [vmem:[%s7263_s1 + $0x4] sm:$0xf] }
 0x1c8   : > { %3381 = vrot.lane.b32.xlu0 %v4679_v36, %s4824_s23  ;;  %v4122_v62 = vpop.permute.xlu1 %4121  ;;  %v2847_v36 = vcombine.high %v6715_v45, %v7359_v55  ;;  %v832_v60 = vsel %vm478_vm7, %v830_v28, %v7458_v38 }
 0x1c9   : > { %v4120_v26 = vpop.permute.xlu0 %4119  ;;  %v4249_v27 = vcombine.low %v6697_v3, %v4122_v62  ;;  %v4241_v3 = vcombine.low %v6636_v48, %v6749_v1  ;;  %v4215_v62 = vcombine.low %v6670_v6, %v6770_v52  ;;  %v844_v48 = vsel %vm843_vm10, %v821_v2, 0 }
 0x1ca   : > { %2976 = vrot.lane.b32.xlu1 %v4664_v50, %s4825_s24  ;;  %v2926_v45 = vpack.i.b16 %v6794_v46, %v2847_v36  ;;  %v4181_v40 = vcombine.low %v6712_v14, %v4120_v26  ;;  %v3343_v14 = vshrl.u32 %v6800_v31, 16  ;;  %v4173_v26 = vcombine.low %v6650_v9, %v6752_v33 }
 0x1cb   : > { %v4207_v6 = vcombine.low %v6605_v32, %v6735_v17  ;;  %v6848_v1 = vrot.slane %v4249_v27, %v4888_v11  ;;  %v2928_v9 = vshrl.u32 %v6794_v46, 16  ;;  %v4658_v32 = vcombine.low %v2902_v30, %v2902_v30 }
 0x1cc   : > { %2948 = vrot.lane.b32.xlu0 %v4657_v21, %s4825_s24  ;;  %v806_v8 = vpop.permute.xlu1 %805  ;;  %v4147_v21 = vcombine.low %v6676_v47, %v6776_v16  ;;  %v4665_v33 = vcombine.low %v2926_v45, %v2926_v45  ;;  %v4139_v47 = vcombine.low %v6617_v29, %v6739_v22  ;;  %v6857_v16 = vrot.slane %v4181_v40, %v4888_v11 }
 0x1cd   : > { %v802_v56 = vpop.permute.xlu0 %801  ;;  %v2904_v17 = vshrl.u32 %v6806_v23, 16  ;;  %v6866_v28 = vrot.slane %v4241_v3, %v4888_v11  ;;  %v6869_v46 = vrot.slane %v4215_v62, %v4888_v11  ;;  %v4688_v29 = vcombine.low %v3365_v59, %v3365_v59 }
 0x1ce   : > { %v834_v50 = vsel %vm481_vm8, %v832_v60, %v802_v56  ;;  %3413 = vrot.lane.b32.xlu1 %v4687_v35, %s4826_s25  ;;  %v2927_v22 = vshrl.u32 %v2847_v36, 16  ;;  %v6873_v35 = vrot.slane %v4173_v26, %v4888_v11  ;;  %v4681_v23 = vcombine.low %v3341_v63, %v3341_v63 }
 0x1cf   : > { %v836_v51 = vsel %vm484_vm9, %v834_v50, %v806_v8  ;;  %v2903_v27 = vshrl.u32 %v2779_v19, 16  ;;  %v6880_v8 = vrot.slane %v4207_v6, %v4888_v11  ;;  %v4257_v25 = vcombine.low %v6866_v28, %v6848_v1 }
 0x1d0   : > { %3385 = vrot.lane.b32.xlu0 %v4680_v43, %s4826_s25  ;;  %4598 = vmatprep.subr.msk.bf16.mxu0 %vm843_vm10, %v836_v51  ;;  %v6851_v52 = vpop.permute.xlu1 %1231  ;;  %v6876_v43 = vrot.slane %v4147_v21, %v4888_v11  ;;  %v2929_v45 = vpack.i.b16 %v2928_v9, %v2927_v22  ;;  %v3368_v59 = vpack.i.b16 %v3367_v4, %v3366_v57 }
 0x1d1   : > { %863 = vmatpush1.bf16.msra.mxu0 %v844_v48  ;;  %v6859_v44 = vpop.permute.xlu0 %1203  ;;  %v6886_v36 = vrot.slane %v4139_v47, %v4888_v11  ;;  %v4189_v40 = vcombine.low %v6873_v35, %v6857_v16  ;;  %v2905_v63 = vpack.i.b16 %v2904_v17, %v2903_v27  ;;  %v3344_v19 = vpack.i.b16 %v3343_v14, %v3342_v10 }
 0x1d2   : > { %2980 = vrot.lane.b32.xlu1 %v4665_v33, %s4823_s22  ;;  %v4223_v60 = vcombine.low %v6880_v8, %v6869_v46  ;;  %v3292_v57 = vcombine.high %v6784_v34, %v7359_v55  ;;  %v3326_v11 = vcombine.high %v6787_v53, %v7359_v55  ;;  %v3224_v56 = vcombine.high %v6797_v13, %v7359_v55 }
 0x1d3   : > { %v4155_v4 = vcombine.low %v6886_v36, %v6876_v43  ;;  %v3258_v30 = vcombine.high %v6800_v31, %v7359_v55  ;;  %v6906_v10 = vrot.slane %v4257_v25, %v7382_v39  ;;  %v4666_v62 = vcombine.low %v2929_v45, %v2929_v45 }
 0x1d4   : > { %2952 = vrot.lane.b32.xlu0 %v4658_v32, %s4823_s22  ;;  %v1236_v2 = vpop.permute.xlu1 %1235  ;;  %4599 = vmatmul.mubr.msk.bf16.vlgmr.msra.gmra.mxu0 %vm839_vm14, %v4597_v12  ;;  %v6909_v34 = vrot.slane %v4189_v40, %v7382_v39  ;;  %v4659_v50 = vcombine.low %v2905_v63, %v2905_v63  ;;  %v4689_v14 = vcombine.low %v3368_v59, %v3368_v59  ;;  %v3372_v51 = vshrl.u32 %v3292_v57, 16 }
 0x1d5   : > { %v1208_v38 = vpop.permute.xlu0 %1207  ;;  %1328 = vmatprep.mubr.bf16.mxu0 %v7359_v55  ;;  %v4682_v26 = vcombine.low %v3344_v19, %v3344_v19  ;;  %v6912_v21 = vrot.slane %v4223_v60, %v7382_v39  ;;  %v3371_v13 = vpack.i.b16 %v3326_v11, %v3292_v57  ;;  %v3373_v31 = vshrl.u32 %v3326_v11, 16  ;;  %v7459_v60 = vld [vmem:[#allocation9_spill] sm:$0xff]  ;;  %v7460_v57 = vld [vmem:[#allocation8_spill] sm:$0xff] }
 0x1d6   : > { %3417 = vrot.lane.b32.xlu1 %v4688_v29, %s4821_s20  ;;  %v6916_v48 = vrot.slane %v4155_v4, %v7382_v39  ;;  %v3347_v6 = vpack.i.b16 %v3258_v30, %v3224_v56  ;;  %v3348_v33 = vshrl.u32 %v3224_v56, 16  ;;  %v3349_v9 = vshrl.u32 %v3258_v30, 16 }
 0x1d7   : > { %v4301_v32 = vpack.i.b16 %v6906_v10, %v6912_v21  ;;  %v4690_v29 = vcombine.low %v3371_v13, %v3371_v13  ;;  %v3374_v22 = vpack.i.b16 %v3373_v31, %v3372_v51  ;;  %v3829_v45 = vshrl.u32 %v6688_v42, 16 }
 0x1d8   : > { %3389 = vrot.lane.b32.xlu0 %v4681_v23, %s4821_s20  ;;  %v1240_v3 = vpop.permute.xlu1 %1239  ;;  %v4277_v12 = vpack.i.b16 %v6909_v34, %v6916_v48  ;;  %v4683_v23 = vcombine.low %v3347_v6, %v3347_v6  ;;  %v3350_v27 = vpack.i.b16 %v3349_v9, %v3348_v33  ;;  %v3805_v40 = vshrl.u32 %v6691_v41, 16 }
 0x1d9   : > { %v1212_v53 = vpop.permute.xlu0 %1211  ;;  %v4691_v63 = vcombine.low %v3374_v22, %v3374_v22  ;;  %v3828_v19 = vshrl.u32 %v6707_v0, 16  ;;  %v7461_v11 = vpack.i.b16 %v7459_v60, %v7460_v57  ;;  %v3804_v30 = vshrl.u32 %v6710_v54, 16 }
 0x1da   : > { %2984 = vrot.lane.b32.xlu1 %v4666_v62, %s4827_s26  ;;  %v4684_v56 = vcombine.low %v3350_v27, %v3350_v27  ;;  %v3799_v62 = vcombine.high %v6688_v42, %v7359_v55 }
 0x1db   : > { %v1274_v4 = vsel %vm465_vm3, %v7461_v11, %v6851_v52  ;;  %v3830_v6 = vpack.i.b16 %v3829_v45, %v3828_v19  ;;  %v3731_v52 = vcombine.high %v6691_v41, %v7359_v55  ;;  %v3806_v22 = vpack.i.b16 %v3805_v40, %v3804_v30 }
 0x1dc   : > { %2956 = vrot.lane.b32.xlu0 %v4659_v50, %s4827_s26  ;;  %v1244_v47 = vpop.permute.xlu1 %1243  ;;  %v7462_v50 = vld [vmem:[#allocation11_spill] sm:$0xff]  ;;  %v1276_v51 = vsel %vm469_vm4, %v1274_v4, %v1236_v2  ;;  %v3697_v2 = vcombine.high %v6710_v54, %v7359_v55  ;;  %v3835_v40 = vshrl.u32 %v3799_v62, 16 }
 0x1dd   : > { %v1216_v17 = vpop.permute.xlu0 %1215  ;;  %v1278_v9 = vsel %vm472_vm5, %v1276_v51, %v1240_v3  ;;  %v4710_v57 = vcombine.low %v3830_v6, %v3830_v6  ;;  %v4703_v30 = vcombine.low %v3806_v22, %v3806_v22  ;;  %v4303_v51 = vshrl.u32 %v6906_v10, 16 }
 0x1de   : > { %3421 = vrot.lane.b32.xlu1 %v4689_v14, %s4825_s24  ;;  %v7463_v14 = vld [vmem:[#allocation10_spill] sm:$0xff]  ;;  %v3716_v6 = vcombine.high %v6642_v15, %v6633_v49  ;;  %v3682_v22 = vcombine.high %v6659_v61, %v6648_v18  ;;  %v4278_v49 = vshrl.u32 %v6916_v48, 16 }
 0x1e0   : > { %3393 = vrot.lane.b32.xlu0 %v4682_v26, %s4825_s24  ;;  %v1248_v25 = vpop.permute.xlu1 %1247  ;;  %v7464_v26 = vpack.i.b16 %v7462_v50, %v7463_v14  ;;  %v3784_v50 = vcombine.high %v6639_v24, %v6630_v58  ;;  %v4279_v58 = vshrl.u32 %v6909_v34, 16  ;;  %v3750_v24 = vcombine.high %v6656_v7, %v6645_v20 }
 0x1e1   : > { %v1220_v59 = vpop.permute.xlu0 %1219  ;;  %v3730_v20 = vrot.slane %v3716_v6, %v7382_v39 }
 0x1e2   : > { %3425 = vrot.lane.b32.xlu1 %v4690_v29, %s4823_s22  ;;  %v1259_v13 = vsel %vm465_vm3, %v7464_v26, %v6859_v44  ;;  %v1280_v44 = vsel %vm475_vm6, %v1278_v9, %v1244_v47  ;;  %v3809_v47 = vpack.i.b16 %v3731_v52, %v3697_v2  ;;  %v3798_v15 = vrot.slane %v3784_v50, %v7382_v39 }
 0x1e3   : > { %v1261_v33 = vsel %vm469_vm4, %v1259_v13, %v1208_v38  ;;  %v1282_v38 = vsel %vm478_vm7, %v1280_v44, %v1248_v25  ;;  %v4280_v18 = vpack.i.b16 %v4279_v58, %v4278_v49  ;;  %v3764_v61 = vrot.slane %v3750_v24, %v7382_v39 }
 0x1e4   : > { %3397 = vrot.lane.b32.xlu0 %v4683_v23, %s4823_s22  ;;  %v1252_v31 = vpop.permute.xlu1 %1251  ;;  %v3765_v23 = vcombine.high %v6707_v0, %v7359_v55  ;;  %v1263_v27 = vsel %vm472_vm5, %v1261_v33, %v1212_v53  ;;  %v4704_v33 = vcombine.low %v3809_v47, %v3809_v47  ;;  %v4205_v47 = vcombine.high %v6909_v34, %v7359_v55 }
 0x1e5   : > { %v1224_v29 = vpop.permute.xlu0 %1223  ;;  %v1265_v45 = vsel %vm475_vm6, %v1263_v27, %v1216_v17  ;;  %v1284_v60 = vsel %vm481_vm8, %v1282_v38, %v1252_v31  ;;  %v3811_v17 = vshrl.u32 %v3731_v52, 16  ;;  %v4616_v31 = vld [vmem:[%s7263_s1 + $0x8] sm:$0xf]  ;;  %v3817_v50 = vshrl.u32 %v3730_v20, 16 }
 0x1e6   : > { %3429 = vrot.lane.b32.xlu1 %v4691_v63, %s4827_s26  ;;  %v3833_v3 = vpack.i.b16 %v3799_v62, %v3765_v23  ;;  %v1267_v19 = vsel %vm478_vm7, %v1265_v45, %v1220_v59  ;;  %v3810_v62 = vshrl.u32 %v3697_v2, 16  ;;  %v3696_v45 = vrot.slane %v3682_v22, %v7382_v39 }
 0x1e7   : > { %v1269_v63 = vsel %vm481_vm8, %v1267_v19, %v1224_v29  ;;  %v4302_v29 = vshrl.u32 %v6912_v21, 16  ;;  %v4273_v19 = vcombine.high %v6906_v10, %v7359_v55 }
 0x1e8   : > { %3401 = vrot.lane.b32.xlu0 %v4684_v56, %s4827_s26  ;;  %v1256_v53 = vpop.permute.xlu1 %1255  ;;  %v3834_v56 = vshrl.u32 %v3765_v23, 16  ;;  %v4711_v26 = vcombine.low %v3833_v3, %v3833_v3  ;;  %v3812_v9 = vpack.i.b16 %v3811_v17, %v3810_v62 }
 0x1e9   : > { %v1286_v11 = vsel %vm484_vm9, %v1284_v60, %v1256_v53  ;;  %v1228_v4 = vpop.permute.xlu0 %1227  ;;  %v4304_v44 = vpack.i.b16 %v4303_v51, %v4302_v29  ;;  %v4728_v53 = vcombine.low %v4280_v18, %v4280_v18  ;;  %v4285_v29 = vshrl.u32 %v4205_v47, 16 }
 0x1ea   : > { %v1271_v25 = vsel %vm484_vm9, %v1269_v63, %v1228_v4  ;;  %3879 = vrot.lane.b32.xlu1 %v4710_v57, %s4822_s21  ;;  %4617 = vmatprep.subr.msk.bf16.mxu0 %vm843_vm10, %v1286_v11  ;;  %v3836_v13 = vpack.i.b16 %v3835_v40, %v3834_v56  ;;  %v4705_v2 = vcombine.low %v3812_v9, %v3812_v9 }
 0x1eb   : > { %v1292_v59 = vsel %vm843_vm10, %v1271_v25, 0  ;;  %v4735_v3 = vcombine.low %v4304_v44, %v4304_v44  ;;  %v3839_v40 = vpack.i.b16 %v3798_v15, %v3764_v61  ;;  %v3815_v57 = vpack.i.b16 %v3730_v20, %v3696_v45 }
 0x1ec   : > { %3851 = vrot.lane.b32.xlu0 %v4703_v30, %s4822_s21  ;;  %1311 = vmatpush1.bf16.msra.mxu0 %v1292_v59  ;;  %v6969_v14 = vpop.permute.xlu1 %1788  ;;  %v4712_v27 = vcombine.low %v3836_v13, %v3836_v13  ;;  %v4239_v63 = vcombine.high %v6912_v21, %v7359_v55  ;;  %v4171_v11 = vcombine.high %v6916_v48, %v7359_v55  ;;  %v3841_v25 = vshrl.u32 %v3798_v15, 16 }
 0x1ed   : > { %v6977_v52 = vpop.permute.xlu0 %1760  ;;  %v4713_v30 = vcombine.low %v3839_v40, %v3839_v40  ;;  %v4706_v59 = vcombine.low %v3815_v57, %v3815_v57  ;;  %v3816_v13 = vshrl.u32 %v3696_v45, 16  ;;  %v4190_v40 = vcombine.high %v6873_v35, %v6857_v16 }
 0x1ee   : > { %3883 = vrot.lane.b32.xlu1 %v4711_v26, %s4824_s23  ;;  %v4307_v17 = vpack.i.b16 %v4273_v19, %v4239_v63  ;;  %v4283_v62 = vpack.i.b16 %v4205_v47, %v4171_v11  ;;  %v3840_v26 = vshrl.u32 %v3764_v61, 16  ;;  %v4308_v22 = vshrl.u32 %v4239_v63, 16 }
 0x1ef   : > { %4618 = vmatmul.mubr.msk.bf16.vlgmr.msra.gmra.mxu0 %vm839_vm14, %v4616_v31  ;;  %v3818_v24 = vpack.i.b16 %v3817_v50, %v3816_v13  ;;  %v4284_v49 = vshrl.u32 %v4171_v11, 16  ;;  %v3732_v47 = vcombine.high %v3730_v20, %v7359_v55  ;;  %v4224_v63 = vcombine.high %v6880_v8, %v6869_v46 }
 0x1f0   : > { %3855 = vrot.lane.b32.xlu0 %v4704_v33, %s4824_s23  ;;  %v6990_v23 = vpop.permute.xlu1 %1792  ;;  %2471 = vmatprep.mubr.bf16.mxu0 %v7359_v55  ;;  %v4736_v31 = vcombine.low %v4307_v17, %v4307_v17  ;;  %v3842_v6 = vpack.i.b16 %v3841_v25, %v3840_v26  ;;  %v4309_v33 = vshrl.u32 %v4273_v19, 16  ;;  %v4729_v58 = vcombine.low %v4283_v62, %v4283_v62 }
 0x1f1   : > { %v6994_v7 = vpop.permute.xlu0 %1764  ;;  %v4286_v57 = vpack.i.b16 %v4285_v29, %v4284_v49  ;;  %v3698_v16 = vcombine.high %v3696_v45, %v7359_v55  ;;  %v4204_v20 = vrot.slane %v4190_v40, %v7382_v39  ;;  %v4238_v25 = vrot.slane %v4224_v63, %v7382_v39  ;;  %v7468_v49 = vld [vmem:[#allocation22_spill] sm:$0xff] }
 0x1f2   : > { %3887 = vrot.lane.b32.xlu1 %v4712_v27, %s4826_s25  ;;  %v4258_v27 = vcombine.high %v6866_v28, %v6848_v1  ;;  %v4310_v18 = vpack.i.b16 %v4309_v33, %v4308_v22  ;;  %v3766_v1 = vcombine.high %v3764_v61, %v7359_v55  ;;  %v4156_v28 = vcombine.high %v6886_v36, %v6876_v43  ;;  %v7467_v22 = vld [vmem:[#allocation18_spill] sm:$0xff] }
 0x1f3   : > { %v4730_v46 = vcombine.low %v4286_v57, %v4286_v57  ;;  %v3821_v8 = vpack.i.b16 %v3732_v47, %v3698_v16  ;;  %v3823_v50 = vshrl.u32 %v3732_v47, 16  ;;  %v3822_v33 = vshrl.u32 %v3698_v16, 16 }
 0x1f4   : > { %3859 = vrot.lane.b32.xlu0 %v4705_v2, %s4826_s25  ;;  %v7000_v38 = vpop.permute.xlu1 %1796  ;;  %v4714_v2 = vcombine.low %v3842_v6, %v3842_v6  ;;  %v4272_v35 = vrot.slane %v4258_v27, %v7382_v39  ;;  %v4737_v11 = vcombine.low %v4310_v18, %v4310_v18  ;;  %v4170_v43 = vrot.slane %v4156_v28, %v7382_v39 }
 0x1f5   : > { %v7004_v60 = vpop.permute.xlu0 %1768  ;;  %v3846_v62 = vshrl.u32 %v3766_v1, 16  ;;  %v4708_v13 = vcombine.low %v3821_v8, %v3821_v8  ;;  %v1712_v27 = vpack.i.b16 %v7468_v49, %v7467_v22  ;;  %v4314_v57 = vshrl.u32 %v4238_v25, 16 }
 0x1f6   : > { %4353 = vrot.lane.b32.xlu1 %v4735_v3, %s4822_s21  ;;  %v3800_v3 = vcombine.high %v3798_v15, %v7359_v55  ;;  %v4315_v39 = vshrl.u32 %v4272_v35, 16  ;;  %v4291_v47 = vshrl.u32 %v4204_v20, 16  ;;  %v4290_v16 = vshrl.u32 %v4170_v43, 16 }
 0x1f8   : > { %4325 = vrot.lane.b32.xlu0 %v4728_v53, %s4822_s21  ;;  %v7014_v4 = vpop.permute.xlu1 %2374  ;;  %v4707_v53 = vcombine.low %v3818_v24, %v3818_v24  ;;  %v3847_v61 = vshrl.u32 %v3800_v3, 16  ;;  %v7466_v24 = vld [vmem:[#allocation17_spill] sm:$0xff]  ;;  %v4316_v28 = vpack.i.b16 %v4315_v39, %v4314_v57 }
 0x1f9   : > { %v7016_v56 = vpop.permute.xlu0 %2346  ;;  %v7469_v57 = vld [vmem:[#allocation21_spill] sm:$0xff] }
 0x1fa   : > { %3891 = vrot.lane.b32.xlu1 %v4713_v30, %s4821_s20  ;;  %v3845_v30 = vpack.i.b16 %v3800_v3, %v3766_v1  ;;  %v3848_v6 = vpack.i.b16 %v3847_v61, %v3846_v62  ;;  %v3824_v3 = vpack.i.b16 %v3823_v50, %v3822_v33  ;;  %v4292_v50 = vpack.i.b16 %v4291_v47, %v4290_v16  ;;  %v7470_v47 = vld [vmem:[#allocation2_spill] sm:$0xff] }
 0x1fb   : > { %v7473_v16 = vld [vmem:[#allocation30_spill] sm:$0xff] }
 0x1fc   : > { %3863 = vrot.lane.b32.xlu0 %v4706_v59, %s4821_s20  ;;  %v7020_v51 = vpop.permute.xlu1 %1800  ;;  %v4715_v45 = vcombine.low %v3845_v30, %v3845_v30  ;;  %v4313_v59 = vpack.i.b16 %v4272_v35, %v4238_v25  ;;  %v4716_v63 = vcombine.low %v3848_v6, %v3848_v6  ;;  %v1816_v30 = vsel %vm465_vm3, %v1712_v27, %v6977_v52 }
 0x1fd   : > { %v4709_v61 = vcombine.low %v3824_v3, %v3824_v3 }
 0x1fe   : > { %v7022_v9 = vpop.permute.xlu0 %1772  ;;  %4357 = vrot.lane.b32.xlu1 %v4736_v31, %s4824_s23  ;;  %v4289_v31 = vpack.i.b16 %v4204_v20, %v4170_v43  ;;  %v4738_v18 = vcombine.low %v4313_v59, %v4313_v59  ;;  %v1818_v59 = vsel %vm469_vm4, %v1816_v30, %v6994_v7 }
 0x1ff   : > { %v1820_v52 = vsel %vm472_vm5, %v1818_v59, %v7004_v60 }
 0x200   : > { %4329 = vrot.lane.b32.xlu0 %v4729_v58, %s4824_s23  ;;  %v7028_v44 = vpop.permute.xlu1 %2378  ;;  %v7465_v58 = vld [vmem:[#allocation31_spill] sm:$0xff]  ;;  %v1822_v7 = vsel %vm475_vm6, %v1820_v52, %v7022_v9 }
 0x201   : > { %v1736_v29 = vpack.i.b16 %v7466_v24, %v7465_v58 }
 0x202   : > { %v7033_v19 = vpop.permute.xlu0 %2350  ;;  %3895 = vrot.lane.b32.xlu1 %v4714_v2, %s4825_s24 }
 0x203   : > { %v1831_v1 = vsel %vm465_vm3, %v1736_v29, %v6969_v14  ;;  %v4732_v29 = vcombine.low %v4292_v50, %v4292_v50 }
 0x204   : > { %3867 = vrot.lane.b32.xlu0 %v4707_v53, %s4825_s24  ;;  %v1805_v15 = vpop.permute.xlu1 %1804  ;;  %v4731_v53 = vcombine.low %v4289_v31, %v4289_v31 }
 0x206   : > { %v1777_v17 = vpop.permute.xlu0 %1776  ;;  %4361 = vrot.lane.b32.xlu1 %v4737_v11, %s4826_s25  ;;  %v4274_v11 = vcombine.high %v4272_v35, %v7359_v55  ;;  %v4240_v35 = vcombine.high %v4238_v25, %v7359_v55 }
 0x207   : > { %v1824_v25 = vsel %vm478_vm7, %v1822_v7, %v1777_v17 }
 0x208   : > { %4333 = vrot.lane.b32.xlu0 %v4730_v46, %s4826_s25  ;;  %v7050_v36 = vpop.permute.xlu1 %2382  ;;  %v1833_v46 = vsel %vm469_vm4, %v1831_v1, %v6990_v23  ;;  %v4319_v31 = vpack.i.b16 %v4274_v11, %v4240_v35  ;;  %v4320_v39 = vshrl.u32 %v4240_v35, 16 }
 0x209   : > { %v1835_v14 = vsel %vm472_vm5, %v1833_v46, %v7000_v38  ;;  %v4739_v38 = vcombine.low %v4316_v28, %v4316_v28  ;;  %v7472_v28 = vld [vmem:[#allocation16_spill] sm:$0xff] }
 0x20a   : > { %v7052_v26 = vpop.permute.xlu0 %2354  ;;  %3899 = vrot.lane.b32.xlu1 %v4715_v45, %s4823_s22  ;;  %v4206_v45 = vcombine.high %v4204_v20, %v7359_v55  ;;  %v1837_v23 = vsel %vm475_vm6, %v1835_v14, %v7020_v51  ;;  %v4172_v20 = vcombine.high %v4170_v43, %v7359_v55  ;;  %v4321_v51 = vshrl.u32 %v4274_v11, 16 }
 0x20b   : > { %v4740_v27 = vcombine.low %v4319_v31, %v4319_v31  ;;  %v7474_v11 = vpack.i.b16 %v7472_v28, %v7473_v16  ;;  %v4650_v31 = vld [vmem:[%s7263_s1 + $0x10] sm:$0xf] }
 0x20c   : > { %3871 = vrot.lane.b32.xlu0 %v4708_v13, %s4823_s22  ;;  %v1809_v2 = vpop.permute.xlu1 %1808  ;;  %v1839_v13 = vsel %vm478_vm7, %v1837_v23, %v1805_v15  ;;  %v4295_v33 = vpack.i.b16 %v4206_v45, %v4172_v20  ;;  %v4297_v9 = vshrl.u32 %v4206_v45, 16  ;;  %v4296_v22 = vshrl.u32 %v4172_v20, 16  ;;  %v4461_v20 = vld [vmem:[%s7264_s2] sm:$0xff] }
 0x20d   : > { %v1841_v60 = vsel %vm481_vm8, %v1839_v13, %v1809_v2  ;;  %v4322_v2 = vpack.i.b16 %v4321_v51, %v4320_v39  ;;  %v2402_v30 = vsel %vm465_vm3, %v7474_v11, %v7016_v56 }
 0x20e   : > { %v1781_v40 = vpop.permute.xlu0 %1780  ;;  %4365 = vrot.lane.b32.xlu1 %v4738_v18, %s4821_s20  ;;  %v4633_v18 = vld [vmem:[%s7263_s1 + $0xc] sm:$0xf] }
 0x20f   : > { %v1826_v58 = vsel %vm481_vm8, %v1824_v25, %v1781_v40  ;;  %v4733_v40 = vcombine.low %v4295_v33, %v4295_v33  ;;  %v4741_v45 = vcombine.low %v4322_v2, %v4322_v2 }
 0x210   : > { %4337 = vrot.lane.b32.xlu0 %v4731_v53, %s4821_s20  ;;  %v2387_v8 = vpop.permute.xlu1 %2386  ;;  %v4298_v53 = vpack.i.b16 %v4297_v9, %v4296_v22 }
 0x212   : > { %v2359_v62 = vpop.permute.xlu0 %2358  ;;  %3903 = vrot.lane.b32.xlu1 %v4716_v63, %s4827_s26  ;;  %v7471_v63 = vpack.i.b16 %v7469_v57, %v7470_v47  ;;  %v4734_v50 = vcombine.low %v4298_v53, %v4298_v53  ;;  %v7477_v53 = vld [vmem:[#allocation32_spill] sm:$0xff] }
 0x214   : > { %3875 = vrot.lane.b32.xlu0 %v4709_v61, %s4827_s26  ;;  %v1813_v6 = vpop.permute.xlu1 %1812  ;;  %v2417_v1 = vsel %vm465_vm3, %v7471_v63, %v7014_v4  ;;  %v2404_v4 = vsel %vm469_vm4, %v2402_v30, %v7033_v19 }
 0x215   : > { %v1843_v43 = vsel %vm484_vm9, %v1841_v60, %v1813_v6  ;;  %v2419_v46 = vsel %vm469_vm4, %v2417_v1, %v7028_v44  ;;  %v2406_v35 = vsel %vm472_vm5, %v2404_v4, %v7052_v26 }
 0x216   : > { %v1785_v24 = vpop.permute.xlu0 %1784  ;;  %4369 = vrot.lane.b32.xlu1 %v4739_v38, %s4825_s24  ;;  %4634 = vmatprep.subr.msk.bf16.mxu1 %vm843_vm10, %v1843_v43  ;;  %v2421_v59 = vsel %vm472_vm5, %v2419_v46, %v7050_v36  ;;  %v2408_v44 = vsel %vm475_vm6, %v2406_v35, %v2359_v62 }
 0x217   : > { %v1828_v15 = vsel %vm484_vm9, %v1826_v58, %v1785_v24  ;;  %v2423_v56 = vsel %vm475_vm6, %v2421_v59, %v2387_v8 }
 0x218   : > { %v1849_v17 = vsel %vm843_vm10, %v1828_v15, 0  ;;  %4341 = vrot.lane.b32.xlu0 %v4732_v29, %s4825_s24  ;;  %v2391_v49 = vpop.permute.xlu1 %2390 }
 0x219   : > { %1868 = vmatpush1.bf16.msra.mxu1 %v1849_v17  ;;  %v2425_v52 = vsel %vm478_vm7, %v2423_v56, %v2391_v49  ;;  %v7479_v56 = vld [vmem:[#allocation14_spill] sm:$0xff] }
 0x21a   : > { %v2363_v3 = vpop.permute.xlu0 %2362  ;;  %4373 = vrot.lane.b32.xlu1 %v4740_v27, %s4823_s22 }
 0x21b   : > { %v2410_v19 = vsel %vm478_vm7, %v2408_v44, %v2363_v3  ;;  %v7480_v44 = vld [vmem:[#allocation33_spill] sm:$0xff] }
 0x21c   : > { %4345 = vrot.lane.b32.xlu0 %v4733_v40, %s4823_s22  ;;  %4635 = vmatmul.mubr.msk.bf16.vlgmr.msra.gmra.mxu1 %vm839_vm14, %v4633_v18  ;;  %v2395_v61 = vpop.permute.xlu1 %2394  ;;  %v7475_v18 = vpack.i.b16 %v6444_v37, %v6461_v5  ;;  %v7476_v40 = vld [vmem:[#allocation24_spill] sm:$0xff] }
 0x21d   : > { %3057 = vmatprep.mubr.bf16.mxu1 %v7359_v55  ;;  %v2427_v23 = vsel %vm481_vm8, %v2425_v52, %v2395_v61  ;;  %v7478_v57 = vpack.i.b16 %v7476_v40, %v7477_v53  ;;  %v3353_v52 = vpack.i.b16 %v7480_v44, %v7479_v56  ;;  %v7484_v56 = vpack.i.b16 %v6691_v41, %v6710_v54 }
 0x21e   : > { %v2367_v14 = vpop.permute.xlu0 %2366  ;;  %4377 = vrot.lane.b32.xlu1 %v4741_v45, %s4827_s26 }
 0x21f   : > { %v2412_v26 = vsel %vm481_vm8, %v2410_v19, %v2367_v14 }
 0x220   : > { %4349 = vrot.lane.b32.xlu0 %v4734_v50, %s4827_s26  ;;  %v2399_v36 = vpop.permute.xlu1 %2398  ;;  %s4747_s26 = sshll.u32 %s7490_s12, 4 }
 0x221   : > { %v2429_v8 = vsel %vm484_vm9, %v2427_v23, %v2399_v36  ;;  %v7481_v23 = vld [vmem:[#allocation15_spill] sm:$0xff]  ;;  %s206_s29 = scalar_lea.vmem %s7265_s3, %s4747_s26 }
 0x222   : > { %v2371_v7 = vpop.permute.xlu0 %2370  ;;  %4651 = vmatprep.subr.msk.bf16.mxu0 %vm843_vm10, %v2429_v8  ;;  %v7482_v36 = vld [vmem:[#allocation19_spill] sm:$0xff]  ;;  %v4667_v8 = vld [vmem:[%s7263_s1 + $0x14] sm:$0xf] }
 0x223   : > { %v2414_v62 = vsel %vm484_vm9, %v2412_v26, %v2371_v7 }
 0x224   : > { %v2435_v13 = vsel %vm843_vm10, %v2414_v62, 0  ;;  %4464 = vperm.xlu0 %4785, %v4461_v20   ;;  %v2961_v38 = vpop.permute.xlu1 %2960  ;;  %v3329_v20 = vpack.i.b16 %v7482_v36, %v7481_v23 }
 0x225   : > { %2454 = vmatpush1.bf16.msra.mxu0 %v2435_v13  ;;  %v3003_v3 = vsel %vm465_vm3, %v7475_v18, %v2961_v38 }
 0x226   : > { %v2933_v25 = vpop.permute.xlu0 %2932 }
 0x227   : > { %v2988_v47 = vsel %vm465_vm3, %v7478_v57, %v2933_v25 }
 0x228   : > { %4652 = vmatmul.mubr.msk.bf16.vlgmr.msra.gmra.mxu0 %vm839_vm14, %v4650_v31  ;;  %v2965_v60 = vpop.permute.xlu1 %2964 }
 0x229   : > { %3502 = vmatprep.mubr.bf16.mxu0 %v7359_v55  ;;  %v3005_v63 = vsel %vm469_vm4, %v3003_v3, %v2965_v60  ;;  %v4692_v3 = vld [vmem:[%s7263_s1 + $0x18] sm:$0xf] }
 0x22a   : > { %v2937_v6 = vpop.permute.xlu0 %2936 }
 0x22b   : > { %v2990_v28 = vsel %vm469_vm4, %v2988_v47, %v2937_v6 }
 0x22c   : > { %v2969_v33 = vpop.permute.xlu1 %2968 }
 0x22d   : > { %v3007_v16 = vsel %vm472_vm5, %v3005_v63, %v2969_v33 }
 0x22e   : > { %v2941_v51 = vpop.permute.xlu0 %2940 }
 0x22f   : > { %v2992_v30 = vsel %vm472_vm5, %v2990_v28, %v2941_v51 }
 0x230   : > { %v3406_v58 = vpop.permute.xlu1 %3405 }
 0x231   : > { %v3448_v62 = vsel %vm465_vm3, %v3353_v52, %v3406_v58 }
 0x232   : > { %v3378_v43 = vpop.permute.xlu0 %3377 }
 0x233   : > { %v3433_v13 = vsel %vm465_vm3, %v3329_v20, %v3378_v43 }
 0x234   : > { %v2973_v24 = vpop.permute.xlu1 %2972 }
 0x235   : > { %v3009_v46 = vsel %vm475_vm6, %v3007_v16, %v2973_v24 }
 0x236   : > { %v2945_v29 = vpop.permute.xlu0 %2944 }
 0x237   : > { %v2994_v37 = vsel %vm475_vm6, %v2992_v30, %v2945_v29 }
 0x238   : > { %v3410_v9 = vpop.permute.xlu1 %3409 }
 0x239   : > { %v3450_v38 = vsel %vm469_vm4, %v3448_v62, %v3410_v9 }
 0x23a   : > { %v3382_v15 = vpop.permute.xlu0 %3381 }
 0x23b   : > { %v3435_v25 = vsel %vm469_vm4, %v3433_v13, %v3382_v15 }
 0x23c   : > { %v2977_v39 = vpop.permute.xlu1 %2976 }
 0x23d   : > { %v3011_v5 = vsel %vm478_vm7, %v3009_v46, %v2977_v39 }
 0x23e   : > { %v2949_v17 = vpop.permute.xlu0 %2948 }
 0x23f   : > { %v2996_v61 = vsel %vm478_vm7, %v2994_v37, %v2949_v17 }
 0x240   : > { %v3414_v22 = vpop.permute.xlu1 %3413 }
 0x241   : > { %v3452_v60 = vsel %vm472_vm5, %v3450_v38, %v3414_v22 }
 0x242   : > { %v3386_v49 = vpop.permute.xlu0 %3385 }
 0x243   : > { %v3437_v33 = vsel %vm472_vm5, %v3435_v25, %v3386_v49 }
 0x244   : > { %v2981_v27 = vpop.permute.xlu1 %2980 }
 0x245   : > { %v3013_v45 = vsel %vm481_vm8, %v3011_v5, %v2981_v27 }
 0x246   : > { %v2953_v2 = vpop.permute.xlu0 %2952 }
 0x247   : > { %v2998_v59 = vsel %vm481_vm8, %v2996_v61, %v2953_v2 }
 0x248   : > { %v3418_v1 = vpop.permute.xlu1 %3417 }
 0x249   : > { %v3454_v51 = vsel %vm475_vm6, %v3452_v60, %v3418_v1 }
 0x24a   : > { %v3390_v11 = vpop.permute.xlu0 %3389 }
 0x24b   : > { %v3439_v58 = vsel %vm475_vm6, %v3437_v33, %v3390_v11 }
 0x24c   : > { %v2985_v4 = vpop.permute.xlu1 %2984 }
 0x24d   : > { %v3015_v14 = vsel %vm484_vm9, %v3013_v45, %v2985_v4 }
 0x24e   : > { %v2957_v50 = vpop.permute.xlu0 %2956  ;;  %4668 = vmatprep.subr.msk.bf16.mxu1 %vm843_vm10, %v3015_v14 }
 0x24f   : > { %v3000_v35 = vsel %vm484_vm9, %v2998_v59, %v2957_v50 }
 0x250   : > { %v3021_v19 = vsel %vm843_vm10, %v3000_v35, 0  ;;  %v3422_v26 = vpop.permute.xlu1 %3421  ;;  %v7483_v35 = vpack.i.b16 %v6688_v42, %v6707_v0 }
 0x251   : > { %3040 = vmatpush1.bf16.msra.mxu1 %v3021_v19  ;;  %v3456_v24 = vsel %vm478_vm7, %v3454_v51, %v3422_v26 }
 0x252   : > { %v3394_v7 = vpop.permute.xlu0 %3393 }
 0x253   : > { %v3441_v43 = vsel %vm478_vm7, %v3439_v58, %v3394_v7  ;;  %v7181_v39 = vpop.f32.mrf.mxu1 }
 0x254   : > { %4669 = vmatmul.mubr.msk.bf16.vlgmr.msra.gmra.mxu1 %vm839_vm14, %v4667_v8  ;;  %v3426_v31 = vpop.permute.xlu1 %3425 }
 0x255   : > { %3976 = vmatprep.mubr.bf16.mxu1 %v7359_v55  ;;  %v3458_v29 = vsel %vm481_vm8, %v3456_v24, %v3426_v31  ;;  %v7187_v27 = vpop.f32.mrf.mxu1 }
 0x256   : > { %v3398_v6 = vpop.permute.xlu0 %3397 }
 0x257   : > { %v3443_v15 = vsel %vm481_vm8, %v3441_v43, %v3398_v6  ;;  %v934_v40 = vpop.f32.mrf.mxu1  ;;  %v4717_v6 = vld [vmem:[%s7263_s1 + $0x1c] sm:$0xf] }
 0x258   : > { %v3430_v9 = vpop.permute.xlu1 %3429  ;;  %v4742_v40 = vld [vmem:[%s7263_s1 + $0x20] sm:$0xf] }
 0x259   : > { %v3460_v17 = vsel %vm484_vm9, %v3458_v29, %v3430_v9  ;;  %v935_v57 = vpop.f32.mrf.mxu1 }
 0x25a   : > { %v3402_v22 = vpop.permute.xlu0 %3401  ;;  %4693 = vmatprep.subr.msk.bf16.mxu0 %vm843_vm10, %v3460_v17 }
 0x25b   : > { %v3445_v49 = vsel %vm484_vm9, %v3443_v15, %v3402_v22 }
 0x25c   : > { %v3466_v2 = vsel %vm843_vm10, %v3445_v49, 0  ;;  %v3880_v18 = vpop.permute.xlu1 %3879 }
 0x25d   : > { %3485 = vmatpush1.bf16.msra.mxu0 %v3466_v2 }
 0x25e   : > { %v3852_v53 = vpop.permute.xlu0 %3851 }
 0x25f   : > { %v3907_v44 = vsel %vm465_vm3, %v7484_v56, %v3852_v53 }
 0x260   : > { %4694 = vmatmul.mubr.msk.bf16.vlgmr.msra.gmra.mxu0 %vm839_vm14, %v4692_v3  ;;  %v3884_v47 = vpop.permute.xlu1 %3883 }
 0x261   : > { %4450 = vmatprep.mubr.bf16.mxu0 %v7359_v55  ;;  %v3922_v55 = vsel %vm465_vm3, %v7483_v35, %v3880_v18 }
 0x262   : > { %v3856_v63 = vpop.permute.xlu0 %3855  ;;  %v3924_v52 = vsel %vm469_vm4, %v3922_v55, %v3884_v47 }
 0x263   : > { %v3909_v23 = vsel %vm469_vm4, %v3907_v44, %v3856_v63 }
 0x264   : > { %v3888_v1 = vpop.permute.xlu1 %3887 }
 0x265   : > { %v3926_v36 = vsel %vm472_vm5, %v3924_v52, %v3888_v1 }
 0x266   : > { %v3860_v28 = vpop.permute.xlu0 %3859 }
 0x267   : > { %v3911_v26 = vsel %vm472_vm5, %v3909_v23, %v3860_v28 }
 0x268   : > { %v4354_v16 = vpop.permute.xlu1 %4353 }
 0x269   : > { %v4396_v51 = vsel %vm465_vm3, %v4301_v32, %v4354_v16 }
 0x26a   : > { %v4326_v11 = vpop.permute.xlu0 %4325 }
 0x26b   : > { %v4381_v58 = vsel %vm465_vm3, %v4277_v12, %v4326_v11 }
 0x26c   : > { %v3892_v30 = vpop.permute.xlu1 %3891 }
 0x26d   : > { %v3928_v8 = vsel %vm475_vm6, %v3926_v36, %v3892_v30 }
 0x26e   : > { %v3864_v46 = vpop.permute.xlu0 %3863 }
 0x26f   : > { %v3913_v42 = vsel %vm475_vm6, %v3911_v26, %v3864_v46 }
 0x270   : > { %v4358_v37 = vpop.permute.xlu1 %4357 }
 0x271   : > { %v4398_v24 = vsel %vm469_vm4, %v4396_v51, %v4358_v37 }
 0x272   : > { %v4330_v5 = vpop.permute.xlu0 %4329 }
 0x273   : > { %v4383_v29 = vsel %vm469_vm4, %v4381_v58, %v4330_v5 }
 0x274   : > { %v3896_v61 = vpop.permute.xlu1 %3895 }
 0x275   : > { %v3930_v0 = vsel %vm478_vm7, %v3928_v8, %v3896_v61 }
 0x276   : > { %v3868_v45 = vpop.permute.xlu0 %3867 }
 0x277   : > { %v3915_v41 = vsel %vm478_vm7, %v3913_v42, %v3868_v45 }
 0x278   : > { %v4362_v4 = vpop.permute.xlu1 %4361 }
 0x279   : > { %v4400_v9 = vsel %vm472_vm5, %v4398_v24, %v4362_v4 }
 0x27a   : > { %v4334_v59 = vpop.permute.xlu0 %4333 }
 0x27b   : > { %v4385_v17 = vsel %vm472_vm5, %v4383_v29, %v4334_v59 }
 0x27c   : > { %v3900_v14 = vpop.permute.xlu1 %3899 }
 0x27d   : > { %v3932_v54 = vsel %vm481_vm8, %v3930_v0, %v3900_v14 }
 0x27e   : > { %v3872_v50 = vpop.permute.xlu0 %3871 }
 0x27f   : > { %v3917_v62 = vsel %vm481_vm8, %v3915_v41, %v3872_v50 }
 0x280   : > { %v4366_v19 = vpop.permute.xlu1 %4365 }
 0x281   : > { %v4402_v10 = vsel %vm475_vm6, %v4400_v9, %v4366_v19 }
 0x282   : > { %v4338_v20 = vpop.permute.xlu0 %4337 }
 0x283   : > { %v4387_v21 = vsel %vm475_vm6, %v4385_v17, %v4338_v20 }
 0x284   : > { %v3904_v7 = vpop.permute.xlu1 %3903 }
 0x285   : > { %v3934_v13 = vsel %vm484_vm9, %v3932_v54, %v3904_v7 }
 0x286   : > { %v3876_v38 = vpop.permute.xlu0 %3875  ;;  %4718 = vmatprep.subr.msk.bf16.mxu1 %vm843_vm10, %v3934_v13 }
 0x287   : > { %v3919_v31 = vsel %vm484_vm9, %v3917_v62, %v3876_v38 }
 0x288   : > { %v3940_v25 = vsel %vm843_vm10, %v3919_v31, 0  ;;  %v4370_v60 = vpop.permute.xlu1 %4369 }
 0x289   : > { %3959 = vmatpush1.bf16.msra.mxu1 %v3940_v25  ;;  %v4404_v32 = vsel %vm478_vm7, %v4402_v10, %v4370_v60 }
 0x28a   : > { %v4342_v33 = vpop.permute.xlu0 %4341 }
 0x28b   : > { %v4389_v34 = vsel %vm478_vm7, %v4387_v21, %v4342_v33 }
 0x28c   : > { %4719 = vmatmul.mubr.msk.bf16.vlgmr.msra.gmra.mxu1 %vm839_vm14, %v4717_v6  ;;  %v4374_v43 = vpop.permute.xlu1 %4373 }
 0x28d   : > { %v4406_v48 = vsel %vm481_vm8, %v4404_v32, %v4374_v43 }
 0x28e   : > { %v4346_v15 = vpop.permute.xlu0 %4345 }
 0x28f   : > { %v4391_v22 = vsel %vm481_vm8, %v4389_v34, %v4346_v15 }
 0x290   : > { %v4378_v12 = vpop.permute.xlu1 %4377 }
 0x291   : > { %v4408_v49 = vsel %vm484_vm9, %v4406_v48, %v4378_v12 }
 0x292   : > { %v4350_v2 = vpop.permute.xlu0 %4349  ;;  %4743 = vmatprep.subr.msk.bf16.mxu0 %vm843_vm10, %v4408_v49 }
 0x293   : > { %v4393_v18 = vsel %vm484_vm9, %v4391_v22, %v4350_v2 }
 0x294   : > { %v4414_v3 = vsel %vm843_vm10, %v4393_v18, 0  ;;  %v882_v53 = vpop.f32.mrf.mxu0 }
 0x295   : > { %4433 = vmatpush1.bf16.msra.mxu0 %v4414_v3  ;;  %v931_v57 = vadd.f32 %v7181_v39, %v882_v53 }
 0x296   : > { %v884_v47 = vpop.f32.mrf.mxu0 }
 0x297   : > { %v933_v63 = vadd.f32 %v7187_v27, %v884_v47 }
 0x298   : > { %4744 = vmatmul.mubr.msk.bf16.vlgmr.msra.gmra.mxu0 %vm839_vm14, %v4742_v40  ;;  %v886_v1 = vpop.f32.mrf.mxu0 }
 0x29a   : > { %v887_v28 = vpop.f32.mrf.mxu0 }
 0x29f   : > { %v4465_v6 = vpop.permute.xlu0 %4464 }
 0x2af   : > { %v1330_v16 = vpop.f32.mrf.mxu0 }
 0x2b0   : > { %v1337_v11 = vadd.f32 %v1330_v16, %v931_v57 }
 0x2b1   : > { %v1332_v30 = vpop.f32.mrf.mxu0 }
 0x2b2   : > { %v1338_v46 = vadd.f32 %v1332_v30, %v933_v63 }
 0x2b3   : > { %v1334_v37 = vpop.f32.mrf.mxu0 }
 0x2b5   : > { %v1335_v5 = vpop.f32.mrf.mxu0 }
 0x2dc   : > { %v1887_v61 = vpop.f32.mrf.mxu1 }
 0x2dd   : > { %v1894_v45 = vadd.f32 %v1887_v61, %v1337_v11 }
 0x2de   : > { %v1889_v4 = vpop.f32.mrf.mxu1 }
 0x2df   : > { %v1895_v59 = vadd.f32 %v1889_v4, %v1338_v46 }
 0x2e0   : > { %v1891_v14 = vpop.f32.mrf.mxu1 }
 0x2e2   : > { %v1892_v50 = vpop.f32.mrf.mxu1 }
 0x2e8   : > { %v2473_v39 = vpop.f32.mrf.mxu0 }
 0x2e9   : > { %v2480_v35 = vadd.f32 %v2473_v39, %v1894_v45 }
 0x2ea   : > { %v2475_v55 = vpop.f32.mrf.mxu0 }
 0x2eb   : > { %v2481_v56 = vadd.f32 %v2475_v55, %v1895_v59 }
 0x2ec   : > { %v2477_v44 = vpop.f32.mrf.mxu0 }
 0x2ee   : > { %v2478_v27 = vpop.f32.mrf.mxu0 }
 0x314   : > { %v3059_v52 = vpop.f32.mrf.mxu1 }
 0x315   : > { %v3066_v7 = vadd.f32 %v3059_v52, %v2480_v35 }
 0x316   : > { %v3061_v19 = vpop.f32.mrf.mxu1 }
 0x317   : > { %v3067_v13 = vadd.f32 %v3061_v19, %v2481_v56 }
 0x318   : > { %v3063_v23 = vpop.f32.mrf.mxu1 }
 0x31a   : > { %v3064_v36 = vpop.f32.mrf.mxu1 }
 0x320   : > { %v3504_v20 = vpop.f32.mrf.mxu0 }
 0x321   : > { %v3511_v38 = vadd.f32 %v3504_v20, %v3066_v7 }
 0x322   : > { %v3506_v26 = vpop.f32.mrf.mxu0 }
 0x323   : > { %v3512_v31 = vadd.f32 %v3506_v26, %v3067_v13 }
 0x324   : > { %v3508_v8 = vpop.f32.mrf.mxu0 }
 0x326   : > { %v3509_v42 = vpop.f32.mrf.mxu0 }
 0x34c   : > { %v3978_v0 = vpop.f32.mrf.mxu1 }
 0x34d   : > { %v3985_v25 = vadd.f32 %v3978_v0, %v3511_v38 }
 0x34e   : > { %v3980_v41 = vpop.f32.mrf.mxu1 }
 0x34f   : > { %v3986_v33 = vadd.f32 %v3980_v41, %v3512_v31 }
 0x350   : > { %v3982_v54 = vpop.f32.mrf.mxu1 }
 0x352   : > { %v3983_v62 = vpop.f32.mrf.mxu1 }
 0x358   : > { %v4452_v60 = vpop.f32.mrf.mxu0 }
 0x359   : > { %v4459_v51 = vadd.f32 %v4452_v60, %v3985_v25 }
 0x35a   : > { %v4454_v58 = vpop.f32.mrf.mxu0 }
 0x35b   : > { %v4460_v24 = vadd.f32 %v4454_v58, %v3986_v33  ;;  %v4467_v43 = vadd.f32 %v4465_v6, %v4459_v51 }
 0x35c   : > { %v4456_v29 = vpop.f32.mrf.mxu0 }
 0x35d   : > { %v4468_v9 = vadd.f32 %v4465_v6, %v4460_v24  ;;  %4469 = vst [vmem:[%s206_s29] sm:$0xff] %v4467_v43 }
 0x35e   : > { %v4457_v15 = vpop.f32.mrf.mxu0 }
 0x35f   : > { %4470 = vst [vmem:[%s206_s29 + $0x8] sm:$0xff] %v4468_v9 }
 0x360 PF: > { %s13_s14 = sadd.s32 1, %s4816_s14   ;;  %s7485_s12 = smov %s4812_s13 }
 0x361   : > { %p10_p5 = scmp.ge.s32.totalorder %s13_s14, 4   ;;  %s7486_s13 = smov %s7488_s15 }
 0x363   :  { %12 = sbr.rel (!%p10_p5) target bundleno = 2 (0x2), region = 70 }

</bundles_post_ra>
